<compile_context>
chip_gen: v7x
topology: tpu7x:2x2x1
jax: 0.10.0
libtpu: 0.0.40
codegen_flags: <defaults>
</compile_context>

<pallas_src>
import functools

import jax
import jax.numpy as jnp
from jax.experimental import pallas as pl
from jax.experimental.pallas import tpu as pltpu

# ----------------------------- configuration -----------------------------
IMG = 16          # input spatial size (processor resize is skipped, see TODO)
CH = 3            # RGB
PATCH = 8         # vision_config.patch_size
HIDDEN = 32       # vision_config.hidden_size (emb_dim)
HEADS = 4
HEAD_DIM = HIDDEN // HEADS
MLP = 64
LAYERS = 2
NUM_PATCHES = (IMG // PATCH) ** 2  # 4


# ------------------------------ fused kernel ------------------------------
def _siglip_fused_kernel(
    # patch embedding
    patches_ref, pw_ref, pb_ref, pos_ref,
    # stacked encoder-layer weights (leading LAYERS axis)
    ln1_g_ref, ln1_b_ref, qkv_w_ref, qkv_b_ref, ow_ref, ob_ref,
    ln2_g_ref, ln2_b_ref, fc1_w_ref, fc1_b_ref, fc2_w_ref, fc2_b_ref,
    # post layernorm
    post_g_ref, post_b_ref,
    # attention-pooling head
    probe_ref, in_w_ref, in_b_ref, out_w_ref, out_b_ref,
    hln_g_ref, hln_b_ref, hfc1_w_ref, hfc1_b_ref, hfc2_w_ref, hfc2_b_ref,
    # output
    o_ref,
    *, batch, seq, heads, head_dim, layers):
    H = heads * head_dim
    scale = float(head_dim) ** -0.5

    def ln(x, g, b, eps=1e-6):
        mu = jnp.mean(x, axis=-1, keepdims=True)
        var = jnp.mean(jnp.square(x - mu), axis=-1, keepdims=True)
        return (x - mu) * jax.lax.rsqrt(var + eps) * g + b

    def gelu_tanh(y):
        c = 0.7978845608028654  # sqrt(2/pi)
        return 0.5 * y * (1.0 + jnp.tanh(c * (y + 0.044715 * y * y * y)))

    def softmax_rows(s):
        s = s - jnp.max(s, axis=-1, keepdims=True)
        p = jnp.exp(s)
        # EUP approx reciprocal instead of a VALU divide
        return p * pl.reciprocal(jnp.sum(p, axis=-1, keepdims=True), approx=True)

    def mha(q2, k2, v2, nq, nkv):
        """q2:(batch*nq,H)  k2,v2:(batch*nkv,H) -> (batch*nq,H).

        All (batch, head) slices are computed inside this single kernel
        invocation (statically unrolled; tiny sizes), so there is no per-head
        grid-step or launch overhead and no HBM round-trip in between.
        """
        rows = []
        for b in range(batch):
            head_outs = []
            for h_i in range(heads):
                c0, c1 = h_i * head_dim, (h_i + 1) * head_dim
                qh = q2[b * nq:(b + 1) * nq, c0:c1]
                kh = k2[b * nkv:(b + 1) * nkv, c0:c1]
                vh = v2[b * nkv:(b + 1) * nkv, c0:c1]
                # q @ k^T without an explicit transpose
                s = jax.lax.dot_general(
                    qh, kh, (((1,), (1,)), ((), ())),
                    preferred_element_type=jnp.float32) * scale
                p = softmax_rows(s)
                head_outs.append(
                    jnp.dot(p, vh, preferred_element_type=jnp.float32))
            rows.append(jnp.concatenate(head_outs, axis=-1))
        return jnp.concatenate(rows, axis=0)

    # ---- patch embedding (pixel normalization folded into pw/pb) + pos ----
    x = patches_ref[...]                                           # (B*S, C*P*P)
    h = jnp.dot(x, pw_ref[...], preferred_element_type=jnp.float32) + pb_ref[...]
    h = h + pos_ref[...]                                           # (B*S, H)

    # ---- transformer encoder layers (weights stay resident in VMEM) ----
    for l in range(layers):
        hn = ln(h, ln1_g_ref[l], ln1_b_ref[l])
        qkv = jnp.dot(hn, qkv_w_ref[l],
                      preferred_element_type=jnp.float32) + qkv_b_ref[l]
        q2 = qkv[:, :H]
        k2 = qkv[:, H:2 * H]
        v2 = qkv[:, 2 * H:]
        a = mha(q2, k2, v2, seq, seq)
        a = jnp.dot(a, ow_ref[l], preferred_element_type=jnp.float32) + ob_ref[l]
        h = h + a

        hn = ln(h, ln2_g_ref[l], ln2_b_ref[l])
        m = jnp.dot(hn, fc1_w_ref[l],
                    preferred_element_type=jnp.float32) + fc1_b_ref[l]
        m = gelu_tanh(m)
        m = jnp.dot(m, fc2_w_ref[l],
                    preferred_element_type=jnp.float32) + fc2_b_ref[l]
        h = h + m

    last_hidden = ln(h, post_g_ref[...], post_b_ref[...])          # (B*S, H)

    # ---- multihead attention pooling head -> pooler_output ----
    in_w = in_w_ref[...]
    in_b = in_b_ref[...]
    q_row = jnp.dot(probe_ref[...], in_w[:, :H],
                    preferred_element_type=jnp.float32) + in_b[:, :H]   # (1, H)
    kv = jnp.dot(last_hidden, in_w[:, H:],
                 preferred_element_type=jnp.float32) + in_b[:, H:]      # (B*S, 2H)
    k2 = kv[:, :H]
    v2 = kv[:, H:]
    q_all = jnp.concatenate([q_row] * batch, axis=0)               # (B, H)
    pooled = mha(q_all, k2, v2, 1, seq)                            # (B, H)
    pooled = jnp.dot(pooled, out_w_ref[...],
                     preferred_element_type=jnp.float32) + out_b_ref[...]

    res = pooled
    pn = ln(pooled, hln_g_ref[...], hln_b_ref[...])
    m = jnp.dot(pn, hfc1_w_ref[...],
                preferred_element_type=jnp.float32) + hfc1_b_ref[...]
    m = gelu_tanh(m)
    m = jnp.dot(m, hfc2_w_ref[...],
                preferred_element_type=jnp.float32) + hfc2_b_ref[...]
    o_ref[...] = (res + m).astype(o_ref.dtype)                     # (B, H)


def _full_block_spec(shape):
    nd = len(shape)
    return pl.BlockSpec(tuple(shape), lambda i, _nd=nd: (0,) * _nd)


# ------------------------------ forward pass -------------------------------
def siglip_encoder_forward(params, x):
    """x: (B, C, H, W) float32 in [0, 1] (NCHW, like the PyTorch module)."""
    B, C, Hh, Ww = x.shape
    f32 = jnp.float32

    # --- processor emulation: (x*255).uint8; rescale/normalize folded below ---
    x_u8 = jnp.clip(jnp.floor(x * 255.0), 0.0, 255.0)   # uint8 values, kept f32
    # TODO(synk): HF processor resizing to the model resolution is skipped;
    #             images are consumed at their input resolution.
    nph, npw = Hh // PATCH, Ww // PATCH
    seq = nph * npw
    assert seq == NUM_PATCHES, "pos_emb sized for 16x16 inputs"

    # patchify (conv stride=patch == matmul over flattened patches); raw u8
    # values go straight to the kernel, normalization is folded into weights.
    patches = x_u8.reshape(B, C, nph, PATCH, npw, PATCH)
    patches = patches.transpose(0, 2, 4, 1, 3, 5).reshape(
        B * seq, C * PATCH * PATCH).astype(f32)

    # fold ((u8/255) - 0.5)/0.5 == u8*(2/255) - 1 into patch-embed weight/bias
    pw = params["patch_w"].astype(f32)
    patch_w_eff = pw * (2.0 / 255.0)
    patch_b_eff = (params["patch_b"].astype(f32)
                   - jnp.sum(pw, axis=0)).reshape(1, HIDDEN)

    pos = jnp.tile(params["pos_emb"].astype(f32), (B, 1))          # (B*S, H)

    # --- stack per-layer weights with a leading LAYERS axis, QKV concatenated ---
    lys = params["layers"]

    def stk(fn):
        return jnp.stack([fn(l).astype(f32) for l in lys], axis=0)

    ln1_g = stk(lambda l: l["ln1_g"].reshape(1, HIDDEN))
    ln1_b = stk(lambda l: l["ln1_b"].reshape(1, HIDDEN))
    qkv_w = stk(lambda l: jnp.concatenate([l["q_w"], l["k_w"], l["v_w"]], axis=1))
    qkv_b = stk(lambda l: jnp.concatenate(
        [l["q_b"], l["k_b"], l["v_b"]]).reshape(1, 3 * HIDDEN))
    o_w = stk(lambda l: l["o_w"])
    o_b = stk(lambda l: l["o_b"].reshape(1, HIDDEN))
    ln2_g = stk(lambda l: l["ln2_g"].reshape(1, HIDDEN))
    ln2_b = stk(lambda l: l["ln2_b"].reshape(1, HIDDEN))
    fc1_w = stk(lambda l: l["fc1_w"])
    fc1_b = stk(lambda l: l["fc1_b"].reshape(1, MLP))
    fc2_w = stk(lambda l: l["fc2_w"])
    fc2_b = stk(lambda l: l["fc2_b"].reshape(1, HIDDEN))

    args = [
        patches, patch_w_eff, patch_b_eff, pos,
        ln1_g, ln1_b, qkv_w, qkv_b, o_w, o_b,
        ln2_g, ln2_b, fc1_w, fc1_b, fc2_w, fc2_b,
        params["post_ln_g"].reshape(1, HIDDEN).astype(f32),
        params["post_ln_b"].reshape(1, HIDDEN).astype(f32),
        params["probe"].reshape(1, HIDDEN).astype(f32),
        params["mha_in_w"].astype(f32),
        params["mha_in_b"].reshape(1, 3 * HIDDEN).astype(f32),
        params["mha_out_w"].astype(f32),
        params["mha_out_b"].reshape(1, HIDDEN).astype(f32),
        params["head_ln_g"].reshape(1, HIDDEN).astype(f32),
        params["head_ln_b"].reshape(1, HIDDEN).astype(f32),
        params["head_fc1_w"].astype(f32),
        params["head_fc1_b"].reshape(1, MLP).astype(f32),
        params["head_fc2_w"].astype(f32),
        params["head_fc2_b"].reshape(1, HIDDEN).astype(f32),
    ]

    kernel = functools.partial(
        _siglip_fused_kernel,
        batch=B, seq=seq, heads=HEADS, head_dim=HEAD_DIM, layers=LAYERS)

    pooled = pl.pallas_call(
        kernel,
        grid=(1,),
        out_shape=jax.ShapeDtypeStruct((B, HIDDEN), f32),
        in_specs=[_full_block_spec(a.shape) for a in args],
        out_specs=pl.BlockSpec((B, HIDDEN), lambda i: (0, 0)),
        compiler_params=pltpu.CompilerParams(
            dimension_semantics=("arbitrary",),
            vmem_limit_bytes=32 * 1024 * 1024),
    )(*args)

    # feature_key == 'pooler_output', latent_ndim == 1 -> unsqueeze(1)
    return pooled[:, None, :]                                      # (B, 1, H)


# ------------------------------ parameter init -----------------------------
def init_params(key):
    def nxt():
        nonlocal key
        key, sub = jax.random.split(key)
        return sub

    def w(shape, scale=0.02):
        return jax.random.normal(nxt(), shape, jnp.float32) * scale

    p = {
        "patch_w": w((CH * PATCH * PATCH, HIDDEN)),
        "patch_b": w((HIDDEN,)),
        "pos_emb": w((NUM_PATCHES, HIDDEN)),
        "post_ln_g": jnp.ones((HIDDEN,), jnp.float32),
        "post_ln_b": jnp.zeros((HIDDEN,), jnp.float32),
        "probe": w((1, 1, HIDDEN)),
        # NOTE: column-split (x @ W) layout; porting real nn.MultiheadAttention
        # checkpoints (stored (3H, H), applied as x @ W.T) requires a transpose.
        "mha_in_w": w((HIDDEN, 3 * HIDDEN)),
        "mha_in_b": w((3 * HIDDEN,)),
        "mha_out_w": w((HIDDEN, HIDDEN)),
        "mha_out_b": w((HIDDEN,)),
        "head_ln_g": jnp.ones((HIDDEN,), jnp.float32),
        "head_ln_b": jnp.zeros((HIDDEN,), jnp.float32),
        "head_fc1_w": w((HIDDEN, MLP)),
        "head_fc1_b": w((MLP,)),
        "head_fc2_w": w((MLP, HIDDEN)),
        "head_fc2_b": w((HIDDEN,)),
    }
    layers = []
    for _ in range(LAYERS):
        layers.append(dict(
            ln1_g=jnp.ones((HIDDEN,), jnp.float32),
            ln1_b=jnp.zeros((HIDDEN,), jnp.float32),
            q_w=w((HIDDEN, HIDDEN)), q_b=w((HIDDEN,)),
            k_w=w((HIDDEN, HIDDEN)), k_b=w((HIDDEN,)),
            v_w=w((HIDDEN, HIDDEN)), v_b=w((HIDDEN,)),
            o_w=w((HIDDEN, HIDDEN)), o_b=w((HIDDEN,)),
            ln2_g=jnp.ones((HIDDEN,), jnp.float32),
            ln2_b=jnp.zeros((HIDDEN,), jnp.float32),
            fc1_w=w((HIDDEN, MLP)), fc1_b=w((MLP,)),
            fc2_w=w((MLP, HIDDEN)), fc2_b=w((HIDDEN,)),
        ))
    p["layers"] = layers
    return p


# ----------------------------------- main ----------------------------------
if __name__ == "__main__":
    key = jax.random.PRNGKey(0)
    key, pkey, xkey = jax.random.split(key, 3)
    params = init_params(pkey)

    # image batch in [0, 1], NCHW like the PyTorch module input
    x = jax.random.uniform(xkey, (2, CH, IMG, IMG), jnp.float32)

    fwd = jax.jit(siglip_encoder_forward)
    emb = fwd(params, x)
    emb = jax.block_until_ready(emb)

    assert emb.shape == (2, 1, HIDDEN), emb.shape
    assert emb.dtype == jnp.float32
    assert bool(jnp.all(jnp.isfinite(emb)))
    print("KERNEL_OK")
</pallas_src>

<mosaic_0001>
module attributes {stable_mosaic.version = 11 : i64} {
  func.func @_siglip_fused_kernel(%arg0: i32, %arg1: memref<8x192xf32, #tpu.memory_space<vmem>>, %arg2: memref<192x32xf32, #tpu.memory_space<vmem>>, %arg3: memref<1x32xf32, #tpu.memory_space<vmem>>, %arg4: memref<8x32xf32, #tpu.memory_space<vmem>>, %arg5: memref<2x1x32xf32, #tpu.memory_space<vmem>>, %arg6: memref<2x1x32xf32, #tpu.memory_space<vmem>>, %arg7: memref<2x32x96xf32, #tpu.memory_space<vmem>>, %arg8: memref<2x1x96xf32, #tpu.memory_space<vmem>>, %arg9: memref<2x32x32xf32, #tpu.memory_space<vmem>>, %arg10: memref<2x1x32xf32, #tpu.memory_space<vmem>>, %arg11: memref<2x1x32xf32, #tpu.memory_space<vmem>>, %arg12: memref<2x1x32xf32, #tpu.memory_space<vmem>>, %arg13: memref<2x32x64xf32, #tpu.memory_space<vmem>>, %arg14: memref<2x1x64xf32, #tpu.memory_space<vmem>>, %arg15: memref<2x64x32xf32, #tpu.memory_space<vmem>>, %arg16: memref<2x1x32xf32, #tpu.memory_space<vmem>>, %arg17: memref<1x32xf32, #tpu.memory_space<vmem>>, %arg18: memref<1x32xf32, #tpu.memory_space<vmem>>, %arg19: memref<1x32xf32, #tpu.memory_space<vmem>>, %arg20: memref<32x96xf32, #tpu.memory_space<vmem>>, %arg21: memref<1x96xf32, #tpu.memory_space<vmem>>, %arg22: memref<32x32xf32, #tpu.memory_space<vmem>>, %arg23: memref<1x32xf32, #tpu.memory_space<vmem>>, %arg24: memref<1x32xf32, #tpu.memory_space<vmem>>, %arg25: memref<1x32xf32, #tpu.memory_space<vmem>>, %arg26: memref<32x64xf32, #tpu.memory_space<vmem>>, %arg27: memref<1x64xf32, #tpu.memory_space<vmem>>, %arg28: memref<64x32xf32, #tpu.memory_space<vmem>>, %arg29: memref<1x32xf32, #tpu.memory_space<vmem>>, %arg30: memref<2x32xf32, #tpu.memory_space<vmem>>) attributes {dimension_semantics = [#tpu.dimension_semantics<arbitrary>], iteration_bounds = array<i64: 1>, scalar_prefetch = 0 : i64, scratch_operands = 0 : i64, tpu.core_type = #tpu.core_type<tc>, window_params = [{pipeline_mode = #tpu.pipeline_mode<synchronous>, transform_indices = @transform_0, window_bounds = array<i64: 8, 192>}, {pipeline_mode = #tpu.pipeline_mode<synchronous>, transform_indices = @transform_1, window_bounds = array<i64: 192, 32>}, {pipeline_mode = #tpu.pipeline_mode<synchronous>, transform_indices = @transform_2, window_bounds = array<i64: 1, 32>}, {pipeline_mode = #tpu.pipeline_mode<synchronous>, transform_indices = @transform_3, window_bounds = array<i64: 8, 32>}, {pipeline_mode = #tpu.pipeline_mode<synchronous>, transform_indices = @transform_4, window_bounds = array<i64: 2, 1, 32>}, {pipeline_mode = #tpu.pipeline_mode<synchronous>, transform_indices = @transform_5, window_bounds = array<i64: 2, 1, 32>}, {pipeline_mode = #tpu.pipeline_mode<synchronous>, transform_indices = @transform_6, window_bounds = array<i64: 2, 32, 96>}, {pipeline_mode = #tpu.pipeline_mode<synchronous>, transform_indices = @transform_7, window_bounds = array<i64: 2, 1, 96>}, {pipeline_mode = #tpu.pipeline_mode<synchronous>, transform_indices = @transform_8, window_bounds = array<i64: 2, 32, 32>}, {pipeline_mode = #tpu.pipeline_mode<synchronous>, transform_indices = @transform_9, window_bounds = array<i64: 2, 1, 32>}, {pipeline_mode = #tpu.pipeline_mode<synchronous>, transform_indices = @transform_10, window_bounds = array<i64: 2, 1, 32>}, {pipeline_mode = #tpu.pipeline_mode<synchronous>, transform_indices = @transform_11, window_bounds = array<i64: 2, 1, 32>}, {pipeline_mode = #tpu.pipeline_mode<synchronous>, transform_indices = @transform_12, window_bounds = array<i64: 2, 32, 64>}, {pipeline_mode = #tpu.pipeline_mode<synchronous>, transform_indices = @transform_13, window_bounds = array<i64: 2, 1, 64>}, {pipeline_mode = #tpu.pipeline_mode<synchronous>, transform_indices = @transform_14, window_bounds = array<i64: 2, 64, 32>}, {pipeline_mode = #tpu.pipeline_mode<synchronous>, transform_indices = @transform_15, window_bounds = array<i64: 2, 1, 32>}, {pipeline_mode = #tpu.pipeline_mode<synchronous>, transform_indices = @transform_16, window_bounds = array<i64: 1, 32>}, {pipeline_mode = #tpu.pipeline_mode<synchronous>, transform_indices = @transform_17, window_bounds = array<i64: 1, 32>}, {pipeline_mode = #tpu.pipeline_mode<synchronous>, transform_indices = @transform_18, window_bounds = array<i64: 1, 32>}, {pipeline_mode = #tpu.pipeline_mode<synchronous>, transform_indices = @transform_19, window_bounds = array<i64: 32, 96>}, {pipeline_mode = #tpu.pipeline_mode<synchronous>, transform_indices = @transform_20, window_bounds = array<i64: 1, 96>}, {pipeline_mode = #tpu.pipeline_mode<synchronous>, transform_indices = @transform_21, window_bounds = array<i64: 32, 32>}, {pipeline_mode = #tpu.pipeline_mode<synchronous>, transform_indices = @transform_22, window_bounds = array<i64: 1, 32>}, {pipeline_mode = #tpu.pipeline_mode<synchronous>, transform_indices = @transform_23, window_bounds = array<i64: 1, 32>}, {pipeline_mode = #tpu.pipeline_mode<synchronous>, transform_indices = @transform_24, window_bounds = array<i64: 1, 32>}, {pipeline_mode = #tpu.pipeline_mode<synchronous>, transform_indices = @transform_25, window_bounds = array<i64: 32, 64>}, {pipeline_mode = #tpu.pipeline_mode<synchronous>, transform_indices = @transform_26, window_bounds = array<i64: 1, 64>}, {pipeline_mode = #tpu.pipeline_mode<synchronous>, transform_indices = @transform_27, window_bounds = array<i64: 64, 32>}, {pipeline_mode = #tpu.pipeline_mode<synchronous>, transform_indices = @transform_28, window_bounds = array<i64: 1, 32>}, {pipeline_mode = #tpu.pipeline_mode<synchronous>, transform_indices = @transform_29, window_bounds = array<i64: 2, 32>}]} {
    %c0 = arith.constant 0 : index
    %c0_0 = arith.constant 0 : index
    %0 = vector.load %arg1[%c0, %c0_0] : memref<8x192xf32, #tpu.memory_space<vmem>>, vector<8x192xf32>
    %c0_1 = arith.constant 0 : index
    %c0_2 = arith.constant 0 : index
    %1 = vector.load %arg2[%c0_1, %c0_2] : memref<192x32xf32, #tpu.memory_space<vmem>>, vector<192x32xf32>
    %cst = arith.constant dense<0.000000e+00> : vector<8x32xf32>
    %2 = tpu.matmul %0, %1, %cst {dimension_numbers = #tpu.dot_dimension_numbers<[1], [0], [0], [1], [0, 0, 1, 1], [], []>} : vector<8x192xf32>, vector<192x32xf32>, vector<8x32xf32> -> vector<8x32xf32>
    %c0_3 = arith.constant 0 : index
    %c0_4 = arith.constant 0 : index
    %3 = vector.load %arg3[%c0_3, %c0_4] : memref<1x32xf32, #tpu.memory_space<vmem>>, vector<1x32xf32>
    %4 = vector.broadcast %3 : vector<1x32xf32> to vector<8x32xf32>
    %5 = arith.addf %2, %4 : vector<8x32xf32>
    %c0_5 = arith.constant 0 : index
    %c0_6 = arith.constant 0 : index
    %6 = vector.load %arg4[%c0_5, %c0_6] : memref<8x32xf32, #tpu.memory_space<vmem>>, vector<8x32xf32>
    %7 = arith.addf %5, %6 : vector<8x32xf32>
    %c0_7 = arith.constant 0 : index
    %c0_8 = arith.constant 0 : index
    %c0_9 = arith.constant 0 : index
    %8 = vector.load %arg5[%c0_7, %c0_8, %c0_9] : memref<2x1x32xf32, #tpu.memory_space<vmem>>, vector<1x1x32xf32>
    %9 = vector.shape_cast %8 : vector<1x1x32xf32> to vector<1x32xf32>
    %c0_10 = arith.constant 0 : index
    %c0_11 = arith.constant 0 : index
    %c0_12 = arith.constant 0 : index
    %10 = vector.load %arg6[%c0_10, %c0_11, %c0_12] : memref<2x1x32xf32, #tpu.memory_space<vmem>>, vector<1x1x32xf32>
    %11 = vector.shape_cast %10 : vector<1x1x32xf32> to vector<1x32xf32>
    %cst_13 = arith.constant dense<0.000000e+00> : vector<8xf32>
    %12 = vector.multi_reduction <add>, %7, %cst_13 [1] : vector<8x32xf32> to vector<8xf32>
    %13 = vector.shape_cast %12 : vector<8xf32> to vector<8x1xf32>
    %cst_14 = arith.constant 3.200000e+01 : f32
    %14 = vector.broadcast %cst_14 : f32 to vector<8x1xf32>
    %15 = arith.divf %13, %14 : vector<8x1xf32>
    %16 = vector.broadcast %15 : vector<8x1xf32> to vector<8x32xf32>
    %17 = arith.subf %7, %16 : vector<8x32xf32>
    %18 = arith.mulf %17, %17 : vector<8x32xf32>
    %cst_15 = arith.constant dense<0.000000e+00> : vector<8xf32>
    %19 = vector.multi_reduction <add>, %18, %cst_15 [1] : vector<8x32xf32> to vector<8xf32>
    %20 = vector.shape_cast %19 : vector<8xf32> to vector<8x1xf32>
    %cst_16 = arith.constant 3.200000e+01 : f32
    %21 = vector.broadcast %cst_16 : f32 to vector<8x1xf32>
    %22 = arith.divf %20, %21 : vector<8x1xf32>
    %23 = vector.broadcast %15 : vector<8x1xf32> to vector<8x32xf32>
    %24 = arith.subf %7, %23 : vector<8x32xf32>
    %cst_17 = arith.constant 9.99999997E-7 : f32
    %25 = vector.broadcast %cst_17 : f32 to vector<8x1xf32>
    %26 = arith.addf %22, %25 : vector<8x1xf32>
    %27 = math.rsqrt %26 : vector<8x1xf32>
    %28 = vector.broadcast %27 : vector<8x1xf32> to vector<8x32xf32>
    %29 = arith.mulf %24, %28 : vector<8x32xf32>
    %30 = vector.broadcast %9 : vector<1x32xf32> to vector<8x32xf32>
    %31 = arith.mulf %29, %30 : vector<8x32xf32>
    %32 = vector.broadcast %11 : vector<1x32xf32> to vector<8x32xf32>
    %33 = arith.addf %31, %32 : vector<8x32xf32>
    %c0_18 = arith.constant 0 : index
    %c0_19 = arith.constant 0 : index
    %c0_20 = arith.constant 0 : index
    %34 = vector.load %arg7[%c0_18, %c0_19, %c0_20] : memref<2x32x96xf32, #tpu.memory_space<vmem>>, vector<1x32x96xf32>
    %35 = vector.shape_cast %34 : vector<1x32x96xf32> to vector<32x96xf32>
    %cst_21 = arith.constant dense<0.000000e+00> : vector<8x96xf32>
    %36 = tpu.matmul %33, %35, %cst_21 {dimension_numbers = #tpu.dot_dimension_numbers<[1], [0], [0], [1], [0, 0, 1, 1], [], []>} : vector<8x32xf32>, vector<32x96xf32>, vector<8x96xf32> -> vector<8x96xf32>
    %c0_22 = arith.constant 0 : index
    %c0_23 = arith.constant 0 : index
    %c0_24 = arith.constant 0 : index
    %37 = vector.load %arg8[%c0_22, %c0_23, %c0_24] : memref<2x1x96xf32, #tpu.memory_space<vmem>>, vector<1x1x96xf32>
    %38 = vector.shape_cast %37 : vector<1x1x96xf32> to vector<1x96xf32>
    %39 = vector.broadcast %38 : vector<1x96xf32> to vector<8x96xf32>
    %40 = arith.addf %36, %39 : vector<8x96xf32>
    %41 = vector.extract_strided_slice %40 {offsets = [0, 0], sizes = [8, 32], strides = [1, 1]} : vector<8x96xf32> to vector<8x32xf32>
    %42 = vector.extract_strided_slice %40 {offsets = [0, 32], sizes = [8, 32], strides = [1, 1]} : vector<8x96xf32> to vector<8x32xf32>
    %43 = vector.extract_strided_slice %40 {offsets = [0, 64], sizes = [8, 32], strides = [1, 1]} : vector<8x96xf32> to vector<8x32xf32>
    %44 = vector.extract_strided_slice %41 {offsets = [0, 0], sizes = [4, 8], strides = [1, 1]} : vector<8x32xf32> to vector<4x8xf32>
    %45 = vector.extract_strided_slice %42 {offsets = [0, 0], sizes = [4, 8], strides = [1, 1]} : vector<8x32xf32> to vector<4x8xf32>
    %46 = vector.extract_strided_slice %43 {offsets = [0, 0], sizes = [4, 8], strides = [1, 1]} : vector<8x32xf32> to vector<4x8xf32>
    %cst_25 = arith.constant dense<0.000000e+00> : vector<4x4xf32>
    %47 = tpu.matmul %44, %45, %cst_25 {dimension_numbers = #tpu.dot_dimension_numbers<[1], [1], [0], [0], [0, 0, 1, 0], [], []>} : vector<4x8xf32>, vector<4x8xf32>, vector<4x4xf32> -> vector<4x4xf32>
    %cst_26 = arith.constant 0.353553385 : f32
    %48 = vector.broadcast %cst_26 : f32 to vector<4x4xf32>
    %49 = arith.mulf %47, %48 : vector<4x4xf32>
    %cst_27 = arith.constant dense<0xFF800000> : vector<4xf32>
    %50 = vector.multi_reduction <maximumf>, %49, %cst_27 [1] : vector<4x4xf32> to vector<4xf32>
    %51 = vector.shape_cast %50 : vector<4xf32> to vector<4x1xf32>
    %52 = vector.broadcast %51 : vector<4x1xf32> to vector<4x4xf32>
    %53 = arith.subf %49, %52 : vector<4x4xf32>
    %54 = math.exp %53 : vector<4x4xf32>
    %cst_28 = arith.constant dense<0.000000e+00> : vector<4xf32>
    %55 = vector.multi_reduction <add>, %54, %cst_28 [1] : vector<4x4xf32> to vector<4xf32>
    %56 = vector.shape_cast %55 : vector<4xf32> to vector<4x1xf32>
    %57 = tpu.reciprocal %56 {approx = true} : vector<4x1xf32> -> vector<4x1xf32>
    %58 = vector.broadcast %57 : vector<4x1xf32> to vector<4x4xf32>
    %59 = arith.mulf %54, %58 : vector<4x4xf32>
    %cst_29 = arith.constant dense<0.000000e+00> : vector<4x8xf32>
    %60 = tpu.matmul %59, %46, %cst_29 {dimension_numbers = #tpu.dot_dimension_numbers<[1], [0], [0], [1], [0, 0, 1, 1], [], []>} : vector<4x4xf32>, vector<4x8xf32>, vector<4x8xf32> -> vector<4x8xf32>
    %61 = vector.extract_strided_slice %41 {offsets = [0, 8], sizes = [4, 8], strides = [1, 1]} : vector<8x32xf32> to vector<4x8xf32>
    %62 = vector.extract_strided_slice %42 {offsets = [0, 8], sizes = [4, 8], strides = [1, 1]} : vector<8x32xf32> to vector<4x8xf32>
    %63 = vector.extract_strided_slice %43 {offsets = [0, 8], sizes = [4, 8], strides = [1, 1]} : vector<8x32xf32> to vector<4x8xf32>
    %cst_30 = arith.constant dense<0.000000e+00> : vector<4x4xf32>
    %64 = tpu.matmul %61, %62, %cst_30 {dimension_numbers = #tpu.dot_dimension_numbers<[1], [1], [0], [0], [0, 0, 1, 0], [], []>} : vector<4x8xf32>, vector<4x8xf32>, vector<4x4xf32> -> vector<4x4xf32>
    %cst_31 = arith.constant 0.353553385 : f32
    %65 = vector.broadcast %cst_31 : f32 to vector<4x4xf32>
    %66 = arith.mulf %64, %65 : vector<4x4xf32>
    %cst_32 = arith.constant dense<0xFF800000> : vector<4xf32>
    %67 = vector.multi_reduction <maximumf>, %66, %cst_32 [1] : vector<4x4xf32> to vector<4xf32>
    %68 = vector.shape_cast %67 : vector<4xf32> to vector<4x1xf32>
    %69 = vector.broadcast %68 : vector<4x1xf32> to vector<4x4xf32>
    %70 = arith.subf %66, %69 : vector<4x4xf32>
    %71 = math.exp %70 : vector<4x4xf32>
    %cst_33 = arith.constant dense<0.000000e+00> : vector<4xf32>
    %72 = vector.multi_reduction <add>, %71, %cst_33 [1] : vector<4x4xf32> to vector<4xf32>
    %73 = vector.shape_cast %72 : vector<4xf32> to vector<4x1xf32>
    %74 = tpu.reciprocal %73 {approx = true} : vector<4x1xf32> -> vector<4x1xf32>
    %75 = vector.broadcast %74 : vector<4x1xf32> to vector<4x4xf32>
    %76 = arith.mulf %71, %75 : vector<4x4xf32>
    %cst_34 = arith.constant dense<0.000000e+00> : vector<4x8xf32>
    %77 = tpu.matmul %76, %63, %cst_34 {dimension_numbers = #tpu.dot_dimension_numbers<[1], [0], [0], [1], [0, 0, 1, 1], [], []>} : vector<4x4xf32>, vector<4x8xf32>, vector<4x8xf32> -> vector<4x8xf32>
    %78 = vector.extract_strided_slice %41 {offsets = [0, 16], sizes = [4, 8], strides = [1, 1]} : vector<8x32xf32> to vector<4x8xf32>
    %79 = vector.extract_strided_slice %42 {offsets = [0, 16], sizes = [4, 8], strides = [1, 1]} : vector<8x32xf32> to vector<4x8xf32>
    %80 = vector.extract_strided_slice %43 {offsets = [0, 16], sizes = [4, 8], strides = [1, 1]} : vector<8x32xf32> to vector<4x8xf32>
    %cst_35 = arith.constant dense<0.000000e+00> : vector<4x4xf32>
    %81 = tpu.matmul %78, %79, %cst_35 {dimension_numbers = #tpu.dot_dimension_numbers<[1], [1], [0], [0], [0, 0, 1, 0], [], []>} : vector<4x8xf32>, vector<4x8xf32>, vector<4x4xf32> -> vector<4x4xf32>
    %cst_36 = arith.constant 0.353553385 : f32
    %82 = vector.broadcast %cst_36 : f32 to vector<4x4xf32>
    %83 = arith.mulf %81, %82 : vector<4x4xf32>
    %cst_37 = arith.constant dense<0xFF800000> : vector<4xf32>
    %84 = vector.multi_reduction <maximumf>, %83, %cst_37 [1] : vector<4x4xf32> to vector<4xf32>
    %85 = vector.shape_cast %84 : vector<4xf32> to vector<4x1xf32>
    %86 = vector.broadcast %85 : vector<4x1xf32> to vector<4x4xf32>
    %87 = arith.subf %83, %86 : vector<4x4xf32>
    %88 = math.exp %87 : vector<4x4xf32>
    %cst_38 = arith.constant dense<0.000000e+00> : vector<4xf32>
    %89 = vector.multi_reduction <add>, %88, %cst_38 [1] : vector<4x4xf32> to vector<4xf32>
    %90 = vector.shape_cast %89 : vector<4xf32> to vector<4x1xf32>
    %91 = tpu.reciprocal %90 {approx = true} : vector<4x1xf32> -> vector<4x1xf32>
    %92 = vector.broadcast %91 : vector<4x1xf32> to vector<4x4xf32>
    %93 = arith.mulf %88, %92 : vector<4x4xf32>
    %cst_39 = arith.constant dense<0.000000e+00> : vector<4x8xf32>
    %94 = tpu.matmul %93, %80, %cst_39 {dimension_numbers = #tpu.dot_dimension_numbers<[1], [0], [0], [1], [0, 0, 1, 1], [], []>} : vector<4x4xf32>, vector<4x8xf32>, vector<4x8xf32> -> vector<4x8xf32>
    %95 = vector.extract_strided_slice %41 {offsets = [0, 24], sizes = [4, 8], strides = [1, 1]} : vector<8x32xf32> to vector<4x8xf32>
    %96 = vector.extract_strided_slice %42 {offsets = [0, 24], sizes = [4, 8], strides = [1, 1]} : vector<8x32xf32> to vector<4x8xf32>
    %97 = vector.extract_strided_slice %43 {offsets = [0, 24], sizes = [4, 8], strides = [1, 1]} : vector<8x32xf32> to vector<4x8xf32>
    %cst_40 = arith.constant dense<0.000000e+00> : vector<4x4xf32>
    %98 = tpu.matmul %95, %96, %cst_40 {dimension_numbers = #tpu.dot_dimension_numbers<[1], [1], [0], [0], [0, 0, 1, 0], [], []>} : vector<4x8xf32>, vector<4x8xf32>, vector<4x4xf32> -> vector<4x4xf32>
    %cst_41 = arith.constant 0.353553385 : f32
    %99 = vector.broadcast %cst_41 : f32 to vector<4x4xf32>
    %100 = arith.mulf %98, %99 : vector<4x4xf32>
    %cst_42 = arith.constant dense<0xFF800000> : vector<4xf32>
    %101 = vector.multi_reduction <maximumf>, %100, %cst_42 [1] : vector<4x4xf32> to vector<4xf32>
    %102 = vector.shape_cast %101 : vector<4xf32> to vector<4x1xf32>
    %103 = vector.broadcast %102 : vector<4x1xf32> to vector<4x4xf32>
    %104 = arith.subf %100, %103 : vector<4x4xf32>
    %105 = math.exp %104 : vector<4x4xf32>
    %cst_43 = arith.constant dense<0.000000e+00> : vector<4xf32>
    %106 = vector.multi_reduction <add>, %105, %cst_43 [1] : vector<4x4xf32> to vector<4xf32>
    %107 = vector.shape_cast %106 : vector<4xf32> to vector<4x1xf32>
    %108 = tpu.reciprocal %107 {approx = true} : vector<4x1xf32> -> vector<4x1xf32>
    %109 = vector.broadcast %108 : vector<4x1xf32> to vector<4x4xf32>
    %110 = arith.mulf %105, %109 : vector<4x4xf32>
    %cst_44 = arith.constant dense<0.000000e+00> : vector<4x8xf32>
    %111 = tpu.matmul %110, %97, %cst_44 {dimension_numbers = #tpu.dot_dimension_numbers<[1], [0], [0], [1], [0, 0, 1, 1], [], []>} : vector<4x4xf32>, vector<4x8xf32>, vector<4x8xf32> -> vector<4x8xf32>
    %112 = tpu.concatenate %60, %77, %94, %111 in 1 : vector<4x8xf32>, vector<4x8xf32>, vector<4x8xf32>, vector<4x8xf32> -> vector<4x32xf32>
    %113 = vector.extract_strided_slice %41 {offsets = [4, 0], sizes = [4, 8], strides = [1, 1]} : vector<8x32xf32> to vector<4x8xf32>
    %114 = vector.extract_strided_slice %42 {offsets = [4, 0], sizes = [4, 8], strides = [1, 1]} : vector<8x32xf32> to vector<4x8xf32>
    %115 = vector.extract_strided_slice %43 {offsets = [4, 0], sizes = [4, 8], strides = [1, 1]} : vector<8x32xf32> to vector<4x8xf32>
    %cst_45 = arith.constant dense<0.000000e+00> : vector<4x4xf32>
    %116 = tpu.matmul %113, %114, %cst_45 {dimension_numbers = #tpu.dot_dimension_numbers<[1], [1], [0], [0], [0, 0, 1, 0], [], []>} : vector<4x8xf32>, vector<4x8xf32>, vector<4x4xf32> -> vector<4x4xf32>
    %cst_46 = arith.constant 0.353553385 : f32
    %117 = vector.broadcast %cst_46 : f32 to vector<4x4xf32>
    %118 = arith.mulf %116, %117 : vector<4x4xf32>
    %cst_47 = arith.constant dense<0xFF800000> : vector<4xf32>
    %119 = vector.multi_reduction <maximumf>, %118, %cst_47 [1] : vector<4x4xf32> to vector<4xf32>
    %120 = vector.shape_cast %119 : vector<4xf32> to vector<4x1xf32>
    %121 = vector.broadcast %120 : vector<4x1xf32> to vector<4x4xf32>
    %122 = arith.subf %118, %121 : vector<4x4xf32>
    %123 = math.exp %122 : vector<4x4xf32>
    %cst_48 = arith.constant dense<0.000000e+00> : vector<4xf32>
    %124 = vector.multi_reduction <add>, %123, %cst_48 [1] : vector<4x4xf32> to vector<4xf32>
    %125 = vector.shape_cast %124 : vector<4xf32> to vector<4x1xf32>
    %126 = tpu.reciprocal %125 {approx = true} : vector<4x1xf32> -> vector<4x1xf32>
    %127 = vector.broadcast %126 : vector<4x1xf32> to vector<4x4xf32>
    %128 = arith.mulf %123, %127 : vector<4x4xf32>
    %cst_49 = arith.constant dense<0.000000e+00> : vector<4x8xf32>
    %129 = tpu.matmul %128, %115, %cst_49 {dimension_numbers = #tpu.dot_dimension_numbers<[1], [0], [0], [1], [0, 0, 1, 1], [], []>} : vector<4x4xf32>, vector<4x8xf32>, vector<4x8xf32> -> vector<4x8xf32>
    %130 = vector.extract_strided_slice %41 {offsets = [4, 8], sizes = [4, 8], strides = [1, 1]} : vector<8x32xf32> to vector<4x8xf32>
    %131 = vector.extract_strided_slice %42 {offsets = [4, 8], sizes = [4, 8], strides = [1, 1]} : vector<8x32xf32> to vector<4x8xf32>
    %132 = vector.extract_strided_slice %43 {offsets = [4, 8], sizes = [4, 8], strides = [1, 1]} : vector<8x32xf32> to vector<4x8xf32>
    %cst_50 = arith.constant dense<0.000000e+00> : vector<4x4xf32>
    %133 = tpu.matmul %130, %131, %cst_50 {dimension_numbers = #tpu.dot_dimension_numbers<[1], [1], [0], [0], [0, 0, 1, 0], [], []>} : vector<4x8xf32>, vector<4x8xf32>, vector<4x4xf32> -> vector<4x4xf32>
    %cst_51 = arith.constant 0.353553385 : f32
    %134 = vector.broadcast %cst_51 : f32 to vector<4x4xf32>
    %135 = arith.mulf %133, %134 : vector<4x4xf32>
    %cst_52 = arith.constant dense<0xFF800000> : vector<4xf32>
    %136 = vector.multi_reduction <maximumf>, %135, %cst_52 [1] : vector<4x4xf32> to vector<4xf32>
    %137 = vector.shape_cast %136 : vector<4xf32> to vector<4x1xf32>
    %138 = vector.broadcast %137 : vector<4x1xf32> to vector<4x4xf32>
    %139 = arith.subf %135, %138 : vector<4x4xf32>
    %140 = math.exp %139 : vector<4x4xf32>
    %cst_53 = arith.constant dense<0.000000e+00> : vector<4xf32>
    %141 = vector.multi_reduction <add>, %140, %cst_53 [1] : vector<4x4xf32> to vector<4xf32>
    %142 = vector.shape_cast %141 : vector<4xf32> to vector<4x1xf32>
    %143 = tpu.reciprocal %142 {approx = true} : vector<4x1xf32> -> vector<4x1xf32>
    %144 = vector.broadcast %143 : vector<4x1xf32> to vector<4x4xf32>
    %145 = arith.mulf %140, %144 : vector<4x4xf32>
    %cst_54 = arith.constant dense<0.000000e+00> : vector<4x8xf32>
    %146 = tpu.matmul %145, %132, %cst_54 {dimension_numbers = #tpu.dot_dimension_numbers<[1], [0], [0], [1], [0, 0, 1, 1], [], []>} : vector<4x4xf32>, vector<4x8xf32>, vector<4x8xf32> -> vector<4x8xf32>
    %147 = vector.extract_strided_slice %41 {offsets = [4, 16], sizes = [4, 8], strides = [1, 1]} : vector<8x32xf32> to vector<4x8xf32>
    %148 = vector.extract_strided_slice %42 {offsets = [4, 16], sizes = [4, 8], strides = [1, 1]} : vector<8x32xf32> to vector<4x8xf32>
    %149 = vector.extract_strided_slice %43 {offsets = [4, 16], sizes = [4, 8], strides = [1, 1]} : vector<8x32xf32> to vector<4x8xf32>
    %cst_55 = arith.constant dense<0.000000e+00> : vector<4x4xf32>
    %150 = tpu.matmul %147, %148, %cst_55 {dimension_numbers = #tpu.dot_dimension_numbers<[1], [1], [0], [0], [0, 0, 1, 0], [], []>} : vector<4x8xf32>, vector<4x8xf32>, vector<4x4xf32> -> vector<4x4xf32>
    %cst_56 = arith.constant 0.353553385 : f32
    %151 = vector.broadcast %cst_56 : f32 to vector<4x4xf32>
    %152 = arith.mulf %150, %151 : vector<4x4xf32>
    %cst_57 = arith.constant dense<0xFF800000> : vector<4xf32>
    %153 = vector.multi_reduction <maximumf>, %152, %cst_57 [1] : vector<4x4xf32> to vector<4xf32>
    %154 = vector.shape_cast %153 : vector<4xf32> to vector<4x1xf32>
    %155 = vector.broadcast %154 : vector<4x1xf32> to vector<4x4xf32>
    %156 = arith.subf %152, %155 : vector<4x4xf32>
    %157 = math.exp %156 : vector<4x4xf32>
    %cst_58 = arith.constant dense<0.000000e+00> : vector<4xf32>
    %158 = vector.multi_reduction <add>, %157, %cst_58 [1] : vector<4x4xf32> to vector<4xf32>
    %159 = vector.shape_cast %158 : vector<4xf32> to vector<4x1xf32>
    %160 = tpu.reciprocal %159 {approx = true} : vector<4x1xf32> -> vector<4x1xf32>
    %161 = vector.broadcast %160 : vector<4x1xf32> to vector<4x4xf32>
    %162 = arith.mulf %157, %161 : vector<4x4xf32>
    %cst_59 = arith.constant dense<0.000000e+00> : vector<4x8xf32>
    %163 = tpu.matmul %162, %149, %cst_59 {dimension_numbers = #tpu.dot_dimension_numbers<[1], [0], [0], [1], [0, 0, 1, 1], [], []>} : vector<4x4xf32>, vector<4x8xf32>, vector<4x8xf32> -> vector<4x8xf32>
    %164 = vector.extract_strided_slice %41 {offsets = [4, 24], sizes = [4, 8], strides = [1, 1]} : vector<8x32xf32> to vector<4x8xf32>
    %165 = vector.extract_strided_slice %42 {offsets = [4, 24], sizes = [4, 8], strides = [1, 1]} : vector<8x32xf32> to vector<4x8xf32>
    %166 = vector.extract_strided_slice %43 {offsets = [4, 24], sizes = [4, 8], strides = [1, 1]} : vector<8x32xf32> to vector<4x8xf32>
    %cst_60 = arith.constant dense<0.000000e+00> : vector<4x4xf32>
    %167 = tpu.matmul %164, %165, %cst_60 {dimension_numbers = #tpu.dot_dimension_numbers<[1], [1], [0], [0], [0, 0, 1, 0], [], []>} : vector<4x8xf32>, vector<4x8xf32>, vector<4x4xf32> -> vector<4x4xf32>
    %cst_61 = arith.constant 0.353553385 : f32
    %168 = vector.broadcast %cst_61 : f32 to vector<4x4xf32>
    %169 = arith.mulf %167, %168 : vector<4x4xf32>
    %cst_62 = arith.constant dense<0xFF800000> : vector<4xf32>
    %170 = vector.multi_reduction <maximumf>, %169, %cst_62 [1] : vector<4x4xf32> to vector<4xf32>
    %171 = vector.shape_cast %170 : vector<4xf32> to vector<4x1xf32>
    %172 = vector.broadcast %171 : vector<4x1xf32> to vector<4x4xf32>
    %173 = arith.subf %169, %172 : vector<4x4xf32>
    %174 = math.exp %173 : vector<4x4xf32>
    %cst_63 = arith.constant dense<0.000000e+00> : vector<4xf32>
    %175 = vector.multi_reduction <add>, %174, %cst_63 [1] : vector<4x4xf32> to vector<4xf32>
    %176 = vector.shape_cast %175 : vector<4xf32> to vector<4x1xf32>
    %177 = tpu.reciprocal %176 {approx = true} : vector<4x1xf32> -> vector<4x1xf32>
    %178 = vector.broadcast %177 : vector<4x1xf32> to vector<4x4xf32>
    %179 = arith.mulf %174, %178 : vector<4x4xf32>
    %cst_64 = arith.constant dense<0.000000e+00> : vector<4x8xf32>
    %180 = tpu.matmul %179, %166, %cst_64 {dimension_numbers = #tpu.dot_dimension_numbers<[1], [0], [0], [1], [0, 0, 1, 1], [], []>} : vector<4x4xf32>, vector<4x8xf32>, vector<4x8xf32> -> vector<4x8xf32>
    %181 = tpu.concatenate %129, %146, %163, %180 in 1 : vector<4x8xf32>, vector<4x8xf32>, vector<4x8xf32>, vector<4x8xf32> -> vector<4x32xf32>
    %182 = tpu.concatenate %112, %181 in 0 : vector<4x32xf32>, vector<4x32xf32> -> vector<8x32xf32>
    %c0_65 = arith.constant 0 : index
    %c0_66 = arith.constant 0 : index
    %c0_67 = arith.constant 0 : index
    %183 = vector.load %arg9[%c0_65, %c0_66, %c0_67] : memref<2x32x32xf32, #tpu.memory_space<vmem>>, vector<1x32x32xf32>
    %184 = vector.shape_cast %183 : vector<1x32x32xf32> to vector<32x32xf32>
    %cst_68 = arith.constant dense<0.000000e+00> : vector<8x32xf32>
    %185 = tpu.matmul %182, %184, %cst_68 {dimension_numbers = #tpu.dot_dimension_numbers<[1], [0], [0], [1], [0, 0, 1, 1], [], []>} : vector<8x32xf32>, vector<32x32xf32>, vector<8x32xf32> -> vector<8x32xf32>
    %c0_69 = arith.constant 0 : index
    %c0_70 = arith.constant 0 : index
    %c0_71 = arith.constant 0 : index
    %186 = vector.load %arg10[%c0_69, %c0_70, %c0_71] : memref<2x1x32xf32, #tpu.memory_space<vmem>>, vector<1x1x32xf32>
    %187 = vector.shape_cast %186 : vector<1x1x32xf32> to vector<1x32xf32>
    %188 = vector.broadcast %187 : vector<1x32xf32> to vector<8x32xf32>
    %189 = arith.addf %185, %188 : vector<8x32xf32>
    %190 = arith.addf %7, %189 : vector<8x32xf32>
    %c0_72 = arith.constant 0 : index
    %c0_73 = arith.constant 0 : index
    %c0_74 = arith.constant 0 : index
    %191 = vector.load %arg11[%c0_72, %c0_73, %c0_74] : memref<2x1x32xf32, #tpu.memory_space<vmem>>, vector<1x1x32xf32>
    %192 = vector.shape_cast %191 : vector<1x1x32xf32> to vector<1x32xf32>
    %c0_75 = arith.constant 0 : index
    %c0_76 = arith.constant 0 : index
    %c0_77 = arith.constant 0 : index
    %193 = vector.load %arg12[%c0_75, %c0_76, %c0_77] : memref<2x1x32xf32, #tpu.memory_space<vmem>>, vector<1x1x32xf32>
    %194 = vector.shape_cast %193 : vector<1x1x32xf32> to vector<1x32xf32>
    %cst_78 = arith.constant dense<0.000000e+00> : vector<8xf32>
    %195 = vector.multi_reduction <add>, %190, %cst_78 [1] : vector<8x32xf32> to vector<8xf32>
    %196 = vector.shape_cast %195 : vector<8xf32> to vector<8x1xf32>
    %cst_79 = arith.constant 3.200000e+01 : f32
    %197 = vector.broadcast %cst_79 : f32 to vector<8x1xf32>
    %198 = arith.divf %196, %197 : vector<8x1xf32>
    %199 = vector.broadcast %198 : vector<8x1xf32> to vector<8x32xf32>
    %200 = arith.subf %190, %199 : vector<8x32xf32>
    %201 = arith.mulf %200, %200 : vector<8x32xf32>
    %cst_80 = arith.constant dense<0.000000e+00> : vector<8xf32>
    %202 = vector.multi_reduction <add>, %201, %cst_80 [1] : vector<8x32xf32> to vector<8xf32>
    %203 = vector.shape_cast %202 : vector<8xf32> to vector<8x1xf32>
    %cst_81 = arith.constant 3.200000e+01 : f32
    %204 = vector.broadcast %cst_81 : f32 to vector<8x1xf32>
    %205 = arith.divf %203, %204 : vector<8x1xf32>
    %206 = vector.broadcast %198 : vector<8x1xf32> to vector<8x32xf32>
    %207 = arith.subf %190, %206 : vector<8x32xf32>
    %cst_82 = arith.constant 9.99999997E-7 : f32
    %208 = vector.broadcast %cst_82 : f32 to vector<8x1xf32>
    %209 = arith.addf %205, %208 : vector<8x1xf32>
    %210 = math.rsqrt %209 : vector<8x1xf32>
    %211 = vector.broadcast %210 : vector<8x1xf32> to vector<8x32xf32>
    %212 = arith.mulf %207, %211 : vector<8x32xf32>
    %213 = vector.broadcast %192 : vector<1x32xf32> to vector<8x32xf32>
    %214 = arith.mulf %212, %213 : vector<8x32xf32>
    %215 = vector.broadcast %194 : vector<1x32xf32> to vector<8x32xf32>
    %216 = arith.addf %214, %215 : vector<8x32xf32>
    %c0_83 = arith.constant 0 : index
    %c0_84 = arith.constant 0 : index
    %c0_85 = arith.constant 0 : index
    %217 = vector.load %arg13[%c0_83, %c0_84, %c0_85] : memref<2x32x64xf32, #tpu.memory_space<vmem>>, vector<1x32x64xf32>
    %218 = vector.shape_cast %217 : vector<1x32x64xf32> to vector<32x64xf32>
    %cst_86 = arith.constant dense<0.000000e+00> : vector<8x64xf32>
    %219 = tpu.matmul %216, %218, %cst_86 {dimension_numbers = #tpu.dot_dimension_numbers<[1], [0], [0], [1], [0, 0, 1, 1], [], []>} : vector<8x32xf32>, vector<32x64xf32>, vector<8x64xf32> -> vector<8x64xf32>
    %c0_87 = arith.constant 0 : index
    %c0_88 = arith.constant 0 : index
    %c0_89 = arith.constant 0 : index
    %220 = vector.load %arg14[%c0_87, %c0_88, %c0_89] : memref<2x1x64xf32, #tpu.memory_space<vmem>>, vector<1x1x64xf32>
    %221 = vector.shape_cast %220 : vector<1x1x64xf32> to vector<1x64xf32>
    %222 = vector.broadcast %221 : vector<1x64xf32> to vector<8x64xf32>
    %223 = arith.addf %219, %222 : vector<8x64xf32>
    %cst_90 = arith.constant 5.000000e-01 : f32
    %224 = vector.broadcast %cst_90 : f32 to vector<8x64xf32>
    %225 = arith.mulf %224, %223 : vector<8x64xf32>
    %cst_91 = arith.constant 4.471500e-02 : f32
    %226 = vector.broadcast %cst_91 : f32 to vector<8x64xf32>
    %227 = arith.mulf %226, %223 : vector<8x64xf32>
    %228 = arith.mulf %227, %223 : vector<8x64xf32>
    %229 = arith.mulf %228, %223 : vector<8x64xf32>
    %230 = arith.addf %223, %229 : vector<8x64xf32>
    %cst_92 = arith.constant 0.797884583 : f32
    %231 = vector.broadcast %cst_92 : f32 to vector<8x64xf32>
    %232 = arith.mulf %231, %230 : vector<8x64xf32>
    %233 = math.tanh %232 : vector<8x64xf32>
    %cst_93 = arith.constant 1.000000e+00 : f32
    %234 = vector.broadcast %cst_93 : f32 to vector<8x64xf32>
    %235 = arith.addf %234, %233 : vector<8x64xf32>
    %236 = arith.mulf %225, %235 : vector<8x64xf32>
    %c0_94 = arith.constant 0 : index
    %c0_95 = arith.constant 0 : index
    %c0_96 = arith.constant 0 : index
    %237 = vector.load %arg15[%c0_94, %c0_95, %c0_96] : memref<2x64x32xf32, #tpu.memory_space<vmem>>, vector<1x64x32xf32>
    %238 = vector.shape_cast %237 : vector<1x64x32xf32> to vector<64x32xf32>
    %cst_97 = arith.constant dense<0.000000e+00> : vector<8x32xf32>
    %239 = tpu.matmul %236, %238, %cst_97 {dimension_numbers = #tpu.dot_dimension_numbers<[1], [0], [0], [1], [0, 0, 1, 1], [], []>} : vector<8x64xf32>, vector<64x32xf32>, vector<8x32xf32> -> vector<8x32xf32>
    %c0_98 = arith.constant 0 : index
    %c0_99 = arith.constant 0 : index
    %c0_100 = arith.constant 0 : index
    %240 = vector.load %arg16[%c0_98, %c0_99, %c0_100] : memref<2x1x32xf32, #tpu.memory_space<vmem>>, vector<1x1x32xf32>
    %241 = vector.shape_cast %240 : vector<1x1x32xf32> to vector<1x32xf32>
    %242 = vector.broadcast %241 : vector<1x32xf32> to vector<8x32xf32>
    %243 = arith.addf %239, %242 : vector<8x32xf32>
    %244 = arith.addf %190, %243 : vector<8x32xf32>
    %c1 = arith.constant 1 : index
    %c0_101 = arith.constant 0 : index
    %c0_102 = arith.constant 0 : index
    %245 = vector.load %arg5[%c1, %c0_101, %c0_102] : memref<2x1x32xf32, #tpu.memory_space<vmem>>, vector<1x1x32xf32>
    %246 = vector.shape_cast %245 : vector<1x1x32xf32> to vector<1x32xf32>
    %c1_103 = arith.constant 1 : index
    %c0_104 = arith.constant 0 : index
    %c0_105 = arith.constant 0 : index
    %247 = vector.load %arg6[%c1_103, %c0_104, %c0_105] : memref<2x1x32xf32, #tpu.memory_space<vmem>>, vector<1x1x32xf32>
    %248 = vector.shape_cast %247 : vector<1x1x32xf32> to vector<1x32xf32>
    %cst_106 = arith.constant dense<0.000000e+00> : vector<8xf32>
    %249 = vector.multi_reduction <add>, %244, %cst_106 [1] : vector<8x32xf32> to vector<8xf32>
    %250 = vector.shape_cast %249 : vector<8xf32> to vector<8x1xf32>
    %cst_107 = arith.constant 3.200000e+01 : f32
    %251 = vector.broadcast %cst_107 : f32 to vector<8x1xf32>
    %252 = arith.divf %250, %251 : vector<8x1xf32>
    %253 = vector.broadcast %252 : vector<8x1xf32> to vector<8x32xf32>
    %254 = arith.subf %244, %253 : vector<8x32xf32>
    %255 = arith.mulf %254, %254 : vector<8x32xf32>
    %cst_108 = arith.constant dense<0.000000e+00> : vector<8xf32>
    %256 = vector.multi_reduction <add>, %255, %cst_108 [1] : vector<8x32xf32> to vector<8xf32>
    %257 = vector.shape_cast %256 : vector<8xf32> to vector<8x1xf32>
    %cst_109 = arith.constant 3.200000e+01 : f32
    %258 = vector.broadcast %cst_109 : f32 to vector<8x1xf32>
    %259 = arith.divf %257, %258 : vector<8x1xf32>
    %260 = vector.broadcast %252 : vector<8x1xf32> to vector<8x32xf32>
    %261 = arith.subf %244, %260 : vector<8x32xf32>
    %cst_110 = arith.constant 9.99999997E-7 : f32
    %262 = vector.broadcast %cst_110 : f32 to vector<8x1xf32>
    %263 = arith.addf %259, %262 : vector<8x1xf32>
    %264 = math.rsqrt %263 : vector<8x1xf32>
    %265 = vector.broadcast %264 : vector<8x1xf32> to vector<8x32xf32>
    %266 = arith.mulf %261, %265 : vector<8x32xf32>
    %267 = vector.broadcast %246 : vector<1x32xf32> to vector<8x32xf32>
    %268 = arith.mulf %266, %267 : vector<8x32xf32>
    %269 = vector.broadcast %248 : vector<1x32xf32> to vector<8x32xf32>
    %270 = arith.addf %268, %269 : vector<8x32xf32>
    %c1_111 = arith.constant 1 : index
    %c0_112 = arith.constant 0 : index
    %c0_113 = arith.constant 0 : index
    %271 = vector.load %arg7[%c1_111, %c0_112, %c0_113] : memref<2x32x96xf32, #tpu.memory_space<vmem>>, vector<1x32x96xf32>
    %272 = vector.shape_cast %271 : vector<1x32x96xf32> to vector<32x96xf32>
    %cst_114 = arith.constant dense<0.000000e+00> : vector<8x96xf32>
    %273 = tpu.matmul %270, %272, %cst_114 {dimension_numbers = #tpu.dot_dimension_numbers<[1], [0], [0], [1], [0, 0, 1, 1], [], []>} : vector<8x32xf32>, vector<32x96xf32>, vector<8x96xf32> -> vector<8x96xf32>
    %c1_115 = arith.constant 1 : index
    %c0_116 = arith.constant 0 : index
    %c0_117 = arith.constant 0 : index
    %274 = vector.load %arg8[%c1_115, %c0_116, %c0_117] : memref<2x1x96xf32, #tpu.memory_space<vmem>>, vector<1x1x96xf32>
    %275 = vector.shape_cast %274 : vector<1x1x96xf32> to vector<1x96xf32>
    %276 = vector.broadcast %275 : vector<1x96xf32> to vector<8x96xf32>
    %277 = arith.addf %273, %276 : vector<8x96xf32>
    %278 = vector.extract_strided_slice %277 {offsets = [0, 0], sizes = [8, 32], strides = [1, 1]} : vector<8x96xf32> to vector<8x32xf32>
    %279 = vector.extract_strided_slice %277 {offsets = [0, 32], sizes = [8, 32], strides = [1, 1]} : vector<8x96xf32> to vector<8x32xf32>
    %280 = vector.extract_strided_slice %277 {offsets = [0, 64], sizes = [8, 32], strides = [1, 1]} : vector<8x96xf32> to vector<8x32xf32>
    %281 = vector.extract_strided_slice %278 {offsets = [0, 0], sizes = [4, 8], strides = [1, 1]} : vector<8x32xf32> to vector<4x8xf32>
    %282 = vector.extract_strided_slice %279 {offsets = [0, 0], sizes = [4, 8], strides = [1, 1]} : vector<8x32xf32> to vector<4x8xf32>
    %283 = vector.extract_strided_slice %280 {offsets = [0, 0], sizes = [4, 8], strides = [1, 1]} : vector<8x32xf32> to vector<4x8xf32>
    %cst_118 = arith.constant dense<0.000000e+00> : vector<4x4xf32>
    %284 = tpu.matmul %281, %282, %cst_118 {dimension_numbers = #tpu.dot_dimension_numbers<[1], [1], [0], [0], [0, 0, 1, 0], [], []>} : vector<4x8xf32>, vector<4x8xf32>, vector<4x4xf32> -> vector<4x4xf32>
    %cst_119 = arith.constant 0.353553385 : f32
    %285 = vector.broadcast %cst_119 : f32 to vector<4x4xf32>
    %286 = arith.mulf %284, %285 : vector<4x4xf32>
    %cst_120 = arith.constant dense<0xFF800000> : vector<4xf32>
    %287 = vector.multi_reduction <maximumf>, %286, %cst_120 [1] : vector<4x4xf32> to vector<4xf32>
    %288 = vector.shape_cast %287 : vector<4xf32> to vector<4x1xf32>
    %289 = vector.broadcast %288 : vector<4x1xf32> to vector<4x4xf32>
    %290 = arith.subf %286, %289 : vector<4x4xf32>
    %291 = math.exp %290 : vector<4x4xf32>
    %cst_121 = arith.constant dense<0.000000e+00> : vector<4xf32>
    %292 = vector.multi_reduction <add>, %291, %cst_121 [1] : vector<4x4xf32> to vector<4xf32>
    %293 = vector.shape_cast %292 : vector<4xf32> to vector<4x1xf32>
    %294 = tpu.reciprocal %293 {approx = true} : vector<4x1xf32> -> vector<4x1xf32>
    %295 = vector.broadcast %294 : vector<4x1xf32> to vector<4x4xf32>
    %296 = arith.mulf %291, %295 : vector<4x4xf32>
    %cst_122 = arith.constant dense<0.000000e+00> : vector<4x8xf32>
    %297 = tpu.matmul %296, %283, %cst_122 {dimension_numbers = #tpu.dot_dimension_numbers<[1], [0], [0], [1], [0, 0, 1, 1], [], []>} : vector<4x4xf32>, vector<4x8xf32>, vector<4x8xf32> -> vector<4x8xf32>
    %298 = vector.extract_strided_slice %278 {offsets = [0, 8], sizes = [4, 8], strides = [1, 1]} : vector<8x32xf32> to vector<4x8xf32>
    %299 = vector.extract_strided_slice %279 {offsets = [0, 8], sizes = [4, 8], strides = [1, 1]} : vector<8x32xf32> to vector<4x8xf32>
    %300 = vector.extract_strided_slice %280 {offsets = [0, 8], sizes = [4, 8], strides = [1, 1]} : vector<8x32xf32> to vector<4x8xf32>
    %cst_123 = arith.constant dense<0.000000e+00> : vector<4x4xf32>
    %301 = tpu.matmul %298, %299, %cst_123 {dimension_numbers = #tpu.dot_dimension_numbers<[1], [1], [0], [0], [0, 0, 1, 0], [], []>} : vector<4x8xf32>, vector<4x8xf32>, vector<4x4xf32> -> vector<4x4xf32>
    %cst_124 = arith.constant 0.353553385 : f32
    %302 = vector.broadcast %cst_124 : f32 to vector<4x4xf32>
    %303 = arith.mulf %301, %302 : vector<4x4xf32>
    %cst_125 = arith.constant dense<0xFF800000> : vector<4xf32>
    %304 = vector.multi_reduction <maximumf>, %303, %cst_125 [1] : vector<4x4xf32> to vector<4xf32>
    %305 = vector.shape_cast %304 : vector<4xf32> to vector<4x1xf32>
    %306 = vector.broadcast %305 : vector<4x1xf32> to vector<4x4xf32>
    %307 = arith.subf %303, %306 : vector<4x4xf32>
    %308 = math.exp %307 : vector<4x4xf32>
    %cst_126 = arith.constant dense<0.000000e+00> : vector<4xf32>
    %309 = vector.multi_reduction <add>, %308, %cst_126 [1] : vector<4x4xf32> to vector<4xf32>
    %310 = vector.shape_cast %309 : vector<4xf32> to vector<4x1xf32>
    %311 = tpu.reciprocal %310 {approx = true} : vector<4x1xf32> -> vector<4x1xf32>
    %312 = vector.broadcast %311 : vector<4x1xf32> to vector<4x4xf32>
    %313 = arith.mulf %308, %312 : vector<4x4xf32>
    %cst_127 = arith.constant dense<0.000000e+00> : vector<4x8xf32>
    %314 = tpu.matmul %313, %300, %cst_127 {dimension_numbers = #tpu.dot_dimension_numbers<[1], [0], [0], [1], [0, 0, 1, 1], [], []>} : vector<4x4xf32>, vector<4x8xf32>, vector<4x8xf32> -> vector<4x8xf32>
    %315 = vector.extract_strided_slice %278 {offsets = [0, 16], sizes = [4, 8], strides = [1, 1]} : vector<8x32xf32> to vector<4x8xf32>
    %316 = vector.extract_strided_slice %279 {offsets = [0, 16], sizes = [4, 8], strides = [1, 1]} : vector<8x32xf32> to vector<4x8xf32>
    %317 = vector.extract_strided_slice %280 {offsets = [0, 16], sizes = [4, 8], strides = [1, 1]} : vector<8x32xf32> to vector<4x8xf32>
    %cst_128 = arith.constant dense<0.000000e+00> : vector<4x4xf32>
    %318 = tpu.matmul %315, %316, %cst_128 {dimension_numbers = #tpu.dot_dimension_numbers<[1], [1], [0], [0], [0, 0, 1, 0], [], []>} : vector<4x8xf32>, vector<4x8xf32>, vector<4x4xf32> -> vector<4x4xf32>
    %cst_129 = arith.constant 0.353553385 : f32
    %319 = vector.broadcast %cst_129 : f32 to vector<4x4xf32>
    %320 = arith.mulf %318, %319 : vector<4x4xf32>
    %cst_130 = arith.constant dense<0xFF800000> : vector<4xf32>
    %321 = vector.multi_reduction <maximumf>, %320, %cst_130 [1] : vector<4x4xf32> to vector<4xf32>
    %322 = vector.shape_cast %321 : vector<4xf32> to vector<4x1xf32>
    %323 = vector.broadcast %322 : vector<4x1xf32> to vector<4x4xf32>
    %324 = arith.subf %320, %323 : vector<4x4xf32>
    %325 = math.exp %324 : vector<4x4xf32>
    %cst_131 = arith.constant dense<0.000000e+00> : vector<4xf32>
    %326 = vector.multi_reduction <add>, %325, %cst_131 [1] : vector<4x4xf32> to vector<4xf32>
    %327 = vector.shape_cast %326 : vector<4xf32> to vector<4x1xf32>
    %328 = tpu.reciprocal %327 {approx = true} : vector<4x1xf32> -> vector<4x1xf32>
    %329 = vector.broadcast %328 : vector<4x1xf32> to vector<4x4xf32>
    %330 = arith.mulf %325, %329 : vector<4x4xf32>
    %cst_132 = arith.constant dense<0.000000e+00> : vector<4x8xf32>
    %331 = tpu.matmul %330, %317, %cst_132 {dimension_numbers = #tpu.dot_dimension_numbers<[1], [0], [0], [1], [0, 0, 1, 1], [], []>} : vector<4x4xf32>, vector<4x8xf32>, vector<4x8xf32> -> vector<4x8xf32>
    %332 = vector.extract_strided_slice %278 {offsets = [0, 24], sizes = [4, 8], strides = [1, 1]} : vector<8x32xf32> to vector<4x8xf32>
    %333 = vector.extract_strided_slice %279 {offsets = [0, 24], sizes = [4, 8], strides = [1, 1]} : vector<8x32xf32> to vector<4x8xf32>
    %334 = vector.extract_strided_slice %280 {offsets = [0, 24], sizes = [4, 8], strides = [1, 1]} : vector<8x32xf32> to vector<4x8xf32>
    %cst_133 = arith.constant dense<0.000000e+00> : vector<4x4xf32>
    %335 = tpu.matmul %332, %333, %cst_133 {dimension_numbers = #tpu.dot_dimension_numbers<[1], [1], [0], [0], [0, 0, 1, 0], [], []>} : vector<4x8xf32>, vector<4x8xf32>, vector<4x4xf32> -> vector<4x4xf32>
    %cst_134 = arith.constant 0.353553385 : f32
    %336 = vector.broadcast %cst_134 : f32 to vector<4x4xf32>
    %337 = arith.mulf %335, %336 : vector<4x4xf32>
    %cst_135 = arith.constant dense<0xFF800000> : vector<4xf32>
    %338 = vector.multi_reduction <maximumf>, %337, %cst_135 [1] : vector<4x4xf32> to vector<4xf32>
    %339 = vector.shape_cast %338 : vector<4xf32> to vector<4x1xf32>
    %340 = vector.broadcast %339 : vector<4x1xf32> to vector<4x4xf32>
    %341 = arith.subf %337, %340 : vector<4x4xf32>
    %342 = math.exp %341 : vector<4x4xf32>
    %cst_136 = arith.constant dense<0.000000e+00> : vector<4xf32>
    %343 = vector.multi_reduction <add>, %342, %cst_136 [1] : vector<4x4xf32> to vector<4xf32>
    %344 = vector.shape_cast %343 : vector<4xf32> to vector<4x1xf32>
    %345 = tpu.reciprocal %344 {approx = true} : vector<4x1xf32> -> vector<4x1xf32>
    %346 = vector.broadcast %345 : vector<4x1xf32> to vector<4x4xf32>
    %347 = arith.mulf %342, %346 : vector<4x4xf32>
    %cst_137 = arith.constant dense<0.000000e+00> : vector<4x8xf32>
    %348 = tpu.matmul %347, %334, %cst_137 {dimension_numbers = #tpu.dot_dimension_numbers<[1], [0], [0], [1], [0, 0, 1, 1], [], []>} : vector<4x4xf32>, vector<4x8xf32>, vector<4x8xf32> -> vector<4x8xf32>
    %349 = tpu.concatenate %297, %314, %331, %348 in 1 : vector<4x8xf32>, vector<4x8xf32>, vector<4x8xf32>, vector<4x8xf32> -> vector<4x32xf32>
    %350 = vector.extract_strided_slice %278 {offsets = [4, 0], sizes = [4, 8], strides = [1, 1]} : vector<8x32xf32> to vector<4x8xf32>
    %351 = vector.extract_strided_slice %279 {offsets = [4, 0], sizes = [4, 8], strides = [1, 1]} : vector<8x32xf32> to vector<4x8xf32>
    %352 = vector.extract_strided_slice %280 {offsets = [4, 0], sizes = [4, 8], strides = [1, 1]} : vector<8x32xf32> to vector<4x8xf32>
    %cst_138 = arith.constant dense<0.000000e+00> : vector<4x4xf32>
    %353 = tpu.matmul %350, %351, %cst_138 {dimension_numbers = #tpu.dot_dimension_numbers<[1], [1], [0], [0], [0, 0, 1, 0], [], []>} : vector<4x8xf32>, vector<4x8xf32>, vector<4x4xf32> -> vector<4x4xf32>
    %cst_139 = arith.constant 0.353553385 : f32
    %354 = vector.broadcast %cst_139 : f32 to vector<4x4xf32>
    %355 = arith.mulf %353, %354 : vector<4x4xf32>
    %cst_140 = arith.constant dense<0xFF800000> : vector<4xf32>
    %356 = vector.multi_reduction <maximumf>, %355, %cst_140 [1] : vector<4x4xf32> to vector<4xf32>
    %357 = vector.shape_cast %356 : vector<4xf32> to vector<4x1xf32>
    %358 = vector.broadcast %357 : vector<4x1xf32> to vector<4x4xf32>
    %359 = arith.subf %355, %358 : vector<4x4xf32>
    %360 = math.exp %359 : vector<4x4xf32>
    %cst_141 = arith.constant dense<0.000000e+00> : vector<4xf32>
    %361 = vector.multi_reduction <add>, %360, %cst_141 [1] : vector<4x4xf32> to vector<4xf32>
    %362 = vector.shape_cast %361 : vector<4xf32> to vector<4x1xf32>
    %363 = tpu.reciprocal %362 {approx = true} : vector<4x1xf32> -> vector<4x1xf32>
    %364 = vector.broadcast %363 : vector<4x1xf32> to vector<4x4xf32>
    %365 = arith.mulf %360, %364 : vector<4x4xf32>
    %cst_142 = arith.constant dense<0.000000e+00> : vector<4x8xf32>
    %366 = tpu.matmul %365, %352, %cst_142 {dimension_numbers = #tpu.dot_dimension_numbers<[1], [0], [0], [1], [0, 0, 1, 1], [], []>} : vector<4x4xf32>, vector<4x8xf32>, vector<4x8xf32> -> vector<4x8xf32>
    %367 = vector.extract_strided_slice %278 {offsets = [4, 8], sizes = [4, 8], strides = [1, 1]} : vector<8x32xf32> to vector<4x8xf32>
    %368 = vector.extract_strided_slice %279 {offsets = [4, 8], sizes = [4, 8], strides = [1, 1]} : vector<8x32xf32> to vector<4x8xf32>
    %369 = vector.extract_strided_slice %280 {offsets = [4, 8], sizes = [4, 8], strides = [1, 1]} : vector<8x32xf32> to vector<4x8xf32>
    %cst_143 = arith.constant dense<0.000000e+00> : vector<4x4xf32>
    %370 = tpu.matmul %367, %368, %cst_143 {dimension_numbers = #tpu.dot_dimension_numbers<[1], [1], [0], [0], [0, 0, 1, 0], [], []>} : vector<4x8xf32>, vector<4x8xf32>, vector<4x4xf32> -> vector<4x4xf32>
    %cst_144 = arith.constant 0.353553385 : f32
    %371 = vector.broadcast %cst_144 : f32 to vector<4x4xf32>
    %372 = arith.mulf %370, %371 : vector<4x4xf32>
    %cst_145 = arith.constant dense<0xFF800000> : vector<4xf32>
    %373 = vector.multi_reduction <maximumf>, %372, %cst_145 [1] : vector<4x4xf32> to vector<4xf32>
    %374 = vector.shape_cast %373 : vector<4xf32> to vector<4x1xf32>
    %375 = vector.broadcast %374 : vector<4x1xf32> to vector<4x4xf32>
    %376 = arith.subf %372, %375 : vector<4x4xf32>
    %377 = math.exp %376 : vector<4x4xf32>
    %cst_146 = arith.constant dense<0.000000e+00> : vector<4xf32>
    %378 = vector.multi_reduction <add>, %377, %cst_146 [1] : vector<4x4xf32> to vector<4xf32>
    %379 = vector.shape_cast %378 : vector<4xf32> to vector<4x1xf32>
    %380 = tpu.reciprocal %379 {approx = true} : vector<4x1xf32> -> vector<4x1xf32>
    %381 = vector.broadcast %380 : vector<4x1xf32> to vector<4x4xf32>
    %382 = arith.mulf %377, %381 : vector<4x4xf32>
    %cst_147 = arith.constant dense<0.000000e+00> : vector<4x8xf32>
    %383 = tpu.matmul %382, %369, %cst_147 {dimension_numbers = #tpu.dot_dimension_numbers<[1], [0], [0], [1], [0, 0, 1, 1], [], []>} : vector<4x4xf32>, vector<4x8xf32>, vector<4x8xf32> -> vector<4x8xf32>
    %384 = vector.extract_strided_slice %278 {offsets = [4, 16], sizes = [4, 8], strides = [1, 1]} : vector<8x32xf32> to vector<4x8xf32>
    %385 = vector.extract_strided_slice %279 {offsets = [4, 16], sizes = [4, 8], strides = [1, 1]} : vector<8x32xf32> to vector<4x8xf32>
    %386 = vector.extract_strided_slice %280 {offsets = [4, 16], sizes = [4, 8], strides = [1, 1]} : vector<8x32xf32> to vector<4x8xf32>
    %cst_148 = arith.constant dense<0.000000e+00> : vector<4x4xf32>
    %387 = tpu.matmul %384, %385, %cst_148 {dimension_numbers = #tpu.dot_dimension_numbers<[1], [1], [0], [0], [0, 0, 1, 0], [], []>} : vector<4x8xf32>, vector<4x8xf32>, vector<4x4xf32> -> vector<4x4xf32>
    %cst_149 = arith.constant 0.353553385 : f32
    %388 = vector.broadcast %cst_149 : f32 to vector<4x4xf32>
    %389 = arith.mulf %387, %388 : vector<4x4xf32>
    %cst_150 = arith.constant dense<0xFF800000> : vector<4xf32>
    %390 = vector.multi_reduction <maximumf>, %389, %cst_150 [1] : vector<4x4xf32> to vector<4xf32>
    %391 = vector.shape_cast %390 : vector<4xf32> to vector<4x1xf32>
    %392 = vector.broadcast %391 : vector<4x1xf32> to vector<4x4xf32>
    %393 = arith.subf %389, %392 : vector<4x4xf32>
    %394 = math.exp %393 : vector<4x4xf32>
    %cst_151 = arith.constant dense<0.000000e+00> : vector<4xf32>
    %395 = vector.multi_reduction <add>, %394, %cst_151 [1] : vector<4x4xf32> to vector<4xf32>
    %396 = vector.shape_cast %395 : vector<4xf32> to vector<4x1xf32>
    %397 = tpu.reciprocal %396 {approx = true} : vector<4x1xf32> -> vector<4x1xf32>
    %398 = vector.broadcast %397 : vector<4x1xf32> to vector<4x4xf32>
    %399 = arith.mulf %394, %398 : vector<4x4xf32>
    %cst_152 = arith.constant dense<0.000000e+00> : vector<4x8xf32>
    %400 = tpu.matmul %399, %386, %cst_152 {dimension_numbers = #tpu.dot_dimension_numbers<[1], [0], [0], [1], [0, 0, 1, 1], [], []>} : vector<4x4xf32>, vector<4x8xf32>, vector<4x8xf32> -> vector<4x8xf32>
    %401 = vector.extract_strided_slice %278 {offsets = [4, 24], sizes = [4, 8], strides = [1, 1]} : vector<8x32xf32> to vector<4x8xf32>
    %402 = vector.extract_strided_slice %279 {offsets = [4, 24], sizes = [4, 8], strides = [1, 1]} : vector<8x32xf32> to vector<4x8xf32>
    %403 = vector.extract_strided_slice %280 {offsets = [4, 24], sizes = [4, 8], strides = [1, 1]} : vector<8x32xf32> to vector<4x8xf32>
    %cst_153 = arith.constant dense<0.000000e+00> : vector<4x4xf32>
    %404 = tpu.matmul %401, %402, %cst_153 {dimension_numbers = #tpu.dot_dimension_numbers<[1], [1], [0], [0], [0, 0, 1, 0], [], []>} : vector<4x8xf32>, vector<4x8xf32>, vector<4x4xf32> -> vector<4x4xf32>
    %cst_154 = arith.constant 0.353553385 : f32
    %405 = vector.broadcast %cst_154 : f32 to vector<4x4xf32>
    %406 = arith.mulf %404, %405 : vector<4x4xf32>
    %cst_155 = arith.constant dense<0xFF800000> : vector<4xf32>
    %407 = vector.multi_reduction <maximumf>, %406, %cst_155 [1] : vector<4x4xf32> to vector<4xf32>
    %408 = vector.shape_cast %407 : vector<4xf32> to vector<4x1xf32>
    %409 = vector.broadcast %408 : vector<4x1xf32> to vector<4x4xf32>
    %410 = arith.subf %406, %409 : vector<4x4xf32>
    %411 = math.exp %410 : vector<4x4xf32>
    %cst_156 = arith.constant dense<0.000000e+00> : vector<4xf32>
    %412 = vector.multi_reduction <add>, %411, %cst_156 [1] : vector<4x4xf32> to vector<4xf32>
    %413 = vector.shape_cast %412 : vector<4xf32> to vector<4x1xf32>
    %414 = tpu.reciprocal %413 {approx = true} : vector<4x1xf32> -> vector<4x1xf32>
    %415 = vector.broadcast %414 : vector<4x1xf32> to vector<4x4xf32>
    %416 = arith.mulf %411, %415 : vector<4x4xf32>
    %cst_157 = arith.constant dense<0.000000e+00> : vector<4x8xf32>
    %417 = tpu.matmul %416, %403, %cst_157 {dimension_numbers = #tpu.dot_dimension_numbers<[1], [0], [0], [1], [0, 0, 1, 1], [], []>} : vector<4x4xf32>, vector<4x8xf32>, vector<4x8xf32> -> vector<4x8xf32>
    %418 = tpu.concatenate %366, %383, %400, %417 in 1 : vector<4x8xf32>, vector<4x8xf32>, vector<4x8xf32>, vector<4x8xf32> -> vector<4x32xf32>
    %419 = tpu.concatenate %349, %418 in 0 : vector<4x32xf32>, vector<4x32xf32> -> vector<8x32xf32>
    %c1_158 = arith.constant 1 : index
    %c0_159 = arith.constant 0 : index
    %c0_160 = arith.constant 0 : index
    %420 = vector.load %arg9[%c1_158, %c0_159, %c0_160] : memref<2x32x32xf32, #tpu.memory_space<vmem>>, vector<1x32x32xf32>
    %421 = vector.shape_cast %420 : vector<1x32x32xf32> to vector<32x32xf32>
    %cst_161 = arith.constant dense<0.000000e+00> : vector<8x32xf32>
    %422 = tpu.matmul %419, %421, %cst_161 {dimension_numbers = #tpu.dot_dimension_numbers<[1], [0], [0], [1], [0, 0, 1, 1], [], []>} : vector<8x32xf32>, vector<32x32xf32>, vector<8x32xf32> -> vector<8x32xf32>
    %c1_162 = arith.constant 1 : index
    %c0_163 = arith.constant 0 : index
    %c0_164 = arith.constant 0 : index
    %423 = vector.load %arg10[%c1_162, %c0_163, %c0_164] : memref<2x1x32xf32, #tpu.memory_space<vmem>>, vector<1x1x32xf32>
    %424 = vector.shape_cast %423 : vector<1x1x32xf32> to vector<1x32xf32>
    %425 = vector.broadcast %424 : vector<1x32xf32> to vector<8x32xf32>
    %426 = arith.addf %422, %425 : vector<8x32xf32>
    %427 = arith.addf %244, %426 : vector<8x32xf32>
    %c1_165 = arith.constant 1 : index
    %c0_166 = arith.constant 0 : index
    %c0_167 = arith.constant 0 : index
    %428 = vector.load %arg11[%c1_165, %c0_166, %c0_167] : memref<2x1x32xf32, #tpu.memory_space<vmem>>, vector<1x1x32xf32>
    %429 = vector.shape_cast %428 : vector<1x1x32xf32> to vector<1x32xf32>
    %c1_168 = arith.constant 1 : index
    %c0_169 = arith.constant 0 : index
    %c0_170 = arith.constant 0 : index
    %430 = vector.load %arg12[%c1_168, %c0_169, %c0_170] : memref<2x1x32xf32, #tpu.memory_space<vmem>>, vector<1x1x32xf32>
    %431 = vector.shape_cast %430 : vector<1x1x32xf32> to vector<1x32xf32>
    %cst_171 = arith.constant dense<0.000000e+00> : vector<8xf32>
    %432 = vector.multi_reduction <add>, %427, %cst_171 [1] : vector<8x32xf32> to vector<8xf32>
    %433 = vector.shape_cast %432 : vector<8xf32> to vector<8x1xf32>
    %cst_172 = arith.constant 3.200000e+01 : f32
    %434 = vector.broadcast %cst_172 : f32 to vector<8x1xf32>
    %435 = arith.divf %433, %434 : vector<8x1xf32>
    %436 = vector.broadcast %435 : vector<8x1xf32> to vector<8x32xf32>
    %437 = arith.subf %427, %436 : vector<8x32xf32>
    %438 = arith.mulf %437, %437 : vector<8x32xf32>
    %cst_173 = arith.constant dense<0.000000e+00> : vector<8xf32>
    %439 = vector.multi_reduction <add>, %438, %cst_173 [1] : vector<8x32xf32> to vector<8xf32>
    %440 = vector.shape_cast %439 : vector<8xf32> to vector<8x1xf32>
    %cst_174 = arith.constant 3.200000e+01 : f32
    %441 = vector.broadcast %cst_174 : f32 to vector<8x1xf32>
    %442 = arith.divf %440, %441 : vector<8x1xf32>
    %443 = vector.broadcast %435 : vector<8x1xf32> to vector<8x32xf32>
    %444 = arith.subf %427, %443 : vector<8x32xf32>
    %cst_175 = arith.constant 9.99999997E-7 : f32
    %445 = vector.broadcast %cst_175 : f32 to vector<8x1xf32>
    %446 = arith.addf %442, %445 : vector<8x1xf32>
    %447 = math.rsqrt %446 : vector<8x1xf32>
    %448 = vector.broadcast %447 : vector<8x1xf32> to vector<8x32xf32>
    %449 = arith.mulf %444, %448 : vector<8x32xf32>
    %450 = vector.broadcast %429 : vector<1x32xf32> to vector<8x32xf32>
    %451 = arith.mulf %449, %450 : vector<8x32xf32>
    %452 = vector.broadcast %431 : vector<1x32xf32> to vector<8x32xf32>
    %453 = arith.addf %451, %452 : vector<8x32xf32>
    %c1_176 = arith.constant 1 : index
    %c0_177 = arith.constant 0 : index
    %c0_178 = arith.constant 0 : index
    %454 = vector.load %arg13[%c1_176, %c0_177, %c0_178] : memref<2x32x64xf32, #tpu.memory_space<vmem>>, vector<1x32x64xf32>
    %455 = vector.shape_cast %454 : vector<1x32x64xf32> to vector<32x64xf32>
    %cst_179 = arith.constant dense<0.000000e+00> : vector<8x64xf32>
    %456 = tpu.matmul %453, %455, %cst_179 {dimension_numbers = #tpu.dot_dimension_numbers<[1], [0], [0], [1], [0, 0, 1, 1], [], []>} : vector<8x32xf32>, vector<32x64xf32>, vector<8x64xf32> -> vector<8x64xf32>
    %c1_180 = arith.constant 1 : index
    %c0_181 = arith.constant 0 : index
    %c0_182 = arith.constant 0 : index
    %457 = vector.load %arg14[%c1_180, %c0_181, %c0_182] : memref<2x1x64xf32, #tpu.memory_space<vmem>>, vector<1x1x64xf32>
    %458 = vector.shape_cast %457 : vector<1x1x64xf32> to vector<1x64xf32>
    %459 = vector.broadcast %458 : vector<1x64xf32> to vector<8x64xf32>
    %460 = arith.addf %456, %459 : vector<8x64xf32>
    %cst_183 = arith.constant 5.000000e-01 : f32
    %461 = vector.broadcast %cst_183 : f32 to vector<8x64xf32>
    %462 = arith.mulf %461, %460 : vector<8x64xf32>
    %cst_184 = arith.constant 4.471500e-02 : f32
    %463 = vector.broadcast %cst_184 : f32 to vector<8x64xf32>
    %464 = arith.mulf %463, %460 : vector<8x64xf32>
    %465 = arith.mulf %464, %460 : vector<8x64xf32>
    %466 = arith.mulf %465, %460 : vector<8x64xf32>
    %467 = arith.addf %460, %466 : vector<8x64xf32>
    %cst_185 = arith.constant 0.797884583 : f32
    %468 = vector.broadcast %cst_185 : f32 to vector<8x64xf32>
    %469 = arith.mulf %468, %467 : vector<8x64xf32>
    %470 = math.tanh %469 : vector<8x64xf32>
    %cst_186 = arith.constant 1.000000e+00 : f32
    %471 = vector.broadcast %cst_186 : f32 to vector<8x64xf32>
    %472 = arith.addf %471, %470 : vector<8x64xf32>
    %473 = arith.mulf %462, %472 : vector<8x64xf32>
    %c1_187 = arith.constant 1 : index
    %c0_188 = arith.constant 0 : index
    %c0_189 = arith.constant 0 : index
    %474 = vector.load %arg15[%c1_187, %c0_188, %c0_189] : memref<2x64x32xf32, #tpu.memory_space<vmem>>, vector<1x64x32xf32>
    %475 = vector.shape_cast %474 : vector<1x64x32xf32> to vector<64x32xf32>
    %cst_190 = arith.constant dense<0.000000e+00> : vector<8x32xf32>
    %476 = tpu.matmul %473, %475, %cst_190 {dimension_numbers = #tpu.dot_dimension_numbers<[1], [0], [0], [1], [0, 0, 1, 1], [], []>} : vector<8x64xf32>, vector<64x32xf32>, vector<8x32xf32> -> vector<8x32xf32>
    %c1_191 = arith.constant 1 : index
    %c0_192 = arith.constant 0 : index
    %c0_193 = arith.constant 0 : index
    %477 = vector.load %arg16[%c1_191, %c0_192, %c0_193] : memref<2x1x32xf32, #tpu.memory_space<vmem>>, vector<1x1x32xf32>
    %478 = vector.shape_cast %477 : vector<1x1x32xf32> to vector<1x32xf32>
    %479 = vector.broadcast %478 : vector<1x32xf32> to vector<8x32xf32>
    %480 = arith.addf %476, %479 : vector<8x32xf32>
    %481 = arith.addf %427, %480 : vector<8x32xf32>
    %c0_194 = arith.constant 0 : index
    %c0_195 = arith.constant 0 : index
    %482 = vector.load %arg17[%c0_194, %c0_195] : memref<1x32xf32, #tpu.memory_space<vmem>>, vector<1x32xf32>
    %c0_196 = arith.constant 0 : index
    %c0_197 = arith.constant 0 : index
    %483 = vector.load %arg18[%c0_196, %c0_197] : memref<1x32xf32, #tpu.memory_space<vmem>>, vector<1x32xf32>
    %cst_198 = arith.constant dense<0.000000e+00> : vector<8xf32>
    %484 = vector.multi_reduction <add>, %481, %cst_198 [1] : vector<8x32xf32> to vector<8xf32>
    %485 = vector.shape_cast %484 : vector<8xf32> to vector<8x1xf32>
    %cst_199 = arith.constant 3.200000e+01 : f32
    %486 = vector.broadcast %cst_199 : f32 to vector<8x1xf32>
    %487 = arith.divf %485, %486 : vector<8x1xf32>
    %488 = vector.broadcast %487 : vector<8x1xf32> to vector<8x32xf32>
    %489 = arith.subf %481, %488 : vector<8x32xf32>
    %490 = arith.mulf %489, %489 : vector<8x32xf32>
    %cst_200 = arith.constant dense<0.000000e+00> : vector<8xf32>
    %491 = vector.multi_reduction <add>, %490, %cst_200 [1] : vector<8x32xf32> to vector<8xf32>
    %492 = vector.shape_cast %491 : vector<8xf32> to vector<8x1xf32>
    %cst_201 = arith.constant 3.200000e+01 : f32
    %493 = vector.broadcast %cst_201 : f32 to vector<8x1xf32>
    %494 = arith.divf %492, %493 : vector<8x1xf32>
    %495 = vector.broadcast %487 : vector<8x1xf32> to vector<8x32xf32>
    %496 = arith.subf %481, %495 : vector<8x32xf32>
    %cst_202 = arith.constant 9.99999997E-7 : f32
    %497 = vector.broadcast %cst_202 : f32 to vector<8x1xf32>
    %498 = arith.addf %494, %497 : vector<8x1xf32>
    %499 = math.rsqrt %498 : vector<8x1xf32>
    %500 = vector.broadcast %499 : vector<8x1xf32> to vector<8x32xf32>
    %501 = arith.mulf %496, %500 : vector<8x32xf32>
    %502 = vector.broadcast %482 : vector<1x32xf32> to vector<8x32xf32>
    %503 = arith.mulf %501, %502 : vector<8x32xf32>
    %504 = vector.broadcast %483 : vector<1x32xf32> to vector<8x32xf32>
    %505 = arith.addf %503, %504 : vector<8x32xf32>
    %c0_203 = arith.constant 0 : index
    %c0_204 = arith.constant 0 : index
    %506 = vector.load %arg20[%c0_203, %c0_204] : memref<32x96xf32, #tpu.memory_space<vmem>>, vector<32x96xf32>
    %c0_205 = arith.constant 0 : index
    %c0_206 = arith.constant 0 : index
    %507 = vector.load %arg21[%c0_205, %c0_206] : memref<1x96xf32, #tpu.memory_space<vmem>>, vector<1x96xf32>
    %c0_207 = arith.constant 0 : index
    %c0_208 = arith.constant 0 : index
    %508 = vector.load %arg19[%c0_207, %c0_208] : memref<1x32xf32, #tpu.memory_space<vmem>>, vector<1x32xf32>
    %509 = vector.extract_strided_slice %506 {offsets = [0, 0], sizes = [32, 32], strides = [1, 1]} : vector<32x96xf32> to vector<32x32xf32>
    %cst_209 = arith.constant dense<0.000000e+00> : vector<1x32xf32>
    %510 = tpu.matmul %508, %509, %cst_209 {dimension_numbers = #tpu.dot_dimension_numbers<[1], [0], [0], [1], [0, 0, 1, 1], [], []>} : vector<1x32xf32>, vector<32x32xf32>, vector<1x32xf32> -> vector<1x32xf32>
    %511 = vector.extract_strided_slice %507 {offsets = [0, 0], sizes = [1, 32], strides = [1, 1]} : vector<1x96xf32> to vector<1x32xf32>
    %512 = arith.addf %510, %511 : vector<1x32xf32>
    %513 = vector.extract_strided_slice %506 {offsets = [0, 32], sizes = [32, 64], strides = [1, 1]} : vector<32x96xf32> to vector<32x64xf32>
    %cst_210 = arith.constant dense<0.000000e+00> : vector<8x64xf32>
    %514 = tpu.matmul %505, %513, %cst_210 {dimension_numbers = #tpu.dot_dimension_numbers<[1], [0], [0], [1], [0, 0, 1, 1], [], []>} : vector<8x32xf32>, vector<32x64xf32>, vector<8x64xf32> -> vector<8x64xf32>
    %515 = vector.extract_strided_slice %507 {offsets = [0, 32], sizes = [1, 64], strides = [1, 1]} : vector<1x96xf32> to vector<1x64xf32>
    %516 = vector.broadcast %515 : vector<1x64xf32> to vector<8x64xf32>
    %517 = arith.addf %514, %516 : vector<8x64xf32>
    %518 = vector.extract_strided_slice %517 {offsets = [0, 0], sizes = [8, 32], strides = [1, 1]} : vector<8x64xf32> to vector<8x32xf32>
    %519 = vector.extract_strided_slice %517 {offsets = [0, 32], sizes = [8, 32], strides = [1, 1]} : vector<8x64xf32> to vector<8x32xf32>
    %520 = tpu.concatenate %512, %512 in 0 : vector<1x32xf32>, vector<1x32xf32> -> vector<2x32xf32>
    %521 = vector.extract_strided_slice %520 {offsets = [0, 0], sizes = [1, 8], strides = [1, 1]} : vector<2x32xf32> to vector<1x8xf32>
    %522 = vector.extract_strided_slice %518 {offsets = [0, 0], sizes = [4, 8], strides = [1, 1]} : vector<8x32xf32> to vector<4x8xf32>
    %523 = vector.extract_strided_slice %519 {offsets = [0, 0], sizes = [4, 8], strides = [1, 1]} : vector<8x32xf32> to vector<4x8xf32>
    %cst_211 = arith.constant dense<0.000000e+00> : vector<1x4xf32>
    %524 = tpu.matmul %521, %522, %cst_211 {dimension_numbers = #tpu.dot_dimension_numbers<[1], [1], [0], [0], [0, 0, 1, 0], [], []>} : vector<1x8xf32>, vector<4x8xf32>, vector<1x4xf32> -> vector<1x4xf32>
    %cst_212 = arith.constant 0.353553385 : f32
    %525 = vector.broadcast %cst_212 : f32 to vector<1x4xf32>
    %526 = arith.mulf %524, %525 : vector<1x4xf32>
    %cst_213 = arith.constant dense<0xFF800000> : vector<1xf32>
    %527 = vector.multi_reduction <maximumf>, %526, %cst_213 [1] : vector<1x4xf32> to vector<1xf32>
    %528 = vector.shape_cast %527 : vector<1xf32> to vector<1x1xf32>
    %529 = vector.broadcast %528 : vector<1x1xf32> to vector<1x4xf32>
    %530 = arith.subf %526, %529 : vector<1x4xf32>
    %531 = math.exp %530 : vector<1x4xf32>
    %cst_214 = arith.constant dense<0.000000e+00> : vector<1xf32>
    %532 = vector.multi_reduction <add>, %531, %cst_214 [1] : vector<1x4xf32> to vector<1xf32>
    %533 = vector.shape_cast %532 : vector<1xf32> to vector<1x1xf32>
    %534 = tpu.reciprocal %533 {approx = true} : vector<1x1xf32> -> vector<1x1xf32>
    %535 = vector.broadcast %534 : vector<1x1xf32> to vector<1x4xf32>
    %536 = arith.mulf %531, %535 : vector<1x4xf32>
    %cst_215 = arith.constant dense<0.000000e+00> : vector<1x8xf32>
    %537 = tpu.matmul %536, %523, %cst_215 {dimension_numbers = #tpu.dot_dimension_numbers<[1], [0], [0], [1], [0, 0, 1, 1], [], []>} : vector<1x4xf32>, vector<4x8xf32>, vector<1x8xf32> -> vector<1x8xf32>
    %538 = vector.extract_strided_slice %520 {offsets = [0, 8], sizes = [1, 8], strides = [1, 1]} : vector<2x32xf32> to vector<1x8xf32>
    %539 = vector.extract_strided_slice %518 {offsets = [0, 8], sizes = [4, 8], strides = [1, 1]} : vector<8x32xf32> to vector<4x8xf32>
    %540 = vector.extract_strided_slice %519 {offsets = [0, 8], sizes = [4, 8], strides = [1, 1]} : vector<8x32xf32> to vector<4x8xf32>
    %cst_216 = arith.constant dense<0.000000e+00> : vector<1x4xf32>
    %541 = tpu.matmul %538, %539, %cst_216 {dimension_numbers = #tpu.dot_dimension_numbers<[1], [1], [0], [0], [0, 0, 1, 0], [], []>} : vector<1x8xf32>, vector<4x8xf32>, vector<1x4xf32> -> vector<1x4xf32>
    %cst_217 = arith.constant 0.353553385 : f32
    %542 = vector.broadcast %cst_217 : f32 to vector<1x4xf32>
    %543 = arith.mulf %541, %542 : vector<1x4xf32>
    %cst_218 = arith.constant dense<0xFF800000> : vector<1xf32>
    %544 = vector.multi_reduction <maximumf>, %543, %cst_218 [1] : vector<1x4xf32> to vector<1xf32>
    %545 = vector.shape_cast %544 : vector<1xf32> to vector<1x1xf32>
    %546 = vector.broadcast %545 : vector<1x1xf32> to vector<1x4xf32>
    %547 = arith.subf %543, %546 : vector<1x4xf32>
    %548 = math.exp %547 : vector<1x4xf32>
    %cst_219 = arith.constant dense<0.000000e+00> : vector<1xf32>
    %549 = vector.multi_reduction <add>, %548, %cst_219 [1] : vector<1x4xf32> to vector<1xf32>
    %550 = vector.shape_cast %549 : vector<1xf32> to vector<1x1xf32>
    %551 = tpu.reciprocal %550 {approx = true} : vector<1x1xf32> -> vector<1x1xf32>
    %552 = vector.broadcast %551 : vector<1x1xf32> to vector<1x4xf32>
    %553 = arith.mulf %548, %552 : vector<1x4xf32>
    %cst_220 = arith.constant dense<0.000000e+00> : vector<1x8xf32>
    %554 = tpu.matmul %553, %540, %cst_220 {dimension_numbers = #tpu.dot_dimension_numbers<[1], [0], [0], [1], [0, 0, 1, 1], [], []>} : vector<1x4xf32>, vector<4x8xf32>, vector<1x8xf32> -> vector<1x8xf32>
    %555 = vector.extract_strided_slice %520 {offsets = [0, 16], sizes = [1, 8], strides = [1, 1]} : vector<2x32xf32> to vector<1x8xf32>
    %556 = vector.extract_strided_slice %518 {offsets = [0, 16], sizes = [4, 8], strides = [1, 1]} : vector<8x32xf32> to vector<4x8xf32>
    %557 = vector.extract_strided_slice %519 {offsets = [0, 16], sizes = [4, 8], strides = [1, 1]} : vector<8x32xf32> to vector<4x8xf32>
    %cst_221 = arith.constant dense<0.000000e+00> : vector<1x4xf32>
    %558 = tpu.matmul %555, %556, %cst_221 {dimension_numbers = #tpu.dot_dimension_numbers<[1], [1], [0], [0], [0, 0, 1, 0], [], []>} : vector<1x8xf32>, vector<4x8xf32>, vector<1x4xf32> -> vector<1x4xf32>
    %cst_222 = arith.constant 0.353553385 : f32
    %559 = vector.broadcast %cst_222 : f32 to vector<1x4xf32>
    %560 = arith.mulf %558, %559 : vector<1x4xf32>
    %cst_223 = arith.constant dense<0xFF800000> : vector<1xf32>
    %561 = vector.multi_reduction <maximumf>, %560, %cst_223 [1] : vector<1x4xf32> to vector<1xf32>
    %562 = vector.shape_cast %561 : vector<1xf32> to vector<1x1xf32>
    %563 = vector.broadcast %562 : vector<1x1xf32> to vector<1x4xf32>
    %564 = arith.subf %560, %563 : vector<1x4xf32>
    %565 = math.exp %564 : vector<1x4xf32>
    %cst_224 = arith.constant dense<0.000000e+00> : vector<1xf32>
    %566 = vector.multi_reduction <add>, %565, %cst_224 [1] : vector<1x4xf32> to vector<1xf32>
    %567 = vector.shape_cast %566 : vector<1xf32> to vector<1x1xf32>
    %568 = tpu.reciprocal %567 {approx = true} : vector<1x1xf32> -> vector<1x1xf32>
    %569 = vector.broadcast %568 : vector<1x1xf32> to vector<1x4xf32>
    %570 = arith.mulf %565, %569 : vector<1x4xf32>
    %cst_225 = arith.constant dense<0.000000e+00> : vector<1x8xf32>
    %571 = tpu.matmul %570, %557, %cst_225 {dimension_numbers = #tpu.dot_dimension_numbers<[1], [0], [0], [1], [0, 0, 1, 1], [], []>} : vector<1x4xf32>, vector<4x8xf32>, vector<1x8xf32> -> vector<1x8xf32>
    %572 = vector.extract_strided_slice %520 {offsets = [0, 24], sizes = [1, 8], strides = [1, 1]} : vector<2x32xf32> to vector<1x8xf32>
    %573 = vector.extract_strided_slice %518 {offsets = [0, 24], sizes = [4, 8], strides = [1, 1]} : vector<8x32xf32> to vector<4x8xf32>
    %574 = vector.extract_strided_slice %519 {offsets = [0, 24], sizes = [4, 8], strides = [1, 1]} : vector<8x32xf32> to vector<4x8xf32>
    %cst_226 = arith.constant dense<0.000000e+00> : vector<1x4xf32>
    %575 = tpu.matmul %572, %573, %cst_226 {dimension_numbers = #tpu.dot_dimension_numbers<[1], [1], [0], [0], [0, 0, 1, 0], [], []>} : vector<1x8xf32>, vector<4x8xf32>, vector<1x4xf32> -> vector<1x4xf32>
    %cst_227 = arith.constant 0.353553385 : f32
    %576 = vector.broadcast %cst_227 : f32 to vector<1x4xf32>
    %577 = arith.mulf %575, %576 : vector<1x4xf32>
    %cst_228 = arith.constant dense<0xFF800000> : vector<1xf32>
    %578 = vector.multi_reduction <maximumf>, %577, %cst_228 [1] : vector<1x4xf32> to vector<1xf32>
    %579 = vector.shape_cast %578 : vector<1xf32> to vector<1x1xf32>
    %580 = vector.broadcast %579 : vector<1x1xf32> to vector<1x4xf32>
    %581 = arith.subf %577, %580 : vector<1x4xf32>
    %582 = math.exp %581 : vector<1x4xf32>
    %cst_229 = arith.constant dense<0.000000e+00> : vector<1xf32>
    %583 = vector.multi_reduction <add>, %582, %cst_229 [1] : vector<1x4xf32> to vector<1xf32>
    %584 = vector.shape_cast %583 : vector<1xf32> to vector<1x1xf32>
    %585 = tpu.reciprocal %584 {approx = true} : vector<1x1xf32> -> vector<1x1xf32>
    %586 = vector.broadcast %585 : vector<1x1xf32> to vector<1x4xf32>
    %587 = arith.mulf %582, %586 : vector<1x4xf32>
    %cst_230 = arith.constant dense<0.000000e+00> : vector<1x8xf32>
    %588 = tpu.matmul %587, %574, %cst_230 {dimension_numbers = #tpu.dot_dimension_numbers<[1], [0], [0], [1], [0, 0, 1, 1], [], []>} : vector<1x4xf32>, vector<4x8xf32>, vector<1x8xf32> -> vector<1x8xf32>
    %589 = tpu.concatenate %537, %554, %571, %588 in 1 : vector<1x8xf32>, vector<1x8xf32>, vector<1x8xf32>, vector<1x8xf32> -> vector<1x32xf32>
    %590 = vector.extract_strided_slice %520 {offsets = [1, 0], sizes = [1, 8], strides = [1, 1]} : vector<2x32xf32> to vector<1x8xf32>
    %591 = vector.extract_strided_slice %518 {offsets = [4, 0], sizes = [4, 8], strides = [1, 1]} : vector<8x32xf32> to vector<4x8xf32>
    %592 = vector.extract_strided_slice %519 {offsets = [4, 0], sizes = [4, 8], strides = [1, 1]} : vector<8x32xf32> to vector<4x8xf32>
    %cst_231 = arith.constant dense<0.000000e+00> : vector<1x4xf32>
    %593 = tpu.matmul %590, %591, %cst_231 {dimension_numbers = #tpu.dot_dimension_numbers<[1], [1], [0], [0], [0, 0, 1, 0], [], []>} : vector<1x8xf32>, vector<4x8xf32>, vector<1x4xf32> -> vector<1x4xf32>
    %cst_232 = arith.constant 0.353553385 : f32
    %594 = vector.broadcast %cst_232 : f32 to vector<1x4xf32>
    %595 = arith.mulf %593, %594 : vector<1x4xf32>
    %cst_233 = arith.constant dense<0xFF800000> : vector<1xf32>
    %596 = vector.multi_reduction <maximumf>, %595, %cst_233 [1] : vector<1x4xf32> to vector<1xf32>
    %597 = vector.shape_cast %596 : vector<1xf32> to vector<1x1xf32>
    %598 = vector.broadcast %597 : vector<1x1xf32> to vector<1x4xf32>
    %599 = arith.subf %595, %598 : vector<1x4xf32>
    %600 = math.exp %599 : vector<1x4xf32>
    %cst_234 = arith.constant dense<0.000000e+00> : vector<1xf32>
    %601 = vector.multi_reduction <add>, %600, %cst_234 [1] : vector<1x4xf32> to vector<1xf32>
    %602 = vector.shape_cast %601 : vector<1xf32> to vector<1x1xf32>
    %603 = tpu.reciprocal %602 {approx = true} : vector<1x1xf32> -> vector<1x1xf32>
    %604 = vector.broadcast %603 : vector<1x1xf32> to vector<1x4xf32>
    %605 = arith.mulf %600, %604 : vector<1x4xf32>
    %cst_235 = arith.constant dense<0.000000e+00> : vector<1x8xf32>
    %606 = tpu.matmul %605, %592, %cst_235 {dimension_numbers = #tpu.dot_dimension_numbers<[1], [0], [0], [1], [0, 0, 1, 1], [], []>} : vector<1x4xf32>, vector<4x8xf32>, vector<1x8xf32> -> vector<1x8xf32>
    %607 = vector.extract_strided_slice %520 {offsets = [1, 8], sizes = [1, 8], strides = [1, 1]} : vector<2x32xf32> to vector<1x8xf32>
    %608 = vector.extract_strided_slice %518 {offsets = [4, 8], sizes = [4, 8], strides = [1, 1]} : vector<8x32xf32> to vector<4x8xf32>
    %609 = vector.extract_strided_slice %519 {offsets = [4, 8], sizes = [4, 8], strides = [1, 1]} : vector<8x32xf32> to vector<4x8xf32>
    %cst_236 = arith.constant dense<0.000000e+00> : vector<1x4xf32>
    %610 = tpu.matmul %607, %608, %cst_236 {dimension_numbers = #tpu.dot_dimension_numbers<[1], [1], [0], [0], [0, 0, 1, 0], [], []>} : vector<1x8xf32>, vector<4x8xf32>, vector<1x4xf32> -> vector<1x4xf32>
    %cst_237 = arith.constant 0.353553385 : f32
    %611 = vector.broadcast %cst_237 : f32 to vector<1x4xf32>
    %612 = arith.mulf %610, %611 : vector<1x4xf32>
    %cst_238 = arith.constant dense<0xFF800000> : vector<1xf32>
    %613 = vector.multi_reduction <maximumf>, %612, %cst_238 [1] : vector<1x4xf32> to vector<1xf32>
    %614 = vector.shape_cast %613 : vector<1xf32> to vector<1x1xf32>
    %615 = vector.broadcast %614 : vector<1x1xf32> to vector<1x4xf32>
    %616 = arith.subf %612, %615 : vector<1x4xf32>
    %617 = math.exp %616 : vector<1x4xf32>
    %cst_239 = arith.constant dense<0.000000e+00> : vector<1xf32>
    %618 = vector.multi_reduction <add>, %617, %cst_239 [1] : vector<1x4xf32> to vector<1xf32>
    %619 = vector.shape_cast %618 : vector<1xf32> to vector<1x1xf32>
    %620 = tpu.reciprocal %619 {approx = true} : vector<1x1xf32> -> vector<1x1xf32>
    %621 = vector.broadcast %620 : vector<1x1xf32> to vector<1x4xf32>
    %622 = arith.mulf %617, %621 : vector<1x4xf32>
    %cst_240 = arith.constant dense<0.000000e+00> : vector<1x8xf32>
    %623 = tpu.matmul %622, %609, %cst_240 {dimension_numbers = #tpu.dot_dimension_numbers<[1], [0], [0], [1], [0, 0, 1, 1], [], []>} : vector<1x4xf32>, vector<4x8xf32>, vector<1x8xf32> -> vector<1x8xf32>
    %624 = vector.extract_strided_slice %520 {offsets = [1, 16], sizes = [1, 8], strides = [1, 1]} : vector<2x32xf32> to vector<1x8xf32>
    %625 = vector.extract_strided_slice %518 {offsets = [4, 16], sizes = [4, 8], strides = [1, 1]} : vector<8x32xf32> to vector<4x8xf32>
    %626 = vector.extract_strided_slice %519 {offsets = [4, 16], sizes = [4, 8], strides = [1, 1]} : vector<8x32xf32> to vector<4x8xf32>
    %cst_241 = arith.constant dense<0.000000e+00> : vector<1x4xf32>
    %627 = tpu.matmul %624, %625, %cst_241 {dimension_numbers = #tpu.dot_dimension_numbers<[1], [1], [0], [0], [0, 0, 1, 0], [], []>} : vector<1x8xf32>, vector<4x8xf32>, vector<1x4xf32> -> vector<1x4xf32>
    %cst_242 = arith.constant 0.353553385 : f32
    %628 = vector.broadcast %cst_242 : f32 to vector<1x4xf32>
    %629 = arith.mulf %627, %628 : vector<1x4xf32>
    %cst_243 = arith.constant dense<0xFF800000> : vector<1xf32>
    %630 = vector.multi_reduction <maximumf>, %629, %cst_243 [1] : vector<1x4xf32> to vector<1xf32>
    %631 = vector.shape_cast %630 : vector<1xf32> to vector<1x1xf32>
    %632 = vector.broadcast %631 : vector<1x1xf32> to vector<1x4xf32>
    %633 = arith.subf %629, %632 : vector<1x4xf32>
    %634 = math.exp %633 : vector<1x4xf32>
    %cst_244 = arith.constant dense<0.000000e+00> : vector<1xf32>
    %635 = vector.multi_reduction <add>, %634, %cst_244 [1] : vector<1x4xf32> to vector<1xf32>
    %636 = vector.shape_cast %635 : vector<1xf32> to vector<1x1xf32>
    %637 = tpu.reciprocal %636 {approx = true} : vector<1x1xf32> -> vector<1x1xf32>
    %638 = vector.broadcast %637 : vector<1x1xf32> to vector<1x4xf32>
    %639 = arith.mulf %634, %638 : vector<1x4xf32>
    %cst_245 = arith.constant dense<0.000000e+00> : vector<1x8xf32>
    %640 = tpu.matmul %639, %626, %cst_245 {dimension_numbers = #tpu.dot_dimension_numbers<[1], [0], [0], [1], [0, 0, 1, 1], [], []>} : vector<1x4xf32>, vector<4x8xf32>, vector<1x8xf32> -> vector<1x8xf32>
    %641 = vector.extract_strided_slice %520 {offsets = [1, 24], sizes = [1, 8], strides = [1, 1]} : vector<2x32xf32> to vector<1x8xf32>
    %642 = vector.extract_strided_slice %518 {offsets = [4, 24], sizes = [4, 8], strides = [1, 1]} : vector<8x32xf32> to vector<4x8xf32>
    %643 = vector.extract_strided_slice %519 {offsets = [4, 24], sizes = [4, 8], strides = [1, 1]} : vector<8x32xf32> to vector<4x8xf32>
    %cst_246 = arith.constant dense<0.000000e+00> : vector<1x4xf32>
    %644 = tpu.matmul %641, %642, %cst_246 {dimension_numbers = #tpu.dot_dimension_numbers<[1], [1], [0], [0], [0, 0, 1, 0], [], []>} : vector<1x8xf32>, vector<4x8xf32>, vector<1x4xf32> -> vector<1x4xf32>
    %cst_247 = arith.constant 0.353553385 : f32
    %645 = vector.broadcast %cst_247 : f32 to vector<1x4xf32>
    %646 = arith.mulf %644, %645 : vector<1x4xf32>
    %cst_248 = arith.constant dense<0xFF800000> : vector<1xf32>
    %647 = vector.multi_reduction <maximumf>, %646, %cst_248 [1] : vector<1x4xf32> to vector<1xf32>
    %648 = vector.shape_cast %647 : vector<1xf32> to vector<1x1xf32>
    %649 = vector.broadcast %648 : vector<1x1xf32> to vector<1x4xf32>
    %650 = arith.subf %646, %649 : vector<1x4xf32>
    %651 = math.exp %650 : vector<1x4xf32>
    %cst_249 = arith.constant dense<0.000000e+00> : vector<1xf32>
    %652 = vector.multi_reduction <add>, %651, %cst_249 [1] : vector<1x4xf32> to vector<1xf32>
    %653 = vector.shape_cast %652 : vector<1xf32> to vector<1x1xf32>
    %654 = tpu.reciprocal %653 {approx = true} : vector<1x1xf32> -> vector<1x1xf32>
    %655 = vector.broadcast %654 : vector<1x1xf32> to vector<1x4xf32>
    %656 = arith.mulf %651, %655 : vector<1x4xf32>
    %cst_250 = arith.constant dense<0.000000e+00> : vector<1x8xf32>
    %657 = tpu.matmul %656, %643, %cst_250 {dimension_numbers = #tpu.dot_dimension_numbers<[1], [0], [0], [1], [0, 0, 1, 1], [], []>} : vector<1x4xf32>, vector<4x8xf32>, vector<1x8xf32> -> vector<1x8xf32>
    %658 = tpu.concatenate %606, %623, %640, %657 in 1 : vector<1x8xf32>, vector<1x8xf32>, vector<1x8xf32>, vector<1x8xf32> -> vector<1x32xf32>
    %659 = tpu.concatenate %589, %658 in 0 : vector<1x32xf32>, vector<1x32xf32> -> vector<2x32xf32>
    %c0_251 = arith.constant 0 : index
    %c0_252 = arith.constant 0 : index
    %660 = vector.load %arg22[%c0_251, %c0_252] : memref<32x32xf32, #tpu.memory_space<vmem>>, vector<32x32xf32>
    %cst_253 = arith.constant dense<0.000000e+00> : vector<2x32xf32>
    %661 = tpu.matmul %659, %660, %cst_253 {dimension_numbers = #tpu.dot_dimension_numbers<[1], [0], [0], [1], [0, 0, 1, 1], [], []>} : vector<2x32xf32>, vector<32x32xf32>, vector<2x32xf32> -> vector<2x32xf32>
    %c0_254 = arith.constant 0 : index
    %c0_255 = arith.constant 0 : index
    %662 = vector.load %arg23[%c0_254, %c0_255] : memref<1x32xf32, #tpu.memory_space<vmem>>, vector<1x32xf32>
    %663 = vector.broadcast %662 : vector<1x32xf32> to vector<2x32xf32>
    %664 = arith.addf %661, %663 : vector<2x32xf32>
    %c0_256 = arith.constant 0 : index
    %c0_257 = arith.constant 0 : index
    %665 = vector.load %arg24[%c0_256, %c0_257] : memref<1x32xf32, #tpu.memory_space<vmem>>, vector<1x32xf32>
    %c0_258 = arith.constant 0 : index
    %c0_259 = arith.constant 0 : index
    %666 = vector.load %arg25[%c0_258, %c0_259] : memref<1x32xf32, #tpu.memory_space<vmem>>, vector<1x32xf32>
    %cst_260 = arith.constant dense<0.000000e+00> : vector<2xf32>
    %667 = vector.multi_reduction <add>, %664, %cst_260 [1] : vector<2x32xf32> to vector<2xf32>
    %668 = vector.shape_cast %667 : vector<2xf32> to vector<2x1xf32>
    %cst_261 = arith.constant 3.200000e+01 : f32
    %669 = vector.broadcast %cst_261 : f32 to vector<2x1xf32>
    %670 = arith.divf %668, %669 : vector<2x1xf32>
    %671 = vector.broadcast %670 : vector<2x1xf32> to vector<2x32xf32>
    %672 = arith.subf %664, %671 : vector<2x32xf32>
    %673 = arith.mulf %672, %672 : vector<2x32xf32>
    %cst_262 = arith.constant dense<0.000000e+00> : vector<2xf32>
    %674 = vector.multi_reduction <add>, %673, %cst_262 [1] : vector<2x32xf32> to vector<2xf32>
    %675 = vector.shape_cast %674 : vector<2xf32> to vector<2x1xf32>
    %cst_263 = arith.constant 3.200000e+01 : f32
    %676 = vector.broadcast %cst_263 : f32 to vector<2x1xf32>
    %677 = arith.divf %675, %676 : vector<2x1xf32>
    %678 = vector.broadcast %670 : vector<2x1xf32> to vector<2x32xf32>
    %679 = arith.subf %664, %678 : vector<2x32xf32>
    %cst_264 = arith.constant 9.99999997E-7 : f32
    %680 = vector.broadcast %cst_264 : f32 to vector<2x1xf32>
    %681 = arith.addf %677, %680 : vector<2x1xf32>
    %682 = math.rsqrt %681 : vector<2x1xf32>
    %683 = vector.broadcast %682 : vector<2x1xf32> to vector<2x32xf32>
    %684 = arith.mulf %679, %683 : vector<2x32xf32>
    %685 = vector.broadcast %665 : vector<1x32xf32> to vector<2x32xf32>
    %686 = arith.mulf %684, %685 : vector<2x32xf32>
    %687 = vector.broadcast %666 : vector<1x32xf32> to vector<2x32xf32>
    %688 = arith.addf %686, %687 : vector<2x32xf32>
    %c0_265 = arith.constant 0 : index
    %c0_266 = arith.constant 0 : index
    %689 = vector.load %arg26[%c0_265, %c0_266] : memref<32x64xf32, #tpu.memory_space<vmem>>, vector<32x64xf32>
    %cst_267 = arith.constant dense<0.000000e+00> : vector<2x64xf32>
    %690 = tpu.matmul %688, %689, %cst_267 {dimension_numbers = #tpu.dot_dimension_numbers<[1], [0], [0], [1], [0, 0, 1, 1], [], []>} : vector<2x32xf32>, vector<32x64xf32>, vector<2x64xf32> -> vector<2x64xf32>
    %c0_268 = arith.constant 0 : index
    %c0_269 = arith.constant 0 : index
    %691 = vector.load %arg27[%c0_268, %c0_269] : memref<1x64xf32, #tpu.memory_space<vmem>>, vector<1x64xf32>
    %692 = vector.broadcast %691 : vector<1x64xf32> to vector<2x64xf32>
    %693 = arith.addf %690, %692 : vector<2x64xf32>
    %cst_270 = arith.constant 5.000000e-01 : f32
    %694 = vector.broadcast %cst_270 : f32 to vector<2x64xf32>
    %695 = arith.mulf %694, %693 : vector<2x64xf32>
    %cst_271 = arith.constant 4.471500e-02 : f32
    %696 = vector.broadcast %cst_271 : f32 to vector<2x64xf32>
    %697 = arith.mulf %696, %693 : vector<2x64xf32>
    %698 = arith.mulf %697, %693 : vector<2x64xf32>
    %699 = arith.mulf %698, %693 : vector<2x64xf32>
    %700 = arith.addf %693, %699 : vector<2x64xf32>
    %cst_272 = arith.constant 0.797884583 : f32
    %701 = vector.broadcast %cst_272 : f32 to vector<2x64xf32>
    %702 = arith.mulf %701, %700 : vector<2x64xf32>
    %703 = math.tanh %702 : vector<2x64xf32>
    %cst_273 = arith.constant 1.000000e+00 : f32
    %704 = vector.broadcast %cst_273 : f32 to vector<2x64xf32>
    %705 = arith.addf %704, %703 : vector<2x64xf32>
    %706 = arith.mulf %695, %705 : vector<2x64xf32>
    %c0_274 = arith.constant 0 : index
    %c0_275 = arith.constant 0 : index
    %707 = vector.load %arg28[%c0_274, %c0_275] : memref<64x32xf32, #tpu.memory_space<vmem>>, vector<64x32xf32>
    %cst_276 = arith.constant dense<0.000000e+00> : vector<2x32xf32>
    %708 = tpu.matmul %706, %707, %cst_276 {dimension_numbers = #tpu.dot_dimension_numbers<[1], [0], [0], [1], [0, 0, 1, 1], [], []>} : vector<2x64xf32>, vector<64x32xf32>, vector<2x32xf32> -> vector<2x32xf32>
    %c0_277 = arith.constant 0 : index
    %c0_278 = arith.constant 0 : index
    %709 = vector.load %arg29[%c0_277, %c0_278] : memref<1x32xf32, #tpu.memory_space<vmem>>, vector<1x32xf32>
    %710 = vector.broadcast %709 : vector<1x32xf32> to vector<2x32xf32>
    %711 = arith.addf %708, %710 : vector<2x32xf32>
    %712 = arith.addf %664, %711 : vector<2x32xf32>
    %c0_279 = arith.constant 0 : index
    %c0_280 = arith.constant 0 : index
    %713 = vector.load %arg30[%c0_279, %c0_280] : memref<2x32xf32, #tpu.memory_space<vmem>>, vector<2x32xf32>
    tpu.vector_store %arg30[%c0_279, %c0_280], %712 {strides = array<i32>} : memref<2x32xf32, #tpu.memory_space<vmem>>, vector<2x32xf32>,
    return
  }
  func.func @transform_0(%arg0: i32) -> (i32, i32) {
    %c0_i32 = arith.constant 0 : i32
    %c0_i32_0 = arith.constant 0 : i32
    %c0_i32_1 = arith.constant 0 : i32
    return %c0_i32, %c0_i32_0 : i32, i32
  }
  func.func @transform_1(%arg0: i32) -> (i32, i32) {
    %c0_i32 = arith.constant 0 : i32
    %c0_i32_0 = arith.constant 0 : i32
    %c0_i32_1 = arith.constant 0 : i32
    return %c0_i32, %c0_i32_0 : i32, i32
  }
  func.func @transform_2(%arg0: i32) -> (i32, i32) {
    %c0_i32 = arith.constant 0 : i32
    %c0_i32_0 = arith.constant 0 : i32
    %c0_i32_1 = arith.constant 0 : i32
    return %c0_i32, %c0_i32_0 : i32, i32
  }
  func.func @transform_3(%arg0: i32) -> (i32, i32) {
    %c0_i32 = arith.constant 0 : i32
    %c0_i32_0 = arith.constant 0 : i32
    %c0_i32_1 = arith.constant 0 : i32
    return %c0_i32, %c0_i32_0 : i32, i32
  }
  func.func @transform_4(%arg0: i32) -> (i32, i32, i32) {
    %c0_i32 = arith.constant 0 : i32
    %c0_i32_0 = arith.constant 0 : i32
    %c0_i32_1 = arith.constant 0 : i32
    %c0_i32_2 = arith.constant 0 : i32
    return %c0_i32, %c0_i32_0, %c0_i32_1 : i32, i32, i32
  }
  func.func @transform_5(%arg0: i32) -> (i32, i32, i32) {
    %c0_i32 = arith.constant 0 : i32
    %c0_i32_0 = arith.constant 0 : i32
    %c0_i32_1 = arith.constant 0 : i32
    %c0_i32_2 = arith.constant 0 : i32
    return %c0_i32, %c0_i32_0, %c0_i32_1 : i32, i32, i32
  }
  func.func @transform_6(%arg0: i32) -> (i32, i32, i32) {
    %c0_i32 = arith.constant 0 : i32
    %c0_i32_0 = arith.constant 0 : i32
    %c0_i32_1 = arith.constant 0 : i32
    %c0_i32_2 = arith.constant 0 : i32
    return %c0_i32, %c0_i32_0, %c0_i32_1 : i32, i32, i32
  }
  func.func @transform_7(%arg0: i32) -> (i32, i32, i32) {
    %c0_i32 = arith.constant 0 : i32
    %c0_i32_0 = arith.constant 0 : i32
    %c0_i32_1 = arith.constant 0 : i32
    %c0_i32_2 = arith.constant 0 : i32
    return %c0_i32, %c0_i32_0, %c0_i32_1 : i32, i32, i32
  }
  func.func @transform_8(%arg0: i32) -> (i32, i32, i32) {
    %c0_i32 = arith.constant 0 : i32
    %c0_i32_0 = arith.constant 0 : i32
    %c0_i32_1 = arith.constant 0 : i32
    %c0_i32_2 = arith.constant 0 : i32
    return %c0_i32, %c0_i32_0, %c0_i32_1 : i32, i32, i32
  }
  func.func @transform_9(%arg0: i32) -> (i32, i32, i32) {
    %c0_i32 = arith.constant 0 : i32
    %c0_i32_0 = arith.constant 0 : i32
    %c0_i32_1 = arith.constant 0 : i32
    %c0_i32_2 = arith.constant 0 : i32
    return %c0_i32, %c0_i32_0, %c0_i32_1 : i32, i32, i32
  }
  func.func @transform_10(%arg0: i32) -> (i32, i32, i32) {
    %c0_i32 = arith.constant 0 : i32
    %c0_i32_0 = arith.constant 0 : i32
    %c0_i32_1 = arith.constant 0 : i32
    %c0_i32_2 = arith.constant 0 : i32
    return %c0_i32, %c0_i32_0, %c0_i32_1 : i32, i32, i32
  }
  func.func @transform_11(%arg0: i32) -> (i32, i32, i32) {
    %c0_i32 = arith.constant 0 : i32
    %c0_i32_0 = arith.constant 0 : i32
    %c0_i32_1 = arith.constant 0 : i32
    %c0_i32_2 = arith.constant 0 : i32
    return %c0_i32, %c0_i32_0, %c0_i32_1 : i32, i32, i32
  }
  func.func @transform_12(%arg0: i32) -> (i32, i32, i32) {
    %c0_i32 = arith.constant 0 : i32
    %c0_i32_0 = arith.constant 0 : i32
    %c0_i32_1 = arith.constant 0 : i32
    %c0_i32_2 = arith.constant 0 : i32
    return %c0_i32, %c0_i32_0, %c0_i32_1 : i32, i32, i32
  }
  func.func @transform_13(%arg0: i32) -> (i32, i32, i32) {
    %c0_i32 = arith.constant 0 : i32
    %c0_i32_0 = arith.constant 0 : i32
    %c0_i32_1 = arith.constant 0 : i32
    %c0_i32_2 = arith.constant 0 : i32
    return %c0_i32, %c0_i32_0, %c0_i32_1 : i32, i32, i32
  }
  func.func @transform_14(%arg0: i32) -> (i32, i32, i32) {
    %c0_i32 = arith.constant 0 : i32
    %c0_i32_0 = arith.constant 0 : i32
    %c0_i32_1 = arith.constant 0 : i32
    %c0_i32_2 = arith.constant 0 : i32
    return %c0_i32, %c0_i32_0, %c0_i32_1 : i32, i32, i32
  }
  func.func @transform_15(%arg0: i32) -> (i32, i32, i32) {
    %c0_i32 = arith.constant 0 : i32
    %c0_i32_0 = arith.constant 0 : i32
    %c0_i32_1 = arith.constant 0 : i32
    %c0_i32_2 = arith.constant 0 : i32
    return %c0_i32, %c0_i32_0, %c0_i32_1 : i32, i32, i32
  }
  func.func @transform_16(%arg0: i32) -> (i32, i32) {
    %c0_i32 = arith.constant 0 : i32
    %c0_i32_0 = arith.constant 0 : i32
    %c0_i32_1 = arith.constant 0 : i32
    return %c0_i32, %c0_i32_0 : i32, i32
  }
  func.func @transform_17(%arg0: i32) -> (i32, i32) {
    %c0_i32 = arith.constant 0 : i32
    %c0_i32_0 = arith.constant 0 : i32
    %c0_i32_1 = arith.constant 0 : i32
    return %c0_i32, %c0_i32_0 : i32, i32
  }
  func.func @transform_18(%arg0: i32) -> (i32, i32) {
    %c0_i32 = arith.constant 0 : i32
    %c0_i32_0 = arith.constant 0 : i32
    %c0_i32_1 = arith.constant 0 : i32
    return %c0_i32, %c0_i32_0 : i32, i32
  }
  func.func @transform_19(%arg0: i32) -> (i32, i32) {
    %c0_i32 = arith.constant 0 : i32
    %c0_i32_0 = arith.constant 0 : i32
    %c0_i32_1 = arith.constant 0 : i32
    return %c0_i32, %c0_i32_0 : i32, i32
  }
  func.func @transform_20(%arg0: i32) -> (i32, i32) {
    %c0_i32 = arith.constant 0 : i32
    %c0_i32_0 = arith.constant 0 : i32
    %c0_i32_1 = arith.constant 0 : i32
    return %c0_i32, %c0_i32_0 : i32, i32
  }
  func.func @transform_21(%arg0: i32) -> (i32, i32) {
    %c0_i32 = arith.constant 0 : i32
    %c0_i32_0 = arith.constant 0 : i32
    %c0_i32_1 = arith.constant 0 : i32
    return %c0_i32, %c0_i32_0 : i32, i32
  }
  func.func @transform_22(%arg0: i32) -> (i32, i32) {
    %c0_i32 = arith.constant 0 : i32
    %c0_i32_0 = arith.constant 0 : i32
    %c0_i32_1 = arith.constant 0 : i32
    return %c0_i32, %c0_i32_0 : i32, i32
  }
  func.func @transform_23(%arg0: i32) -> (i32, i32) {
    %c0_i32 = arith.constant 0 : i32
    %c0_i32_0 = arith.constant 0 : i32
    %c0_i32_1 = arith.constant 0 : i32
    return %c0_i32, %c0_i32_0 : i32, i32
  }
  func.func @transform_24(%arg0: i32) -> (i32, i32) {
    %c0_i32 = arith.constant 0 : i32
    %c0_i32_0 = arith.constant 0 : i32
    %c0_i32_1 = arith.constant 0 : i32
    return %c0_i32, %c0_i32_0 : i32, i32
  }
  func.func @transform_25(%arg0: i32) -> (i32, i32) {
    %c0_i32 = arith.constant 0 : i32
    %c0_i32_0 = arith.constant 0 : i32
    %c0_i32_1 = arith.constant 0 : i32
    return %c0_i32, %c0_i32_0 : i32, i32
  }
  func.func @transform_26(%arg0: i32) -> (i32, i32) {
    %c0_i32 = arith.constant 0 : i32
    %c0_i32_0 = arith.constant 0 : i32
    %c0_i32_1 = arith.constant 0 : i32
    return %c0_i32, %c0_i32_0 : i32, i32
  }
  func.func @transform_27(%arg0: i32) -> (i32, i32) {
    %c0_i32 = arith.constant 0 : i32
    %c0_i32_0 = arith.constant 0 : i32
    %c0_i32_1 = arith.constant 0 : i32
    return %c0_i32, %c0_i32_0 : i32, i32
  }
  func.func @transform_28(%arg0: i32) -> (i32, i32) {
    %c0_i32 = arith.constant 0 : i32
    %c0_i32_0 = arith.constant 0 : i32
    %c0_i32_1 = arith.constant 0 : i32
    return %c0_i32, %c0_i32_0 : i32, i32
  }
  func.func @transform_29(%arg0: i32) -> (i32, i32) {
    %c0_i32 = arith.constant 0 : i32
    %c0_i32_0 = arith.constant 0 : i32
    %c0_i32_1 = arith.constant 0 : i32
    return %c0_i32, %c0_i32_0 : i32, i32
  }
}

</mosaic_0001>

<bundles_post_ra>
// kernel: siglip_encoder_forward.1
= control target key start
LH: loop header
LB: loop body
LE: loop exit
PB: predicated region body
PF: predicated region fallthrough
CT: control target
= control target key end

     0   :  { %s6792_s6 = smov 1   ;;  %s6793_s10 = smov 2   ;;  %s7751_s0 = inlined_call_operand.smem [shape: u32[30], index: -1, kind: input, shape index: {}] }
   0x1   :  { %s6847_s5 = sld [smem:[%s7751_s0]]   ;;  %s6794_s14 = smov 3  }
   0x2   :  { %s6852_s9 = sld [smem:[%s7751_s0 + %s6792_s6]]   ;;  %s6795_s18 = smov 4  }
   0x3   :  { %s6857_s13 = sld [smem:[%s7751_s0 + %s6793_s10]]   ;;  %s6796_s22 = smov 5  }
   0x4   :  { %s6862_s17 = sld [smem:[%s7751_s0 + %s6794_s14]]   ;;  %s6797_s26 = smov 6  }
   0x5   :  { %s6867_s21 = sld [smem:[%s7751_s0 + %s6795_s18]]   ;;  %s6798_s30 = smov 7  }
   0x6   :  { %s6872_s25 = sld [smem:[%s7751_s0 + %s6796_s22]]   ;;  %s6799_s4 = smov 8  }
   0x7   :  { %s6877_s29 = sld [smem:[%s7751_s0 + %s6797_s26]]   ;;  %s6800_s10 = smov 9  }
   0x8   :  { %s6882_s3 = sld [smem:[%s7751_s0 + %s6798_s30]]   ;;  %s6801_s15 = smov 10  }
   0x9   :  { %s6887_s8 = sld [smem:[%s7751_s0 + %s6799_s4]]   ;;  %s6802_s20 = smov 11  }
   0xa   :  { %s6892_s14 = sld [smem:[%s7751_s0 + %s6800_s10]]   ;;  %s6803_s26 = smov 12  }
   0xb   :  { %s6897_s19 = sld [smem:[%s7751_s0 + %s6801_s15]]   ;;  %s6804_s1 = smov 13  }
   0xc   :  { %s6902_s24 = sld [smem:[%s7751_s0 + %s6802_s20]]   ;;  %s6805_s7 = smov 14  }
   0xd   :  { %s6907_s30 = sld [smem:[%s7751_s0 + %s6803_s26]]   ;;  %s6806_s15 = smov 15  }
   0xe   :  { %s6912_s6 = sld [smem:[%s7751_s0 + %s6804_s1]]   ;;  %s6807_s22 = smov 16  }
   0xf   :  { %s6917_s12 = sld [smem:[%s7751_s0 + %s6805_s7]]   ;;  %s6808_s28 = smov 17  }
  0x10   :  { %s6922_s20 = sld [smem:[%s7751_s0 + %s6806_s15]]   ;;  %s6809_s7 = smov 18  }
  0x11   :  { %s6927_s27 = sld [smem:[%s7751_s0 + %s6807_s22]]   ;;  %s6810_s15 = smov 19  }
  0x12   :  { %s6932_s4 = sld [smem:[%s7751_s0 + %s6808_s28]]   ;;  %s6811_s22 = smov 20  }
  0x13   :  { %s6812_s28 = smov 21  }
  0x14   :  { %7757 = sst [smem:[#allocation5_spill]] %s6912_s6 }
  0x15   :  { %s6937_s6 = sld [smem:[%s7751_s0 + %s6809_s7]]   ;;  %s6813_s7 = smov 22  }
  0x16   :  { %7758 = sst [smem:[#allocation6_spill]] %s6922_s20 }
  0x17   :  { %7759 = sst [smem:[#allocation7_spill]] %s6927_s27 }
  0x18   :  { %7760 = sst [smem:[#allocation8_spill]] %s6932_s4 }
  0x19   :  { %s6942_s20 = sld [smem:[%s7751_s0 + %s6810_s15]]   ;;  %s6814_s15 = smov 23  }
  0x1a   :  { %s6947_s27 = sld [smem:[%s7751_s0 + %s6811_s22]]   ;;  %s6815_s22 = smov 24  }
  0x1b   :  { %7761 = sst [smem:[#allocation9_spill]] %s6937_s6 }
  0x1c   :  { %s6952_s4 = sld [smem:[%s7751_s0 + %s6812_s28]]   ;;  %s6816_s28 = smov 25  }
  0x1d   :  { %s6957_s6 = sld [smem:[%s7751_s0 + %s6813_s7]]   ;;  %s6817_s7 = smov 26  }
  0x1f   :  { %7762 = sst [smem:[#allocation10_spill]] %s6942_s20 }
  0x20   :  { %7763 = sst [smem:[#allocation11_spill]] %s6947_s27 }
  0x21   :  { %s6962_s20 = sld [smem:[%s7751_s0 + %s6814_s15]]   ;;  %s6818_s15 = smov 27  }
  0x22   :  { %7764 = sst [smem:[#allocation12_spill]] %s6952_s4 }
  0x23   :  { %7765 = sst [smem:[#allocation13_spill]] %s6957_s6 }
  0x24   :  { %s6967_s27 = sld [smem:[%s7751_s0 + %s6815_s22]]   ;;  %s6819_s22 = smov 28  }
  0x25   :  { %s6972_s4 = sld [smem:[%s7751_s0 + %s6816_s28]]   ;;  %s6820_s28 = smov 29  }
  0x26   :  { %s6977_s6 = sld [smem:[%s7751_s0 + %s6817_s7]]  }
  0x27   :  { %7766 = sst [smem:[#allocation14_spill]] %s6962_s20 }
  0x28   :  { %s6982_s20 = sld [smem:[%s7751_s0 + %s6818_s15]]  }
  0x2a   :  { %7767 = sst [smem:[#allocation15_spill]] %s6967_s27 }
  0x2b   :  { %7768 = sst [smem:[#allocation16_spill]] %s6972_s4 }
  0x2c   :  { %s6987_s27 = sld [smem:[%s7751_s0 + %s6819_s22]]  }
  0x2d   :  { %s6992_s4 = sld [smem:[%s7751_s0 + %s6820_s28]]  }
  0x2e   :  { %v125_v0 = vld [vmem:[%s6852_s9] sm:$0xff]  ;;  %v126_v1 = vld [vmem:[%s6852_s9 + $0x8] sm:$0xff]  ;;  %v127_v2 = vld [vmem:[%s6852_s9 + $0x10] sm:$0xff]  ;;  %v6821_v3 = vmov 0.0|0.0   ;;  %vm156_vm0 = vcmask 523264  }
  0x2f   :  { %6465 = vmatprep.subr.bf16.mxu0 %v6821_v3  ;;  %v6466_v4 = vpack.c.bf16 %v126_v1, %v125_v0  ;;  %v128_v5 = vld [vmem:[%s6852_s9 + $0x18] sm:$0xff]  ;;  %6501 = vmatprep.subr.bf16.mxu1 %v6821_v3  ;;  %v129_v7 = vld [vmem:[%s6852_s9 + $0x20] sm:$0xff]  ;;  %v130_v8 = vld [vmem:[%s6852_s9 + $0x28] sm:$0xff] }
  0x30   :  { %v6469_v6 = vpack.c.bf16 %v128_v5, %v127_v2  ;;  %v6472_v9 = vpack.c.bf16 %v130_v8, %v129_v7  ;;  %v131_v10 = vld [vmem:[%s6852_s9 + $0x30] sm:$0xff]  ;;  %v132_v11 = vld [vmem:[%s6852_s9 + $0x38] sm:$0xff]  ;;  %v124_v12 = vld [vmem:[%s6847_s5 + $0x8] sm:$0xff] }
  0x31   :  { %6467 = vmatpush1.bf16.msra.mxu0 %v6466_v4  ;;  %5724 = vmatprep.mubr.msk.f32.mxu0 %vm156_vm0, %v124_v12 }
  0x32   :  { %6468 = vmatprep.subr.bf16.mxu0 %v6821_v3 }
  0x35   :  { %6470 = vmatpush1.bf16.msra.mxu0 %v6469_v6 }
  0x36   :  { %6471 = vmatprep.subr.bf16.mxu0 %v6821_v3 }
  0x37   :  { %64 = vsyncpa [#allocation3], 0  ;;  %v6475_v13 = vpack.c.bf16 %v132_v11, %v131_v10  ;;  %v133_v14 = vld [vmem:[%s6852_s9 + $0x40] sm:$0xff]  ;;  %v134_v15 = vld [vmem:[%s6852_s9 + $0x48] sm:$0xff]  ;;  %vm234_vm1 = vcmask 261120   ;;  %vm6822_vm2 = vmmov 0  }
  0x38   :  { %v6478_v16 = vpack.c.bf16 %v134_v15, %v133_v14  ;;  %v135_v17 = vld [vmem:[%s6852_s9 + $0x50] sm:$0xff]  ;;  %v136_v18 = vld [vmem:[%s6852_s9 + $0x58] sm:$0xff]  ;;  %v137_v20 = vld [vmem:[%s6852_s9 + $0x60] sm:$0xff]  ;;  %v6823_v56 = vmov 0.0   ;;  %s6824_s0 = smov 64   ;;  %vm350_vm3 = vcmask 64512  }
  0x39   :  { %6473 = vmatpush1.bf16.msra.mxu0 %v6472_v9  ;;  %v6481_v19 = vpack.c.bf16 %v136_v18, %v135_v17  ;;  %v138_v21 = vld [vmem:[%s6852_s9 + $0x68] sm:$0xff]  ;;  %v139_v23 = vld [vmem:[%s6852_s9 + $0x70] sm:$0xff]  ;;  %v140_v24 = vld [vmem:[%s6852_s9 + $0x78] sm:$0xff]  ;;  %6066 = vmatprep.mubr.msk.f32.mxu1 %vm6822_vm2, %v6823_v56  ;;  %vm444_vm4 = vcmask 1043456   ;;  %vm426_vm5 = vcmask 27648   ;;  %vm440_vm6 = vcmask 31744  }
  0x3a   :  { %6474 = vmatprep.subr.bf16.mxu0 %v6821_v3  ;;  %v6484_v22 = vpack.c.bf16 %v138_v21, %v137_v20  ;;  %v6487_v25 = vpack.c.bf16 %v140_v24, %v139_v23  ;;  %v141_v26 = vld [vmem:[%s6852_s9 + $0x80] sm:$0xff]  ;;  %v142_v27 = vld [vmem:[%s6852_s9 + $0x88] sm:$0xff]  ;;  %v143_v29 = vld [vmem:[%s6852_s9 + $0x90] sm:$0xff]  ;;  %s6829_s7 = smov 80   ;;  %s6830_s10 = smov 112   ;;  %vm1031_vm7 = vcmask 130048  }
  0x3b   :  { %v6490_v28 = vpack.c.bf16 %v142_v27, %v141_v26  ;;  %v144_v30 = vld [vmem:[%s6852_s9 + $0x98] sm:$0xff]  ;;  %v145_v32 = vld [vmem:[%s6852_s9 + $0xa0] sm:$0xff]  ;;  %v146_v33 = vld [vmem:[%s6852_s9 + $0xa8] sm:$0xff]  ;;  %s6831_s11 = smov 48   ;;  %s6832_s15 = smov 72   ;;  %vm1033_vm8 = vcmask 195584  }
  0x3c   :  { %v6493_v31 = vpack.c.bf16 %v144_v30, %v143_v29  ;;  %v6496_v34 = vpack.c.bf16 %v146_v33, %v145_v32  ;;  %v147_v35 = vld [vmem:[%s6852_s9 + $0xb0] sm:$0xff]  ;;  %v148_v36 = vld [vmem:[%s6852_s9 + $0xb8] sm:$0xff]  ;;  %v123_v38 = vld [vmem:[%s6847_s5] sm:$0xff]  ;;  %s6825_s5 = smov 96   ;;  %s6826_s9 = smov 88   ;;  %vm4014_vm9 = vcmask 1040384  }
  0x3d   :  { %6476 = vmatpush1.bf16.msra.mxu0 %v6475_v13  ;;  %v6499_v37 = vpack.c.bf16 %v148_v36, %v147_v35  ;;  %v5723_v39 = vld [vmem:[%s6857_s13] ss:$0 sm:$0xff]  ;;  %v264_v52 = vld [vmem:[%s6877_s29 + $0x8] sm:$0xff]  ;;  %v265_v53 = vld [vmem:[%s6877_s29 + $0x10] sm:$0xff]  ;;  %s6827_s13 = smov 120   ;;  %s6833_s16 = smov 104  }
  0x3e   :  { %6477 = vmatprep.subr.bf16.mxu0 %v6821_v3  ;;  %v230_v41 = vld [vmem:[%s6862_s17] sm:$0xff]  ;;  %v266_v55 = vld [vmem:[%s6877_s29 + $0x18] sm:$0xff]  ;;  %s6828_s17 = smov 56   ;;  %s6834_s18 = smov 40   ;;  %vm4093_vm10 = vcmask 24576   ;;  %vm5469_vm11 = vcmask 254976  }
  0x3f   :  { %v263_v51 = vld [vmem:[%s6877_s29] sm:$0xff]  ;;  %v6505_v57 = vpack.c.bf16 %v266_v55, %v265_v53  ;;  %s6835_s22 = smov 8   ;;  %s6836_s23 = smov 16  }
  0x40   :  { %v6502_v54 = vpack.c.bf16 %v264_v52, %v263_v51  ;;  %v5725_v62 = vld [vmem:[%s6867_s21] ss:$0 sm:$0xff]  ;;  %s6837_s26 = smov 24   ;;  %s7769_s28 = sld [smem:[#allocation5_spill]] }
  0x41   :  { %6479 = vmatpush1.bf16.msra.mxu0 %v6478_v16  ;;  %v5726_v0 = vld [vmem:[%s6872_s25] ss:$0 sm:$0xff]  ;;  %s7770_s1 = sld [smem:[#allocation6_spill]] }
  0x42   :  { %6480 = vmatprep.subr.bf16.mxu0 %v6821_v3  ;;  %6503 = vmatpush3.bf16.msra.mxu1 %v6502_v54  ;;  %v5727_v4 = vld [vmem:[%s6882_s3] ss:$0 sm:$0xff] }
  0x43   :  { %6504 = vmatprep.subr.bf16.mxu1 %v6821_v3 }
  0x45   :  { %6482 = vmatpush1.bf16.msra.mxu0 %v6481_v19 }
  0x46   :  { %6483 = vmatprep.subr.bf16.mxu0 %v6821_v3  ;;  %6506 = vmatpush3.bf16.msra.mxu1 %v6505_v57 }
  0x47   :  { %6069 = vmatprep.subr.mxu1 %v6823_v56 }
  0x49   :  { %6485 = vmatpush1.bf16.msra.mxu0 %v6484_v22 }
  0x4a   :  { %6486 = vmatprep.subr.bf16.mxu0 %v6821_v3 }
  0x4d   :  { %6488 = vmatpush1.bf16.msra.mxu0 %v6487_v25 }
  0x4e   :  { %6489 = vmatprep.subr.bf16.mxu0 %v6821_v3 }
  0x51   :  { %6491 = vmatpush1.bf16.msra.mxu0 %v6490_v28 }
  0x52   :  { %6492 = vmatprep.subr.bf16.mxu0 %v6821_v3 }
  0x55   :  { %6494 = vmatpush1.bf16.msra.mxu0 %v6493_v31 }
  0x56   :  { %6495 = vmatprep.subr.bf16.mxu0 %v6821_v3 }
  0x59   :  { %6497 = vmatpush1.bf16.msra.mxu0 %v6496_v34 }
  0x5a   :  { %6498 = vmatprep.subr.bf16.mxu0 %v6821_v3 }
  0x5d   :  { %6500 = vmatpush1.bf16.msra.mxu0 %v6499_v37 }
  0x5e   :  { %6119 = vmatprep.subr.mxu0 %v6823_v56 }
  0x60   :  { %225 = vmatmul.mubr.f32.vlgmr.msra.gmra.mrb[0].mxu0 %v123_v38 }
  0x61   :  { %6121 = vmatprep.mubr.msk.f32.mxu0 %vm6822_vm2, %v6823_v56 }
 0x133   :  { %v226_v40 = vpop.f32.mrb[0].mxu0 }
 0x134   :  { %v227_v42 = vadd.f32 %v5723_v39, %v226_v40  ;;  %v228_v43 = vpop.f32.mrb[1].mxu0 }
 0x136   :  { %v7036_v44 = vadd.f32 %v230_v41, %v227_v42 }
 0x138   :  { %v235_v45 = vsel %vm234_vm1, %v7036_v44, 0.0 }
 0x139   :  { %236 = vadd.xlane.f32.xlu0 %v235_v45 }
 0x1c6   :  { %v237_v46 = vpop.xlane.xlu0 %236 }
 0x1c7   :  { %v239_v47 = vmul.f32 0.03125, %v237_v46 }
 0x1c9   :  { %v240_v48 = vsub.f32 %v7036_v44, %v239_v47 }
 0x1cb   :  { %v241_v49 = vmul.f32 %v240_v48, %v240_v48 }
 0x1cd   :  { %v242_v50 = vsel %vm234_vm1, %v241_v49, 0.0 }
 0x1ce   :  { %243 = vadd.xlane.f32.xlu0 %v242_v50 }
 0x25b   :  { %v244_v58 = vpop.xlane.xlu0 %243 }
 0x25c   :  { %v245_v59 = vmul.f32 0.03125, %v244_v58 }
 0x25e   :  { %v246_v60 = vadd.f32 1e-06, %v245_v59 }
 0x260   :  { %6654 = vrsqrt.f32 %v246_v60 }
 0x26a   :  { %v6655_v61 = vpop.eup %6654 }
 0x26b   :  { %v248_v63 = vmul.f32 %v6655_v61, %v240_v48 }
 0x26d   :  { %v255_v1 = vmul.f32 %v5725_v62, %v248_v63 }
 0x26f   :  { %v262_v2 = vadd.f32 %v5726_v0, %v255_v1 }
 0x271   :  { %6067 = vmatmul.mubr.msk.f32.vlgmr.msra.gmra.mrb[0].mxu1 %vm234_vm1, %v262_v2 }
 0x272   :  { %6071 = vmatprep.mubr.msk.f32.mxu1 %vm6822_vm2, %v6823_v56 }
 0x344   :  { %v343_v5 = vpop.f32.mrb[0].mxu1 }
 0x345   :  { %v7059_v6 = vadd.f32 %v5727_v4, %v343_v5  ;;  %v6068_v7 = vpop.f32.mrb[1].mxu1 }
 0x347   :  { %438 = vrot.lane.b32.xlu0 %v7059_v6, %s6824_s0  ;;  %348 = vrot.lane.b32.xlu1 %v7059_v6, %s6825_s5  ;;  %v7133_v2 = vrot.slane %v7059_v6, 4 }
 0x34b   :  { %519 = vrot.lane.b32.xlu0 %v7059_v6, %s6826_s9 }
 0x3b9   :  { %v349_v8 = vpop.permute.xlu1 %348  ;;  %v439_v9 = vpop.permute.xlu0 %438 }
 0x3ba   :  { %6070 = vmatpush3.xpose.msk.msra.mxu1 %vm350_vm3, %v349_v8 }
 0x3bb   :  { %6074 = vmatprep.subr.mxu1 %v6823_v56 }
 0x3bd   :  { %6072 = vmatmul.mubr.msk.f32.vlgmr.msra.gmra.mrb[2].mxu1 %vm350_vm3, %v7059_v6  ;;  %v520_v19 = vpop.permute.xlu0 %519 }
 0x3be   :  { %6075 = vmatpush3.msk.msra.mxu1 %vm444_vm4, %v439_v9  ;;  %6076 = vmatprep.mubr.msk.f32.mxu1 %vm6822_vm2, %v6823_v56 }
 0x3bf   :  { %6079 = vmatprep.subr.mxu1 %v6823_v56 }
 0x490   :  { %v421_v10 = vpop.f32.mrb[2].mxu1 }
 0x491   :  { %v425_v11 = vmul.f32 0.35355338, %v421_v10  ;;  %v6073_v12 = vpop.f32.mrb[3].mxu1 }
 0x493   :  { %v427_v13 = vsel %vm426_vm5, %v425_v11, -inf }
 0x494   :  { %428 = vmax.xlane.f32.xlu1 %v427_v13 }
 0x521   :  { %v429_v14 = vpop.xlane.xlu1 %428 }
 0x522   :  { %v430_v15 = vsub.f32 %v425_v11, %v429_v14 }
 0x524   :  { %v431_v16 = vmul.f32 1.442695, %v430_v15 }
 0x526   :  { %6656 = vpow2.f32 %v431_v16 }
 0x530   :  { %v6657_v17 = vpop.eup %6656 }
 0x531   :  { %v433_v18 = vsel %vm426_vm5, %v6657_v17, 0.0 }
 0x532   :  { %434 = vadd.xlane.f32.xlu0 %v433_v18 }
 0x548   :  { %517 = vrot.lane.b32.xlu0 %v7059_v6, %s6827_s13 }
 0x5bf   :  { %v435_v20 = vpop.xlane.xlu0 %434 }
 0x5c0   :  { %6658 = vrcp.f32 %v435_v20 }
 0x5c3   :  { %v518_v23 = vpop.permute.xlu0 %517 }
 0x5ca   :  { %v6659_v21 = vpop.eup %6658 }
 0x5cb   :  { %v437_v22 = vmul.f32 %v6659_v21, %v6657_v17 }
 0x5cd   :  { %6077 = vmatmul.mubr.msk.f32.vlgmr.msra.gmra.mrb[4].mxu1 %vm440_vm6, %v437_v22 }
 0x5ce   :  { %6080 = vmatpush3.xpose.msk.msra.mxu1 %vm350_vm3, %v520_v19  ;;  %6081 = vmatprep.mubr.msk.f32.mxu1 %vm6822_vm2, %v6823_v56 }
 0x5cf   :  { %6084 = vmatprep.subr.mxu1 %v6823_v56 }
 0x5d1   :  { %6082 = vmatmul.mubr.msk.f32.vlgmr.msra.gmra.mrb[6].mxu1 %vm350_vm3, %v518_v23 }
 0x5d2   :  { %6086 = vmatprep.mubr.msk.f32.mxu1 %vm6822_vm2, %v6823_v56 }
 0x6a0   :  { %v7087_v24 = vpop.f32.mrb[4].mxu1 }
 0x6a1   :  { %v6078_v25 = vpop.f32.mrb[5].mxu1 }
 0x6a4   :  { %v591_v26 = vpop.f32.mrb[6].mxu1 }
 0x6a5   :  { %v595_v27 = vmul.f32 0.35355338, %v591_v26  ;;  %v6083_v28 = vpop.f32.mrb[7].mxu1 }
 0x6a7   :  { %v596_v29 = vsel %vm426_vm5, %v595_v27, -inf }
 0x6a8   :  { %597 = vmax.xlane.f32.xlu1 %v596_v29 }
 0x6b9   :  { %607 = vrot.lane.b32.xlu1 %v7059_v6, %s6828_s17 }
 0x6bd   :  { %686 = vrot.lane.b32.xlu1 %v7059_v6, %s6829_s7 }
 0x6c1   :  { %684 = vrot.lane.b32.xlu1 %v7059_v6, %s6830_s10 }
 0x735   :  { %v598_v30 = vpop.xlane.xlu1 %597 }
 0x736   :  { %v599_v31 = vsub.f32 %v595_v27, %v598_v30 }
 0x738   :  { %v600_v32 = vmul.f32 1.442695, %v599_v31 }
 0x739   :  { %v608_v33 = vpop.permute.xlu1 %607 }
 0x73a   :  { %6660 = vpow2.f32 %v600_v32  ;;  %6085 = vmatpush3.msk.msra.mxu1 %vm444_vm4, %v608_v33 }
 0x73b   :  { %6089 = vmatprep.subr.mxu1 %v6823_v56 }
 0x73d   :  { %v687_v38 = vpop.permute.xlu1 %686 }
 0x741   :  { %v685_v40 = vpop.permute.xlu1 %684 }
 0x744   :  { %v6661_v34 = vpop.eup %6660 }
 0x745   :  { %v602_v35 = vsel %vm426_vm5, %v6661_v34, 0.0 }
 0x746   :  { %603 = vadd.xlane.f32.xlu0 %v602_v35 }
 0x75c   :  { %774 = vrot.lane.b32.xlu0 %v7059_v6, %s6831_s11 }
 0x760   :  { %853 = vrot.lane.b32.xlu0 %v7059_v6, %s6832_s15 }
 0x7d3   :  { %v604_v36 = vpop.xlane.xlu0 %603 }
 0x7d4   :  { %6662 = vrcp.f32 %v604_v36 }
 0x7d7   :  { %v775_v41 = vpop.permute.xlu0 %774 }
 0x7db   :  { %v854_v54 = vpop.permute.xlu0 %853 }
 0x7de   :  { %v6663_v37 = vpop.eup %6662 }
 0x7df   :  { %v606_v39 = vmul.f32 %v6663_v37, %v6661_v34 }
 0x7e1   :  { %6087 = vmatmul.mubr.msk.f32.vlgmr.msra.gmra.mrb[8].mxu1 %vm440_vm6, %v606_v39 }
 0x7e2   :  { %6090 = vmatpush3.xpose.msk.msra.mxu1 %vm350_vm3, %v687_v38  ;;  %6091 = vmatprep.mubr.msk.f32.mxu1 %vm6822_vm2, %v6823_v56 }
 0x7e3   :  { %6094 = vmatprep.subr.mxu1 %v6823_v56 }
 0x7e5   :  { %6092 = vmatmul.mubr.msk.f32.vlgmr.msra.gmra.mrb[10].mxu1 %vm350_vm3, %v685_v40 }
 0x7e6   :  { %6095 = vmatpush3.msk.msra.mxu1 %vm444_vm4, %v775_v41  ;;  %6096 = vmatprep.mubr.msk.f32.mxu1 %vm6822_vm2, %v6823_v56 }
 0x7e7   :  { %6099 = vmatprep.subr.mxu1 %v6823_v56 }
 0x8b4   :  { %v7113_v42 = vpop.f32.mrb[8].mxu1 }
 0x8b5   :  { %v6088_v43 = vpop.f32.mrb[9].mxu1 }
 0x8b8   :  { %v758_v45 = vpop.f32.mrb[10].mxu1 }
 0x8b9   :  { %v762_v46 = vmul.f32 0.35355338, %v758_v45  ;;  %v6093_v47 = vpop.f32.mrb[11].mxu1 }
 0x8bb   :  { %v763_v48 = vsel %vm426_vm5, %v762_v46, -inf }
 0x8bc   :  { %764 = vmax.xlane.f32.xlu1 %v763_v48 }
 0x949   :  { %v765_v49 = vpop.xlane.xlu1 %764 }
 0x94a   :  { %v766_v50 = vsub.f32 %v762_v46, %v765_v49 }
 0x94c   :  { %v767_v51 = vmul.f32 1.442695, %v766_v50 }
 0x94e   :  { %6664 = vpow2.f32 %v767_v51 }
 0x958   :  { %v6665_v52 = vpop.eup %6664 }
 0x959   :  { %v769_v53 = vsel %vm426_vm5, %v6665_v52, 0.0 }
 0x95a   :  { %770 = vadd.xlane.f32.xlu0 %v769_v53 }
 0x970   :  { %851 = vrot.lane.b32.xlu0 %v7059_v6, %s6833_s16 }
 0x9e7   :  { %v771_v55 = vpop.xlane.xlu0 %770 }
 0x9e8   :  { %6666 = vrcp.f32 %v771_v55 }
 0x9eb   :  { %v852_v59 = vpop.permute.xlu0 %851 }
 0x9f2   :  { %v6667_v57 = vpop.eup %6666 }
 0x9f3   :  { %v773_v58 = vmul.f32 %v6667_v57, %v6665_v52 }
 0x9f5   :  { %6097 = vmatmul.mubr.msk.f32.vlgmr.msra.gmra.mrb[12].mxu1 %vm440_vm6, %v773_v58 }
 0x9f6   :  { %6100 = vmatpush3.xpose.msk.msra.mxu1 %vm350_vm3, %v854_v54  ;;  %6101 = vmatprep.mubr.msk.f32.mxu1 %vm6822_vm2, %v6823_v56 }
 0x9f7   :  { %6104 = vmatprep.subr.mxu1 %v6823_v56 }
 0x9f9   :  { %6102 = vmatmul.mubr.msk.f32.vlgmr.msra.gmra.mrb[14].mxu1 %vm350_vm3, %v852_v59 }
 0x9fa   :  { %6106 = vmatprep.mubr.msk.f32.mxu1 %vm6822_vm2, %v6823_v56 }
 0xac8   :  { %v7127_v60 = vpop.f32.mrb[12].mxu1 }
 0xac9   :  { %v6098_v61 = vpop.f32.mrb[13].mxu1 }
 0xacc   :  { %v925_v62 = vpop.f32.mrb[14].mxu1 }
 0xacd   :  { %v929_v63 = vmul.f32 0.35355338, %v925_v62  ;;  %v6103_v0 = vpop.f32.mrb[15].mxu1 }
 0xacf   :  { %v930_v1 = vsel %vm426_vm5, %v929_v63, -inf }
 0xad0   :  { %931 = vmax.xlane.f32.xlu1 %v930_v1 }
 0xae1   :  { %941 = vrot.lane.b32.xlu1 %v7059_v6, %s6834_s18 }
 0xae5   :  { %1036 = vrot.lane.b32.xlu1 %v7133_v2, %s6825_s5 }
 0xae9   :  { %1203 = vrot.lane.b32.xlu1 %v7133_v2, %s6826_s9 }
 0xaed   :  { %1201 = vrot.lane.b32.xlu1 %v7133_v2, %s6827_s13 }
 0xaf1   :  { %1368 = vrot.lane.b32.xlu1 %v7133_v2, %s6830_s10 }
 0xaf5   :  { %1537 = vrot.lane.b32.xlu1 %v7133_v2, %s6832_s15 }
 0xaf9   :  { %1535 = vrot.lane.b32.xlu1 %v7133_v2, %s6833_s16 }
 0xb5d   :  { %v932_v4 = vpop.xlane.xlu1 %931 }
 0xb5e   :  { %v933_v5 = vsub.f32 %v929_v63, %v932_v4 }
 0xb60   :  { %v934_v6 = vmul.f32 1.442695, %v933_v5 }
 0xb61   :  { %v942_v7 = vpop.permute.xlu1 %941 }
 0xb62   :  { %6668 = vpow2.f32 %v934_v6  ;;  %6105 = vmatpush3.msk.msra.mxu1 %vm444_vm4, %v942_v7 }
 0xb63   :  { %6109 = vmatprep.subr.mxu1 %v6823_v56 }
 0xb65   :  { %v1037_v8 = vpop.permute.xlu1 %1036 }
 0xb69   :  { %v1204_v9 = vpop.permute.xlu1 %1203 }
 0xb6a   :  { %6120 = vmatpush3.xpose.msk.msra.mxu0 %vm350_vm3, %v1204_v9 }
 0xb6b   :  { %6129 = vmatprep.subr.mxu0 %v6823_v56 }
 0xb6c   :  { %v6669_v10 = vpop.eup %6668 }
 0xb6d   :  { %v1202_v11 = vpop.permute.xlu1 %1201  ;;  %v936_v12 = vsel %vm426_vm5, %v6669_v10, 0.0 }
 0xb6e   :  { %937 = vadd.xlane.f32.xlu0 %v936_v12  ;;  %6122 = vmatmul.mubr.msk.f32.vlgmr.msra.gmra.mrb[2].mxu0 %vm350_vm3, %v1202_v11 }
 0xb6f   :  { %6131 = vmatprep.mubr.msk.f32.mxu0 %vm6822_vm2, %v6823_v56 }
 0xb71   :  { %v1369_v13 = vpop.permute.xlu1 %1368 }
 0xb75   :  { %v1538_v16 = vpop.permute.xlu1 %1537 }
 0xb79   :  { %v1536_v18 = vpop.permute.xlu1 %1535 }
 0xb84   :  { %1370 = vrot.lane.b32.xlu0 %v7133_v2, %s6829_s7 }
 0xbfb   :  { %v938_v14 = vpop.xlane.xlu0 %937 }
 0xbfc   :  { %6670 = vrcp.f32 %v938_v14 }
 0xbff   :  { %v1371_v15 = vpop.permute.xlu0 %1370 }
 0xc00   :  { %6130 = vmatpush3.xpose.msk.msra.mxu0 %vm350_vm3, %v1371_v15  ;;  %v1721_v15 = vld [vmem:[%s6887_s8] sm:$0xff] }
 0xc01   :  { %6139 = vmatprep.subr.mxu0 %v6823_v56 }
 0xc03   :  { %6132 = vmatmul.mubr.msk.f32.vlgmr.msra.gmra.mrb[4].mxu0 %vm350_vm3, %v1369_v13 }
 0xc04   :  { %6140 = vmatpush3.xpose.msk.msra.mxu0 %vm350_vm3, %v1538_v16  ;;  %6141 = vmatprep.mubr.msk.f32.mxu0 %vm6822_vm2, %v6823_v56  ;;  %v1722_v16 = vld [vmem:[%s6887_s8 + $0x8] sm:$0xff] }
 0xc05   :  { %6519 = vmatprep.subr.bf16.mxu0 %v6821_v3 }
 0xc06   :  { %v6671_v17 = vpop.eup %6670 }
 0xc07   :  { %6142 = vmatmul.mubr.msk.f32.vlgmr.msra.gmra.mrb[6].mxu0 %vm350_vm3, %v1536_v18  ;;  %v940_v19 = vmul.f32 %v6671_v17, %v6669_v10  ;;  %v6508_v17 = vpack.c.bf16 %v1722_v16, %v1721_v15  ;;  %v1934_v16 = vld [vmem:[%s6917_s12 + $0x30] sm:$0xff] }
 0xc08   :  { %6187 = vmatprep.mubr.msk.f32.mxu0 %vm6822_vm2, %v6823_v56 }
 0xc09   :  { %6107 = vmatmul.mubr.msk.f32.vlgmr.msra.gmra.mrb[16].mxu1 %vm440_vm6, %v940_v19 }
 0xc0a   :  { %6110 = vmatpush3.xpose.msk.msra.mxu1 %vm350_vm3, %v1037_v8  ;;  %6111 = vmatprep.mubr.msk.f32.mxu1 %vm6822_vm2, %v6823_v56 }
 0xc0b   :  { %6114 = vmatprep.subr.mxu1 %v6823_v56 }
 0xc0d   :  { %6112 = vmatmul.mubr.msk.f32.vlgmr.msra.gmra.mrb[18].mxu1 %vm350_vm3, %v7133_v2 }
 0xc0e   :  { %6116 = vmatprep.mubr.msk.f32.mxu1 %vm6822_vm2, %v6823_v56 }
 0xc41   :  { %v1275_v20 = vpop.f32.mrb[2].mxu0 }
 0xc42   :  { %v1279_v21 = vmul.f32 0.35355338, %v1275_v20  ;;  %v6123_v22 = vpop.f32.mrb[3].mxu0  ;;  %v1723_v20 = vld [vmem:[%s6887_s8 + $0x10] sm:$0xff] }
 0xc44   :  { %v1280_v23 = vsel %vm426_vm5, %v1279_v21, -inf }
 0xc45   :  { %1281 = vmax.xlane.f32.xlu0 %v1280_v23 }
 0xcd2   :  { %v1282_v26 = vpop.xlane.xlu0 %1281 }
 0xcd3   :  { %v1283_v28 = vsub.f32 %v1279_v21, %v1282_v26  ;;  %v1724_v21 = vld [vmem:[%s6887_s8 + $0x18] sm:$0xff] }
 0xcd4   :  { %v6511_v22 = vpack.c.bf16 %v1724_v21, %v1723_v20 }
 0xcd5   :  { %v1284_v33 = vmul.f32 1.442695, %v1283_v28 }
 0xcd6   :  { %v1442_v25 = vpop.f32.mrb[4].mxu0 }
 0xcd7   :  { %v6133_v27 = vpop.f32.mrb[5].mxu0  ;;  %6672 = vpow2.f32 %v1284_v33  ;;  %v1446_v37 = vmul.f32 0.35355338, %v1442_v25 }
 0xcd9   :  { %v1447_v40 = vsel %vm426_vm5, %v1446_v37, -inf }
 0xcda   :  { %v1609_v29 = vpop.f32.mrb[6].mxu0 }
 0xcdb   :  { %v6143_v30 = vpop.f32.mrb[7].mxu0  ;;  %v1613_v39 = vmul.f32 0.35355338, %v1609_v29 }
 0xcdc   :  { %v7177_v31 = vpop.f32.mrb[16].mxu1 }
 0xcdd   :  { %v6108_v32 = vpop.f32.mrb[17].mxu1  ;;  %v1614_v41 = vsel %vm426_vm5, %v1613_v39, -inf }
 0xce0   :  { %v1108_v34 = vpop.f32.mrb[18].mxu1 }
 0xce1   :  { %v1112_v35 = vmul.f32 0.35355338, %v1108_v34  ;;  %v6113_v36 = vpop.f32.mrb[19].mxu1  ;;  %v6673_v43 = vpop.eup %6672 }
 0xce2   :  { %v1286_v45 = vsel %vm426_vm5, %v6673_v43, 0.0 }
 0xce3   :  { %v1113_v38 = vsel %vm426_vm5, %v1112_v35, -inf }
 0xce4   :  { %1114 = vmax.xlane.f32.xlu1 %v1113_v38 }
 0xce8   :  { %1448 = vmax.xlane.f32.xlu1 %v1447_v40 }
 0xcec   :  { %1615 = vmax.xlane.f32.xlu1 %v1614_v41 }
 0xcf0   :  { %1287 = vadd.xlane.f32.xlu1 %v1286_v45  ;;  %v5761_v45 = vld [vmem:[%s6892_s14] ss:$0 sm:$0xff] }
 0xd71   :  { %v1115_v46 = vpop.xlane.xlu1 %1114 }
 0xd72   :  { %v1116_v47 = vsub.f32 %v1112_v35, %v1115_v46 }
 0xd74   :  { %v1117_v50 = vmul.f32 1.442695, %v1116_v47 }
 0xd75   :  { %v1449_v48 = vpop.xlane.xlu1 %1448 }
 0xd76   :  { %v1450_v49 = vsub.f32 %v1446_v37, %v1449_v48 }
 0xd78   :  { %v1451_v51 = vmul.f32 1.442695, %v1450_v49 }
 0xd79   :  { %v1616_v52 = vpop.xlane.xlu1 %1615 }
 0xd7a   :  { %6674 = vpow2.f32 %v1451_v51  ;;  %v1617_v53 = vsub.f32 %v1613_v39, %v1616_v52 }
 0xd7b   :  { %6676 = vpow2.f32 %v1117_v50 }
 0xd7c   :  { %v1618_v54 = vmul.f32 1.442695, %v1617_v53 }
 0xd7d   :  { %v1288_v0 = vpop.xlane.xlu1 %1287 }
 0xd7e   :  { %6678 = vpow2.f32 %v1618_v54 }
 0xd84   :  { %v6675_v55 = vpop.eup %6674 }
 0xd85   :  { %v1453_v57 = vsel %vm426_vm5, %v6675_v55, 0.0  ;;  %v6677_v58 = vpop.eup %6676 }
 0xd86   :  { %1454 = vadd.xlane.f32.xlu0 %v1453_v57  ;;  %v1119_v61 = vsel %vm426_vm5, %v6677_v58, 0.0  ;;  %v1836_v57 = vld [vmem:[%s6907_s30 + $0x8] sm:$0xff] }
 0xd88   :  { %v6679_v59 = vpop.eup %6678 }
 0xd89   :  { %v1620_v62 = vsel %vm426_vm5, %v6679_v59, 0.0 }
 0xd8a   :  { %1120 = vadd.xlane.f32.xlu0 %v1119_v61  ;;  %1621 = vadd.xlane.f32.xlu1 %v1620_v62 }
 0xd9b   :  { %1291 = vrot.lane.b32.xlu1 %v7133_v2, %s6828_s17 }
 0xd9f   :  { %1458 = vrot.lane.b32.xlu1 %v7133_v2, %s6831_s11 }
 0xda0   :  { %1124 = vrot.lane.b32.xlu0 %v7133_v2, %s6824_s0 }
 0xda3   :  { %1019 = vrot.lane.b32.xlu1 %v7113_v42, %s6835_s22 }
 0xda4   :  { %1625 = vrot.lane.b32.xlu0 %v7133_v2, %s6834_s18 }
 0xe13   :  { %v1455_v63 = vpop.xlane.xlu0 %1454 }
 0xe17   :  { %v1121_v1 = vpop.xlane.xlu0 %1120  ;;  %v1622_v5 = vpop.xlane.xlu1 %1621 }
 0xe18   :  { %6680 = vrcp.f32 %v1121_v1 }
 0xe19   :  { %6682 = vrcp.f32 %v1288_v0 }
 0xe1a   :  { %6684 = vrcp.f32 %v1455_v63 }
 0xe1b   :  { %v1125_v4 = vpop.permute.xlu0 %1124  ;;  %6686 = vrcp.f32 %v1622_v5  ;;  %v1292_v7 = vpop.permute.xlu1 %1291 }
 0xe1c   :  { %6115 = vmatpush3.msk.msra.mxu1 %vm444_vm4, %v1125_v4  ;;  %v5763_v4 = vld [vmem:[%s6897_s19] ss:$0 sm:$0xff] }
 0xe1d   :  { %6124 = vmatprep.subr.mxu1 %v6823_v56 }
 0xe1f   :  { %v1459_v10 = vpop.permute.xlu1 %1458  ;;  %v1626_v13 = vpop.permute.xlu0 %1625 }
 0xe22   :  { %v6681_v6 = vpop.eup %6680 }
 0xe23   :  { %v1123_v8 = vmul.f32 %v6681_v6, %v6677_v58  ;;  %v6683_v42 = vpop.eup %6682  ;;  %v1020_v30 = vpop.permute.xlu1 %1019  ;;  %v5764_v6 = vld [vmem:[%s6902_s24] ss:$0 sm:$0xff] }
 0xe24   :  { %v1290_v2 = vmul.f32 %v6683_v42, %v6673_v43  ;;  %v6685_v9 = vpop.eup %6684  ;;  %v1030_v38 = vsel %vm350_vm3, %v7087_v24, %v1020_v30  ;;  %v1928_v42 = vld [vmem:[%s6917_s12] sm:$0xff] }
 0xe25   :  { %6117 = vmatmul.mubr.msk.f32.vlgmr.msra.gmra.mrb[20].mxu1 %vm440_vm6, %v1123_v8  ;;  %v1457_v11 = vmul.f32 %v6685_v9, %v6675_v55  ;;  %v6687_v12 = vpop.eup %6686  ;;  %v1835_v55 = vld [vmem:[%s6907_s30] sm:$0xff] }
 0xe26   :  { %6125 = vmatpush3.msk.msra.mxu1 %vm444_vm4, %v1292_v7  ;;  %6126 = vmatprep.mubr.msk.f32.mxu1 %vm6822_vm2, %v6823_v56  ;;  %v1624_v14 = vmul.f32 %v6687_v12, %v6679_v59  ;;  %v6514_v58 = vpack.c.bf16 %v1836_v57, %v1835_v55  ;;  %v1838_v59 = vld [vmem:[%s6907_s30 + $0x18] sm:$0xff]  ;;  %v5772_v57 = vld [vmem:[%s6872_s25 + $0x1] ss:$0 sm:$0xff]  ;;  %s7772_s25 = sld [smem:[#allocation9_spill]] }
 0xe27   :  { %6134 = vmatprep.subr.mxu1 %v6823_v56 }
 0xe29   :  { %6127 = vmatmul.mubr.msk.f32.vlgmr.msra.gmra.mrb[22].mxu1 %vm440_vm6, %v1290_v2  ;;  %v1929_v2 = vld [vmem:[%s6917_s12 + $0x8] sm:$0xff] }
 0xe2a   :  { %6135 = vmatpush3.msk.msra.mxu1 %vm444_vm4, %v1459_v10  ;;  %6136 = vmatprep.mubr.msk.f32.mxu1 %vm6822_vm2, %v6823_v56  ;;  %v6520_v9 = vpack.c.bf16 %v1929_v2, %v1928_v42  ;;  %v1930_v10 = vld [vmem:[%s6917_s12 + $0x10] sm:$0xff] }
 0xe2b   :  { %6144 = vmatprep.subr.mxu1 %v6823_v56 }
 0xe2c   :  { %6521 = vmatpush3.bf16.msra.mxu0 %v6520_v9 }
 0xe2d   :  { %6137 = vmatmul.mubr.msk.f32.vlgmr.msra.gmra.mrb[24].mxu1 %vm440_vm6, %v1457_v11  ;;  %v1931_v11 = vld [vmem:[%s6917_s12 + $0x18] sm:$0xff]  ;;  %6522 = vmatprep.subr.bf16.mxu0 %v6821_v3 }
 0xe2e   :  { %6145 = vmatpush3.msk.msra.mxu1 %vm444_vm4, %v1626_v13  ;;  %6146 = vmatprep.mubr.msk.f32.mxu1 %vm6822_vm2, %v6823_v56  ;;  %v6523_v12 = vpack.c.bf16 %v1931_v11, %v1930_v10  ;;  %v1932_v13 = vld [vmem:[%s6917_s12 + $0x20] sm:$0xff] }
 0xe2f   :  { %6507 = vmatprep.subr.bf16.mxu1 %v6821_v3 }
 0xe30   :  { %6524 = vmatpush3.bf16.msra.mxu0 %v6523_v12 }
 0xe31   :  { %6147 = vmatmul.mubr.msk.f32.vlgmr.msra.gmra.mrb[26].mxu1 %vm440_vm6, %v1624_v14  ;;  %v1933_v14 = vld [vmem:[%s6917_s12 + $0x28] sm:$0xff]  ;;  %6525 = vmatprep.subr.bf16.mxu0 %v6821_v3 }
 0xe32   :  { %6157 = vmatprep.mubr.msk.f32.mxu1 %vm6822_vm2, %v6823_v56  ;;  %6509 = vmatpush3.bf16.msra.mxu1 %v6508_v17  ;;  %v6526_v15 = vpack.c.bf16 %v1933_v14, %v1932_v13  ;;  %v1935_v17 = vld [vmem:[%s6917_s12 + $0x38] sm:$0xff] }
 0xe33   :  { %6510 = vmatprep.subr.bf16.mxu1 %v6821_v3 }
 0xe34   :  { %6527 = vmatpush3.bf16.msra.mxu0 %v6526_v15 }
 0xe35   :  { %6528 = vmatprep.subr.bf16.mxu0 %v6821_v3 }
 0xe36   :  { %6512 = vmatpush3.bf16.msra.mxu1 %v6511_v22 }
 0xe37   :  { %6513 = vmatprep.subr.bf16.mxu1 %v6821_v3 }
 0xef8   :  { %v1197_v18 = vpop.f32.mrb[20].mxu1 }
 0xef9   :  { %v6118_v19 = vpop.f32.mrb[21].mxu1 }
 0xefa   :  { %v5765_v19 = vld [vmem:[%s7769_s28] ss:$0 sm:$0xff] }
 0xefc   :  { %v1364_v23 = vpop.f32.mrb[22].mxu1 }
 0xefd   :  { %1703 = vrot.lane.b32.xlu1 %v1364_v23, %s6835_s22  ;;  %v6128_v25 = vpop.f32.mrb[23].mxu1 }
 0xf00   :  { %v1531_v26 = vpop.f32.mrb[24].mxu1 }
 0xf01   :  { %1023 = vrot.lane.b32.xlu1 %v7127_v60, %s6836_s23  ;;  %1707 = vrot.lane.b32.xlu0 %v1531_v26, %s6836_s23  ;;  %v6138_v27 = vpop.f32.mrb[25].mxu1 }
 0xf04   :  { %v1698_v28 = vpop.f32.mrb[26].mxu1 }
 0xf05   :  { %1711 = vrot.lane.b32.xlu0 %v1698_v28, %s6837_s26  ;;  %v6148_v29 = vpop.f32.mrb[27].mxu1 }
 0xf09   :  { %1027 = vrot.lane.b32.xlu0 %v7177_v31, %s6837_s26 }
 0xf6f   :  { %v1704_v32 = vpop.permute.xlu1 %1703 }
 0xf70   :  { %v1714_v34 = vsel %vm350_vm3, %v1197_v18, %v1704_v32  ;;  %v6529_v18 = vpack.c.bf16 %v1935_v17, %v1934_v16 }
 0xf72   :  { %6530 = vmatpush3.bf16.msra.mxu0 %v6529_v18 }
 0xf73   :  { %v1708_v33 = vpop.permute.xlu0 %1707  ;;  %v1024_v36 = vpop.permute.xlu1 %1023  ;;  %6211 = vmatprep.subr.mxu0 %v6823_v56 }
 0xf74   :  { %v1715_v60 = vsel %vm1031_vm7, %v1714_v34, %v1708_v33  ;;  %v1032_v39 = vsel %vm1031_vm7, %v1030_v38, %v1024_v36  ;;  %v5767_v34 = vld [vmem:[%s7770_s1] ss:$0 sm:$0xff] }
 0xf77   :  { %v1712_v35 = vpop.permute.xlu0 %1711 }
 0xf78   :  { %v1716_v37 = vsel %vm1033_vm8, %v1715_v60, %v1712_v35 }
 0xf79   :  { %v1718_v31 = vrot.slane %v1716_v37, 4 }
 0xf7b   :  { %v1028_v40 = vpop.permute.xlu0 %1027 }
 0xf7c   :  { %v1034_v41 = vsel %vm1033_vm8, %v1032_v39, %v1028_v40 }
 0xf7d   :  { %v1720_v43 = vsel %vm444_vm4, %v1034_v41, %v1718_v31 }
 0xf7e   :  { %6158 = vmatmul.mubr.msk.f32.vlgmr.msra.gmra.mrb[28].mxu1 %vm234_vm1, %v1720_v43 }
 0xf7f   :  { %6168 = vmatprep.mubr.msk.f32.mxu1 %vm6822_vm2, %v6823_v56  ;;  %6515 = vmatpush3.bf16.msra.mxu1 %v6514_v58 }
 0xf80   :  { %6516 = vmatprep.subr.bf16.mxu1 %v6821_v3 }
0x1051   :  { %v1801_v46 = vpop.f32.mrb[28].mxu1 }
0x1052   :  { %v1802_v47 = vadd.f32 %v5761_v45, %v1801_v46  ;;  %v6159_v24 = vpop.f32.mrb[29].mxu1  ;;  %v5773_v45 = vld [vmem:[%s6877_s29 + $0x20] sm:$0xff]  ;;  %v5774_v46 = vld [vmem:[%s6877_s29 + $0x28] sm:$0xff] }
0x1053   :  { %v5775_v24 = vld [vmem:[%s6877_s29 + $0x30] sm:$0xff] }
0x1054   :  { %v7242_v48 = vadd.f32 %v1802_v47, %v7036_v44  ;;  %v1837_v44 = vld [vmem:[%s6907_s30 + $0x10] sm:$0xff]  ;;  %v6532_v47 = vpack.c.bf16 %v5774_v46, %v5773_v45 }
0x1055   :  { %v6517_v61 = vpack.c.bf16 %v1838_v59, %v1837_v44  ;;  %v5778_v59 = vld [vmem:[%s6882_s3 + $0x1] ss:$0 sm:$0xff]  ;;  %s7774_s3 = sld [smem:[#allocation7_spill]] }
0x1056   :  { %v1808_v49 = vsel %vm234_vm1, %v7242_v48, 0.0 }
0x1057   :  { %1809 = vadd.xlane.f32.xlu1 %v1808_v49  ;;  %6518 = vmatpush3.bf16.msra.mxu1 %v6517_v61 }
0x1058   :  { %6531 = vmatprep.subr.bf16.mxu1 %v6821_v3 }
0x10e4   :  { %v1810_v50 = vpop.xlane.xlu1 %1809 }
0x10e5   :  { %v1811_v51 = vmul.f32 0.03125, %v1810_v50 }
0x10e7   :  { %v1812_v52 = vsub.f32 %v7242_v48, %v1811_v51 }
0x10e9   :  { %v1813_v53 = vmul.f32 %v1812_v52, %v1812_v52 }
0x10eb   :  { %v1814_v54 = vsel %vm234_vm1, %v1813_v53, 0.0 }
0x10ec   :  { %1815 = vadd.xlane.f32.xlu0 %v1814_v54  ;;  %v5771_v54 = vld [vmem:[%s6867_s21 + $0x1] ss:$0 sm:$0xff]  ;;  %s7771_s21 = sld [smem:[#allocation10_spill]] }
0x1179   :  { %v1816_v62 = vpop.xlane.xlu0 %1815 }
0x117a   :  { %v1817_v63 = vmul.f32 0.03125, %v1816_v62 }
0x117c   :  { %v1818_v0 = vadd.f32 1e-06, %v1817_v63 }
0x117e   :  { %6688 = vrsqrt.f32 %v1818_v0 }
0x1188   :  { %v6689_v1 = vpop.eup %6688 }
0x1189   :  { %v1820_v5 = vmul.f32 %v6689_v1, %v1812_v52 }
0x118b   :  { %v1827_v7 = vmul.f32 %v5763_v4, %v1820_v5 }
0x118d   :  { %v1834_v8 = vadd.f32 %v5764_v6, %v1827_v7 }
0x118f   :  { %6169 = vmatmul.mubr.msk.f32.vlgmr.msra.gmra.mrb[30].mxu1 %vm234_vm1, %v1834_v8 }
0x1190   :  { %6198 = vmatprep.mubr.msk.f32.mxu1 %vm6822_vm2, %v6823_v56  ;;  %6533 = vmatpush3.bf16.msra.mxu1 %v6532_v47 }
0x1191   :  { %6534 = vmatprep.subr.bf16.mxu1 %v6821_v3 }
0x1262   :  { %v1915_v20 = vpop.f32.mrb[30].mxu1 }
0x1263   :  { %v1916_v21 = vadd.f32 %v5765_v19, %v1915_v20  ;;  %v6170_v22 = vpop.f32.mrb[31].mxu1 }
0x1265   :  { %v1920_v23 = vmul.f32 0.044715, %v1916_v21  ;;  %v1919_v30 = vmul.f32 0.5, %v1916_v21 }
0x1267   :  { %v1921_v25 = vmul.f32 %v1920_v23, %v1916_v21 }
0x1269   :  { %v1922_v26 = vmul.f32 %v1921_v25, %v1916_v21 }
0x126b   :  { %v1923_v27 = vadd.f32 %v1922_v26, %v1916_v21 }
0x126d   :  { %v1924_v28 = vmul.f32 0.7978846, %v1923_v27 }
0x126f   :  { %6690 = vtanh.f32 %v1924_v28 }
0x1279   :  { %v6691_v29 = vpop.eup %6690 }
0x127a   :  { %v1926_v32 = vadd.f32 1.0, %v6691_v29 }
0x127c   :  { %v1927_v33 = vmul.f32 %v1926_v32, %v1919_v30 }
0x127e   :  { %6188 = vmatmul.mubr.msk.f32.vlgmr.msra.gmra.mrb[8].mxu0 %vm156_vm0, %v1927_v33 }
0x127f   :  { %6213 = vmatprep.mubr.msk.f32.mxu0 %vm6822_vm2, %v6823_v56 }
0x1351   :  { %v2012_v60 = vpop.f32.mrb[8].mxu0 }
0x1352   :  { %v2013_v35 = vadd.f32 %v5767_v34, %v2012_v60  ;;  %v6189_v36 = vpop.f32.mrb[9].mxu0 }
0x1354   :  { %v7277_v37 = vadd.f32 %v2013_v35, %v7242_v48  ;;  %v5776_v48 = vld [vmem:[%s6877_s29 + $0x38] sm:$0xff]  ;;  %s7773_s29 = sld [smem:[#allocation11_spill]] }
0x1355   :  { %v6535_v49 = vpack.c.bf16 %v5776_v48, %v5775_v24 }
0x1356   :  { %v2021_v38 = vsel %vm234_vm1, %v7277_v37, 0.0 }
0x1357   :  { %2022 = vadd.xlane.f32.xlu0 %v2021_v38  ;;  %6536 = vmatpush3.bf16.msra.mxu1 %v6535_v49 }
0x1358   :  { %6201 = vmatprep.subr.mxu1 %v6823_v56 }
0x13e4   :  { %v2023_v39 = vpop.xlane.xlu0 %2022 }
0x13e5   :  { %v2024_v31 = vmul.f32 0.03125, %v2023_v39 }
0x13e7   :  { %v2025_v40 = vsub.f32 %v7277_v37, %v2024_v31 }
0x13e9   :  { %v2026_v41 = vmul.f32 %v2025_v40, %v2025_v40 }
0x13eb   :  { %v2027_v43 = vsel %vm234_vm1, %v2026_v41, 0.0 }
0x13ec   :  { %2028 = vadd.xlane.f32.xlu1 %v2027_v43 }
0x1479   :  { %v2029_v50 = vpop.xlane.xlu1 %2028 }
0x147a   :  { %v2030_v51 = vmul.f32 0.03125, %v2029_v50 }
0x147c   :  { %v2031_v52 = vadd.f32 1e-06, %v2030_v51 }
0x147e   :  { %6692 = vrsqrt.f32 %v2031_v52 }
0x1488   :  { %v6693_v53 = vpop.eup %6692 }
0x1489   :  { %v2033_v55 = vmul.f32 %v6693_v53, %v2025_v40 }
0x148b   :  { %v2040_v58 = vmul.f32 %v5771_v54, %v2033_v55 }
0x148d   :  { %v2047_v44 = vadd.f32 %v5772_v57, %v2040_v58 }
0x148f   :  { %6199 = vmatmul.mubr.msk.f32.vlgmr.msra.gmra.mrb[32].mxu1 %vm234_vm1, %v2047_v44 }
0x1490   :  { %6203 = vmatprep.mubr.msk.f32.mxu1 %vm6822_vm2, %v6823_v56 }
0x1562   :  { %v2130_v61 = vpop.f32.mrb[32].mxu1 }
0x1563   :  { %v7295_v62 = vadd.f32 %v5778_v59, %v2130_v61  ;;  %v6200_v63 = vpop.f32.mrb[33].mxu1 }
0x1565   :  { %2302 = vrot.lane.b32.xlu1 %v7295_v62, %s6826_s9  ;;  %2135 = vrot.lane.b32.xlu0 %v7295_v62, %s6825_s5  ;;  %v7310_v0 = vrot.slane %v7295_v62, 4 }
0x1569   :  { %2300 = vrot.lane.b32.xlu1 %v7295_v62, %s6827_s13  ;;  %2469 = vrot.lane.b32.xlu0 %v7295_v62, %s6829_s7 }
0x156d   :  { %2467 = vrot.lane.b32.xlu1 %v7295_v62, %s6830_s10  ;;  %2636 = vrot.lane.b32.xlu0 %v7295_v62, %s6832_s15 }
0x1571   :  { %2634 = vrot.lane.b32.xlu1 %v7295_v62, %s6833_s16  ;;  %2817 = vrot.lane.b32.xlu0 %v7310_v0, %s6825_s5 }
0x1575   :  { %2984 = vrot.lane.b32.xlu1 %v7310_v0, %s6826_s9  ;;  %2982 = vrot.lane.b32.xlu0 %v7310_v0, %s6827_s13 }
0x1579   :  { %3151 = vrot.lane.b32.xlu1 %v7310_v0, %s6829_s7  ;;  %3149 = vrot.lane.b32.xlu0 %v7310_v0, %s6830_s10 }
0x157d   :  { %3318 = vrot.lane.b32.xlu1 %v7310_v0, %s6832_s15  ;;  %3316 = vrot.lane.b32.xlu0 %v7310_v0, %s6833_s16 }
0x1581   :  { %2223 = vrot.lane.b32.xlu1 %v7295_v62, %s6824_s0 }
0x15d7   :  { %v2303_v1 = vpop.permute.xlu1 %2302  ;;  %v2136_v4 = vpop.permute.xlu0 %2135 }
0x15d8   :  { %6202 = vmatpush3.xpose.msk.msra.mxu1 %vm350_vm3, %v2136_v4  ;;  %6212 = vmatpush3.xpose.msk.msra.mxu0 %vm350_vm3, %v2303_v1 }
0x15d9   :  { %6221 = vmatprep.subr.mxu0 %v6823_v56  ;;  %6206 = vmatprep.subr.mxu1 %v6823_v56 }
0x15db   :  { %v2301_v5 = vpop.permute.xlu1 %2300  ;;  %6204 = vmatmul.mubr.msk.f32.vlgmr.msra.gmra.mrb[34].mxu1 %vm350_vm3, %v7295_v62  ;;  %v2470_v6 = vpop.permute.xlu0 %2469 }
0x15dc   :  { %6214 = vmatmul.mubr.msk.f32.vlgmr.msra.gmra.mrb[10].mxu0 %vm350_vm3, %v2301_v5  ;;  %6208 = vmatprep.mubr.msk.f32.mxu1 %vm6822_vm2, %v6823_v56 }
0x15dd   :  { %6222 = vmatpush3.xpose.msk.msra.mxu0 %vm350_vm3, %v2470_v6  ;;  %6223 = vmatprep.mubr.msk.f32.mxu0 %vm6822_vm2, %v6823_v56 }
0x15de   :  { %6231 = vmatprep.subr.mxu0 %v6823_v56 }
0x15df   :  { %v2468_v7 = vpop.permute.xlu1 %2467  ;;  %v2637_v8 = vpop.permute.xlu0 %2636 }
0x15e0   :  { %6224 = vmatmul.mubr.msk.f32.vlgmr.msra.gmra.mrb[12].mxu0 %vm350_vm3, %v2468_v7 }
0x15e1   :  { %6232 = vmatpush3.xpose.msk.msra.mxu0 %vm350_vm3, %v2637_v8  ;;  %6233 = vmatprep.mubr.msk.f32.mxu0 %vm6822_vm2, %v6823_v56 }
0x15e2   :  { %6241 = vmatprep.subr.mxu0 %v6823_v56 }
0x15e3   :  { %v2635_v42 = vpop.permute.xlu1 %2634  ;;  %v2818_v2 = vpop.permute.xlu0 %2817 }
0x15e4   :  { %6234 = vmatmul.mubr.msk.f32.vlgmr.msra.gmra.mrb[14].mxu0 %vm350_vm3, %v2635_v42 }
0x15e5   :  { %6242 = vmatpush3.xpose.msk.msra.mxu0 %vm350_vm3, %v2818_v2  ;;  %6243 = vmatprep.mubr.msk.f32.mxu0 %vm6822_vm2, %v6823_v56 }
0x15e6   :  { %6251 = vmatprep.subr.mxu0 %v6823_v56 }
0x15e7   :  { %v2985_v9 = vpop.permute.xlu1 %2984  ;;  %v2983_v10 = vpop.permute.xlu0 %2982 }
0x15e8   :  { %6244 = vmatmul.mubr.msk.f32.vlgmr.msra.gmra.mrb[16].mxu0 %vm350_vm3, %v7310_v0 }
0x15e9   :  { %6252 = vmatpush3.xpose.msk.msra.mxu0 %vm350_vm3, %v2985_v9  ;;  %6253 = vmatprep.mubr.msk.f32.mxu0 %vm6822_vm2, %v6823_v56 }
0x15ea   :  { %6261 = vmatprep.subr.mxu0 %v6823_v56 }
0x15eb   :  { %v3152_v11 = vpop.permute.xlu1 %3151  ;;  %v3150_v12 = vpop.permute.xlu0 %3149 }
0x15ec   :  { %6254 = vmatmul.mubr.msk.f32.vlgmr.msra.gmra.mrb[18].mxu0 %vm350_vm3, %v2983_v10 }
0x15ed   :  { %6262 = vmatpush3.xpose.msk.msra.mxu0 %vm350_vm3, %v3152_v11  ;;  %6263 = vmatprep.mubr.msk.f32.mxu0 %vm6822_vm2, %v6823_v56 }
0x15ee   :  { %6271 = vmatprep.subr.mxu0 %v6823_v56 }
0x15ef   :  { %v3319_v13 = vpop.permute.xlu1 %3318  ;;  %v3317_v14 = vpop.permute.xlu0 %3316 }
0x15f0   :  { %6264 = vmatmul.mubr.msk.f32.vlgmr.msra.gmra.mrb[20].mxu0 %vm350_vm3, %v3150_v12 }
0x15f1   :  { %6272 = vmatpush3.xpose.msk.msra.mxu0 %vm350_vm3, %v3319_v13  ;;  %6273 = vmatprep.mubr.msk.f32.mxu0 %vm6822_vm2, %v6823_v56 }
0x15f2   :  { %6537 = vmatprep.subr.bf16.mxu0 %v6821_v3 }
0x15f3   :  { %v2224_v15 = vpop.permute.xlu1 %2223 }
0x15f4   :  { %6207 = vmatpush3.msk.msra.mxu1 %vm444_vm4, %v2224_v15  ;;  %6274 = vmatmul.mubr.msk.f32.vlgmr.msra.gmra.mrb[22].mxu0 %vm350_vm3, %v3317_v14 }
0x15f5   :  { %6216 = vmatprep.subr.mxu1 %v6823_v56  ;;  %6289 = vmatprep.mubr.msk.f32.mxu0 %vm6822_vm2, %v6823_v56 }
0x16ae   :  { %v2207_v16 = vpop.f32.mrb[34].mxu1 }
0x16af   :  { %v2211_v17 = vmul.f32 0.35355338, %v2207_v16  ;;  %v6205_v18 = vpop.f32.mrb[35].mxu1  ;;  %v2374_v19 = vpop.f32.mrb[10].mxu0 }
0x16b0   :  { %v2378_v20 = vmul.f32 0.35355338, %v2374_v19  ;;  %v6215_v21 = vpop.f32.mrb[11].mxu0 }
0x16b1   :  { %v2212_v22 = vsel %vm426_vm5, %v2211_v17, -inf }
0x16b2   :  { %2213 = vmax.xlane.f32.xlu1 %v2212_v22  ;;  %v2379_v23 = vsel %vm426_vm5, %v2378_v20, -inf }
0x16b3   :  { %v2541_v25 = vpop.f32.mrb[12].mxu0  ;;  %2380 = vmax.xlane.f32.xlu0 %v2379_v23 }
0x16b4   :  { %v2545_v26 = vmul.f32 0.35355338, %v2541_v25  ;;  %v6225_v27 = vpop.f32.mrb[13].mxu0 }
0x16b6   :  { %v2546_v28 = vsel %vm426_vm5, %v2545_v26, -inf }
0x16b7   :  { %v2708_v29 = vpop.f32.mrb[14].mxu0  ;;  %2547 = vmax.xlane.f32.xlu0 %v2546_v28 }
0x16b8   :  { %v2712_v30 = vmul.f32 0.35355338, %v2708_v29  ;;  %v6235_v32 = vpop.f32.mrb[15].mxu0 }
0x16ba   :  { %v2713_v33 = vsel %vm426_vm5, %v2712_v30, -inf }
0x16bb   :  { %v2889_v34 = vpop.f32.mrb[16].mxu0  ;;  %2714 = vmax.xlane.f32.xlu1 %v2713_v33 }
0x16bc   :  { %v2893_v60 = vmul.f32 0.35355338, %v2889_v34  ;;  %v6245_v35 = vpop.f32.mrb[17].mxu0 }
0x16be   :  { %v2894_v36 = vsel %vm426_vm5, %v2893_v60, -inf }
0x16bf   :  { %2895 = vmax.xlane.f32.xlu0 %v2894_v36  ;;  %v3056_v38 = vpop.f32.mrb[18].mxu0 }
0x16c0   :  { %v3060_v39 = vmul.f32 0.35355338, %v3056_v38  ;;  %v6255_v31 = vpop.f32.mrb[19].mxu0 }
0x16c2   :  { %v3061_v40 = vsel %vm426_vm5, %v3060_v39, -inf }
0x16c3   :  { %v3223_v41 = vpop.f32.mrb[20].mxu0  ;;  %3062 = vmax.xlane.f32.xlu1 %v3061_v40 }
0x16c4   :  { %v3227_v43 = vmul.f32 0.35355338, %v3223_v41  ;;  %v6265_v45 = vpop.f32.mrb[21].mxu0 }
0x16c6   :  { %v3228_v46 = vsel %vm426_vm5, %v3227_v43, -inf }
0x16c7   :  { %3229 = vmax.xlane.f32.xlu0 %v3228_v46  ;;  %v3390_v47 = vpop.f32.mrb[22].mxu0 }
0x16c8   :  { %v6275_v24 = vpop.f32.mrb[23].mxu0  ;;  %v3394_v48 = vmul.f32 0.35355338, %v3390_v47 }
0x16ca   :  { %v3395_v49 = vsel %vm426_vm5, %v3394_v48, -inf }
0x16d4   :  { %2557 = vrot.lane.b32.xlu1 %v7295_v62, %s6831_s11 }
0x16dd   :  { %2390 = vrot.lane.b32.xlu0 %v7295_v62, %s6828_s17 }
0x16f8   :  { %3396 = vmax.xlane.f32.xlu1 %v3395_v49 }
0x1709   :  { %2724 = vrot.lane.b32.xlu1 %v7295_v62, %s6834_s18 }
0x173f   :  { %v2214_v50 = vpop.xlane.xlu1 %2213 }
0x1740   :  { %v2215_v51 = vsub.f32 %v2211_v17, %v2214_v50  ;;  %v2381_v52 = vpop.xlane.xlu0 %2380 }
0x1741   :  { %v2382_v53 = vsub.f32 %v2378_v20, %v2381_v52 }
0x1742   :  { %v2216_v54 = vmul.f32 1.442695, %v2215_v51 }
0x1743   :  { %v2383_v55 = vmul.f32 1.442695, %v2382_v53 }
0x1744   :  { %6694 = vpow2.f32 %v2216_v54  ;;  %v2548_v57 = vpop.xlane.xlu0 %2547 }
0x1745   :  { %6696 = vpow2.f32 %v2383_v55  ;;  %v2549_v58 = vsub.f32 %v2545_v26, %v2548_v57 }
0x1747   :  { %v2550_v44 = vmul.f32 1.442695, %v2549_v58 }
0x1748   :  { %v2715_v5 = vpop.xlane.xlu1 %2714 }
0x1749   :  { %6698 = vpow2.f32 %v2550_v44  ;;  %v2716_v6 = vsub.f32 %v2712_v30, %v2715_v5 }
0x174b   :  { %v2717_v2 = vmul.f32 1.442695, %v2716_v6 }
0x174c   :  { %v2896_v7 = vpop.xlane.xlu0 %2895 }
0x174d   :  { %v2897_v42 = vsub.f32 %v2893_v60, %v2896_v7  ;;  %6700 = vpow2.f32 %v2717_v2  ;;  %v5812_v7 = vld [vmem:[%s6887_s8 + $0x20] sm:$0xff] }
0x174e   :  { %v6695_v59 = vpop.eup %6694 }
0x174f   :  { %v6697_v61 = vpop.eup %6696  ;;  %v2218_v63 = vsel %vm426_vm5, %v6695_v59, 0.0  ;;  %v2898_v11 = vmul.f32 1.442695, %v2897_v42 }
0x1750   :  { %2219 = vadd.xlane.f32.xlu0 %v2218_v63  ;;  %v2385_v1 = vsel %vm426_vm5, %v6697_v61, 0.0  ;;  %v3063_v8 = vpop.xlane.xlu1 %3062 }
0x1751   :  { %2386 = vadd.xlane.f32.xlu1 %v2385_v1  ;;  %v3064_v9 = vsub.f32 %v3060_v39, %v3063_v8  ;;  %6702 = vpow2.f32 %v2898_v11  ;;  %v5813_v8 = vld [vmem:[%s6887_s8 + $0x28] sm:$0xff]  ;;  %v5814_v11 = vld [vmem:[%s6887_s8 + $0x30] sm:$0xff] }
0x1752   :  { %v6538_v2 = vpack.c.bf16 %v5813_v8, %v5812_v7  ;;  %v5835_v7 = vld [vmem:[%s6917_s12 + $0x68] sm:$0xff] }
0x1753   :  { %v7390_v62 = vpop.eup %6698  ;;  %v3065_v12 = vmul.f32 1.442695, %v3064_v9 }
0x1754   :  { %v2552_v4 = vsel %vm426_vm5, %v7390_v62, 0.0  ;;  %v3230_v10 = vpop.xlane.xlu0 %3229  ;;  %v2558_v15 = vpop.permute.xlu1 %2557  ;;  %6539 = vmatpush3.bf16.msra.mxu0 %v6538_v2  ;;  %v5837_v2 = vld [vmem:[%s6917_s12 + $0x78] sm:$0xff] }
0x1755   :  { %2553 = vadd.xlane.f32.xlu0 %v2552_v4  ;;  %v3231_v13 = vsub.f32 %v3227_v43, %v3230_v10  ;;  %6704 = vpow2.f32 %v3065_v12  ;;  %6540 = vmatprep.subr.bf16.mxu0 %v6821_v3  ;;  %v5815_v12 = vld [vmem:[%s6887_s8 + $0x38] sm:$0xff]  ;;  %s7775_s8 = sld [smem:[#allocation8_spill]] }
0x1757   :  { %v3232_v14 = vmul.f32 1.442695, %v3231_v13  ;;  %v6701_v16 = vpop.eup %6700  ;;  %v6541_v13 = vpack.c.bf16 %v5815_v12, %v5814_v11 }
0x1758   :  { %v2719_v19 = vsel %vm426_vm5, %v6701_v16, 0.0  ;;  %v2391_v30 = vpop.permute.xlu0 %2390 }
0x1759   :  { %6706 = vpow2.f32 %v3232_v14  ;;  %6542 = vmatpush3.bf16.msra.mxu0 %v6541_v13 }
0x175a   :  { %6549 = vmatprep.subr.bf16.mxu0 %v6821_v3 }
0x175b   :  { %v6703_v17 = vpop.eup %6702 }
0x175c   :  { %v2900_v23 = vsel %vm426_vm5, %v6703_v17, 0.0 }
0x175f   :  { %v7399_v20 = vpop.eup %6704 }
0x1760   :  { %v3067_v25 = vsel %vm426_vm5, %v7399_v20, 0.0 }
0x1762   :  { %2905 = vrot.lane.b32.xlu1 %v7310_v0, %s6824_s0 }
0x1763   :  { %v7404_v26 = vpop.eup %6706 }
0x1764   :  { %v3234_v27 = vsel %vm426_vm5, %v7404_v26, 0.0 }
0x176b   :  { %3072 = vrot.lane.b32.xlu0 %v7310_v0, %s6828_s17 }
0x1785   :  { %v3397_v18 = vpop.xlane.xlu1 %3396 }
0x1786   :  { %v3398_v21 = vsub.f32 %v3394_v48, %v3397_v18  ;;  %2720 = vadd.xlane.f32.xlu1 %v2719_v19 }
0x1788   :  { %v3399_v22 = vmul.f32 1.442695, %v3398_v21 }
0x1789   :  { %v2725_v32 = vpop.permute.xlu1 %2724 }
0x178a   :  { %6708 = vpow2.f32 %v3399_v22  ;;  %2901 = vadd.xlane.f32.xlu0 %v2900_v23  ;;  %3068 = vadd.xlane.f32.xlu1 %v3067_v25 }
0x178e   :  { %3235 = vadd.xlane.f32.xlu0 %v3234_v27 }
0x1794   :  { %v7408_v28 = vpop.eup %6708 }
0x1795   :  { %v3401_v29 = vsel %vm426_vm5, %v7408_v28, 0.0 }
0x1796   :  { %3402 = vadd.xlane.f32.xlu0 %v3401_v29 }
0x179b   :  { %3239 = vrot.lane.b32.xlu1 %v7310_v0, %s6831_s11 }
0x17ac   :  { %3406 = vrot.lane.b32.xlu0 %v7310_v0, %s6834_s18 }
0x17dd   :  { %v2220_v33 = vpop.xlane.xlu0 %2219 }
0x17de   :  { %6710 = vrcp.f32 %v2220_v33  ;;  %v2387_v34 = vpop.xlane.xlu1 %2386 }
0x17df   :  { %6712 = vrcp.f32 %v2387_v34 }
0x17e2   :  { %v2554_v60 = vpop.xlane.xlu0 %2553  ;;  %v2906_v40 = vpop.permute.xlu1 %2905 }
0x17e3   :  { %6714 = vrcp.f32 %v2554_v60 }
0x17e6   :  { %v3073_v41 = vpop.permute.xlu0 %3072 }
0x17e8   :  { %v6711_v35 = vpop.eup %6710 }
0x17e9   :  { %v2222_v36 = vmul.f32 %v6711_v35, %v6695_v59  ;;  %v6713_v38 = vpop.eup %6712  ;;  %v5817_v35 = vld [vmem:[%s6892_s14 + $0x1] ss:$0 sm:$0xff]  ;;  %s7776_s14 = sld [smem:[#allocation12_spill]] }
0x17ea   :  { %v2389_v39 = vmul.f32 %v6713_v38, %v6697_v61 }
0x17eb   :  { %6209 = vmatmul.mubr.msk.f32.vlgmr.msra.gmra.mrb[36].mxu1 %vm440_vm6, %v2222_v36 }
0x17ec   :  { %6217 = vmatpush3.msk.msra.mxu1 %vm444_vm4, %v2391_v30  ;;  %6218 = vmatprep.mubr.msk.f32.mxu1 %vm6822_vm2, %v6823_v56 }
0x17ed   :  { %6226 = vmatprep.subr.mxu1 %v6823_v56  ;;  %v6715_v0 = vpop.eup %6714 }
0x17ee   :  { %v2556_v31 = vmul.f32 %v6715_v0, %v7390_v62 }
0x17ef   :  { %6219 = vmatmul.mubr.msk.f32.vlgmr.msra.gmra.mrb[38].mxu1 %vm440_vm6, %v2389_v39 }
0x17f0   :  { %6227 = vmatpush3.msk.msra.mxu1 %vm444_vm4, %v2558_v15  ;;  %6228 = vmatprep.mubr.msk.f32.mxu1 %vm6822_vm2, %v6823_v56 }
0x17f1   :  { %6236 = vmatprep.subr.mxu1 %v6823_v56 }
0x17f3   :  { %6229 = vmatmul.mubr.msk.f32.vlgmr.msra.gmra.mrb[40].mxu1 %vm440_vm6, %v2556_v31 }
0x17f4   :  { %6237 = vmatpush3.msk.msra.mxu1 %vm444_vm4, %v2725_v32  ;;  %6238 = vmatprep.mubr.msk.f32.mxu1 %vm6822_vm2, %v6823_v56 }
0x17f5   :  { %6246 = vmatprep.subr.mxu1 %v6823_v56 }
0x1813   :  { %v2721_v43 = vpop.xlane.xlu1 %2720 }
0x1814   :  { %6716 = vrcp.f32 %v2721_v43 }
0x1817   :  { %v2902_v45 = vpop.xlane.xlu0 %2901  ;;  %v3069_v46 = vpop.xlane.xlu1 %3068 }
0x1818   :  { %6718 = vrcp.f32 %v2902_v45 }
0x1819   :  { %6720 = vrcp.f32 %v3069_v46 }
0x181b   :  { %v3236_v47 = vpop.xlane.xlu0 %3235  ;;  %v3240_v55 = vpop.permute.xlu1 %3239 }
0x181c   :  { %6722 = vrcp.f32 %v3236_v47  ;;  %v5823_v47 = vld [vmem:[%s6907_s30 + $0x20] sm:$0xff] }
0x181e   :  { %v6717_v24 = vpop.eup %6716 }
0x181f   :  { %v2723_v48 = vmul.f32 %v6717_v24, %v6701_v16  ;;  %v5824_v24 = vld [vmem:[%s6907_s30 + $0x28] sm:$0xff] }
0x1821   :  { %6239 = vmatmul.mubr.msk.f32.vlgmr.msra.gmra.mrb[42].mxu1 %vm440_vm6, %v2723_v48  ;;  %v6544_v48 = vpack.c.bf16 %v5824_v24, %v5823_v47 }
0x1822   :  { %v6719_v49 = vpop.eup %6718  ;;  %6247 = vmatpush3.msk.msra.mxu1 %vm444_vm4, %v2906_v40  ;;  %6248 = vmatprep.mubr.msk.f32.mxu1 %vm6822_vm2, %v6823_v56 }
0x1823   :  { %v2904_v50 = vmul.f32 %v6719_v49, %v6703_v17  ;;  %v3403_v51 = vpop.xlane.xlu0 %3402  ;;  %6256 = vmatprep.subr.mxu1 %v6823_v56  ;;  %v6721_v52 = vpop.eup %6720  ;;  %v5826_v49 = vld [vmem:[%s6907_s30 + $0x38] sm:$0xff] }
0x1824   :  { %6724 = vrcp.f32 %v3403_v51  ;;  %v3071_v53 = vmul.f32 %v6721_v52, %v7399_v20 }
0x1825   :  { %6249 = vmatmul.mubr.msk.f32.vlgmr.msra.gmra.mrb[44].mxu1 %vm440_vm6, %v2904_v50 }
0x1826   :  { %6257 = vmatpush3.msk.msra.mxu1 %vm444_vm4, %v3073_v41  ;;  %6258 = vmatprep.mubr.msk.f32.mxu1 %vm6822_vm2, %v6823_v56  ;;  %v6723_v54 = vpop.eup %6722 }
0x1827   :  { %6266 = vmatprep.subr.mxu1 %v6823_v56  ;;  %v3238_v57 = vmul.f32 %v6723_v54, %v7404_v26  ;;  %v3407_v58 = vpop.permute.xlu0 %3406 }
0x1829   :  { %6259 = vmatmul.mubr.msk.f32.vlgmr.msra.gmra.mrb[46].mxu1 %vm440_vm6, %v3071_v53 }
0x182a   :  { %6267 = vmatpush3.msk.msra.mxu1 %vm444_vm4, %v3240_v55  ;;  %6268 = vmatprep.mubr.msk.f32.mxu1 %vm6822_vm2, %v6823_v56  ;;  %v5821_v55 = vld [vmem:[%s6897_s19 + $0x1] ss:$0 sm:$0xff]  ;;  %s7777_s19 = sld [smem:[#allocation13_spill]] }
0x182b   :  { %6276 = vmatprep.subr.mxu1 %v6823_v56 }
0x182d   :  { %6269 = vmatmul.mubr.msk.f32.vlgmr.msra.gmra.mrb[48].mxu1 %vm440_vm6, %v3238_v57 }
0x182e   :  { %v6725_v44 = vpop.eup %6724  ;;  %6277 = vmatpush3.msk.msra.mxu1 %vm444_vm4, %v3407_v58  ;;  %6278 = vmatprep.mubr.msk.f32.mxu1 %vm6822_vm2, %v6823_v56  ;;  %v5822_v58 = vld [vmem:[%s6902_s24 + $0x1] ss:$0 sm:$0xff]  ;;  %s7778_s24 = sld [smem:[#allocation16_spill]] }
0x182f   :  { %v3405_v59 = vmul.f32 %v6725_v44, %v7408_v28  ;;  %6543 = vmatprep.subr.bf16.mxu1 %v6821_v3 }
0x1831   :  { %6279 = vmatmul.mubr.msk.f32.vlgmr.msra.gmra.mrb[50].mxu1 %vm440_vm6, %v3405_v59 }
0x1832   :  { %6300 = vmatprep.mubr.msk.f32.mxu1 %vm6822_vm2, %v6823_v56  ;;  %6545 = vmatpush3.bf16.msra.mxu1 %v6544_v48  ;;  %v3915_v48 = vlaneseq }
0x1833   :  { %6546 = vmatprep.subr.bf16.mxu1 %v6821_v3 }
0x18be   :  { %v2296_v61 = vpop.f32.mrb[36].mxu1 }
0x18bf   :  { %v6210_v63 = vpop.f32.mrb[37].mxu1 }
0x18c0   :  { %v5831_v63 = vld [vmem:[%s6917_s12 + $0x48] sm:$0xff] }
0x18c2   :  { %v2463_v1 = vpop.f32.mrb[38].mxu1 }
0x18c3   :  { %2802 = vrot.lane.b32.xlu1 %v2463_v1, %s6835_s22  ;;  %v6220_v62 = vpop.f32.mrb[39].mxu1 }
0x18c4   :  { %v5832_v62 = vld [vmem:[%s6917_s12 + $0x50] sm:$0xff] }
0x18c6   :  { %v2630_v4 = vpop.f32.mrb[40].mxu1 }
0x18c7   :  { %v6230_v5 = vpop.f32.mrb[41].mxu1 }
0x18f4   :  { %v2797_v6 = vpop.f32.mrb[42].mxu1 }
0x18f5   :  { %v6240_v42 = vpop.f32.mrb[43].mxu1 }
0x18f6   :  { %v5836_v42 = vld [vmem:[%s6917_s12 + $0x70] sm:$0xff] }
0x18f8   :  { %v2978_v9 = vpop.f32.mrb[44].mxu1 }
0x18f9   :  { %v6250_v10 = vpop.f32.mrb[45].mxu1 }
0x18fa   :  { %v5828_v10 = vld [vmem:[%s7769_s28 + $0x1] ss:$0 sm:$0xff] }
0x18fc   :  { %v3145_v14 = vpop.f32.mrb[46].mxu1 }
0x18fd   :  { %3484 = vrot.lane.b32.xlu1 %v3145_v14, %s6835_s22  ;;  %v6260_v15 = vpop.f32.mrb[47].mxu1 }
0x1900   :  { %v3312_v16 = vpop.f32.mrb[48].mxu1 }
0x1901   :  { %2806 = vrot.lane.b32.xlu1 %v2630_v4, %s6836_s23  ;;  %3488 = vrot.lane.b32.xlu0 %v3312_v16, %s6836_s23  ;;  %v6270_v17 = vpop.f32.mrb[49].mxu1  ;;  %v5833_v4 = vld [vmem:[%s6917_s12 + $0x58] sm:$0xff] }
0x1902   :  { %v6553_v5 = vpack.c.bf16 %v5833_v4, %v5832_v62 }
0x1904   :  { %v3479_v18 = vpop.f32.mrb[50].mxu1 }
0x1905   :  { %3492 = vrot.lane.b32.xlu0 %v3479_v18, %s6837_s26  ;;  %v6280_v19 = vpop.f32.mrb[51].mxu1 }
0x1909   :  { %2810 = vrot.lane.b32.xlu0 %v2797_v6, %s6837_s26  ;;  %v5834_v6 = vld [vmem:[%s6917_s12 + $0x60] sm:$0xff] }
0x190a   :  { %v6556_v8 = vpack.c.bf16 %v5835_v7, %v5834_v6  ;;  %v5841_v6 = vld [vmem:[%s7774_s3] ss:$0 sm:$0xff] }
0x1935   :  { %v2803_v20 = vpop.permute.xlu1 %2802 }
0x1936   :  { %v2813_v29 = vsel %vm350_vm3, %v2296_v61, %v2803_v20  ;;  %v5830_v61 = vld [vmem:[%s6917_s12 + $0x40] sm:$0xff]  ;;  %s7780_s12 = sld [smem:[#allocation15_spill]] }
0x1937   :  { %v6550_v1 = vpack.c.bf16 %v5831_v63, %v5830_v61 }
0x196f   :  { %v3485_v21 = vpop.permute.xlu1 %3484 }
0x1970   :  { %v3495_v23 = vsel %vm350_vm3, %v2978_v9, %v3485_v21  ;;  %v6559_v9 = vpack.c.bf16 %v5837_v2, %v5836_v42 }
0x1973   :  { %v3489_v22 = vpop.permute.xlu0 %3488  ;;  %v2807_v27 = vpop.permute.xlu1 %2806 }
0x1974   :  { %v3496_v25 = vsel %vm1031_vm7, %v3495_v23, %v3489_v22  ;;  %v2814_v30 = vsel %vm1031_vm7, %v2813_v29, %v2807_v27  ;;  %v5839_v23 = vld [vmem:[%s7770_s1 + $0x1] ss:$0 sm:$0xff] }
0x1977   :  { %v3493_v26 = vpop.permute.xlu0 %3492 }
0x1978   :  { %v3497_v28 = vsel %vm1033_vm8, %v3496_v25, %v3493_v26 }
0x1979   :  { %v3499_v32 = vrot.slane %v3497_v28, 4 }
0x197b   :  { %v2811_v33 = vpop.permute.xlu0 %2810 }
0x197c   :  { %v2815_v34 = vsel %vm1033_vm8, %v2814_v30, %v2811_v33  ;;  %v3835_v30 = vld [vmem:[%s7771_s21] sm:$0xff]  ;;  %v3837_v33 = vld [vmem:[%s7771_s21 + $0x10] sm:$0xff] }
0x197d   :  { %v3501_v60 = vsel %vm444_vm4, %v2815_v34, %v3499_v32  ;;  %v3836_v32 = vld [vmem:[%s7771_s21 + $0x8] sm:$0xff] }
0x197e   :  { %6290 = vmatmul.mubr.msk.f32.vlgmr.msra.gmra.mrb[24].mxu0 %vm234_vm1, %v3501_v60  ;;  %v6644_v34 = vpack.i.bf16 %v3836_v32, %v3835_v30  ;;  %v6562_v60 = vpack.c.bf16 %v3836_v32, %v3835_v30 }
0x197f   :  { %6319 = vmatprep.mubr.msk.f32.mxu0 %vm6822_vm2, %v6823_v56  ;;  %6551 = vmatpush3.bf16.msra.mxu0 %v6550_v1 }
0x1980   :  { %6552 = vmatprep.subr.bf16.mxu0 %v6821_v3 }
0x1983   :  { %6554 = vmatpush3.bf16.msra.mxu0 %v6553_v5 }
0x1984   :  { %6555 = vmatprep.subr.bf16.mxu0 %v6821_v3 }
0x1987   :  { %6557 = vmatpush3.bf16.msra.mxu0 %v6556_v8  ;;  %v5842_v8 = vld [vmem:[%s7775_s8] ss:$0 sm:$0xff] }
0x1988   :  { %6558 = vmatprep.subr.bf16.mxu0 %v6821_v3 }
0x198b   :  { %6560 = vmatpush3.bf16.msra.mxu0 %v6559_v9 }
0x198c   :  { %6344 = vmatprep.subr.mxu0 %v6823_v56 }
0x1a51   :  { %v3584_v36 = vpop.f32.mrb[24].mxu0 }
0x1a52   :  { %v3585_v38 = vadd.f32 %v5817_v35, %v3584_v36  ;;  %v6291_v39 = vpop.f32.mrb[25].mxu0  ;;  %v3838_v35 = vld [vmem:[%s7771_s21 + $0x18] sm:$0xff] }
0x1a53   :  { %v6649_v36 = vpack.i.bf16 %v3838_v35, %v3837_v33  ;;  %v3840_v39 = vld [vmem:[%s7772_s25] sm:$0x1] }
0x1a54   :  { %v7482_v0 = vadd.f32 %v3585_v38, %v7277_v37  ;;  %v5825_v37 = vld [vmem:[%s6907_s30 + $0x30] sm:$0xff]  ;;  %v6565_v38 = vpack.c.bf16 %v3838_v35, %v3837_v33  ;;  %s7779_s30 = sld [smem:[#allocation14_spill]] }
0x1a55   :  { %v6547_v50 = vpack.c.bf16 %v5826_v49, %v5825_v37  ;;  %v3916_v37 = vshrl.u32 %v3915_v48, 7  ;;  %v3839_v49 = vld [vmem:[%s7773_s29] sm:$0x1] }
0x1a56   :  { %v3593_v31 = vsel %vm234_vm1, %v7482_v0, 0.0 }
0x1a57   :  { %3594 = vadd.xlane.f32.xlu1 %v3593_v31  ;;  %6548 = vmatpush3.bf16.msra.mxu1 %v6547_v50  ;;  %v3917_v50 = vsub.s32 0, %v3916_v37 }
0x1a58   :  { %6561 = vmatprep.subr.bf16.mxu1 %v6821_v3 }
0x1ae4   :  { %v3595_v40 = vpop.xlane.xlu1 %3594 }
0x1ae5   :  { %v3596_v41 = vmul.f32 0.03125, %v3595_v40 }
0x1ae7   :  { %v3597_v43 = vsub.f32 %v7482_v0, %v3596_v41 }
0x1ae9   :  { %v3598_v45 = vmul.f32 %v3597_v43, %v3597_v43 }
0x1aeb   :  { %v3599_v46 = vsel %vm234_vm1, %v3598_v45, 0.0 }
0x1aec   :  { %3600 = vadd.xlane.f32.xlu0 %v3599_v46 }
0x1b79   :  { %v3601_v51 = vpop.xlane.xlu0 %3600 }
0x1b7a   :  { %v3602_v52 = vmul.f32 0.03125, %v3601_v51  ;;  %v3918_v51 = vrot.slane %v3839_v49, %v3917_v50 }
0x1b7c   :  { %v3603_v53 = vadd.f32 1e-06, %v3602_v52 }
0x1b7e   :  { %6726 = vrsqrt.f32 %v3603_v53 }
0x1b88   :  { %v6727_v54 = vpop.eup %6726 }
0x1b89   :  { %v3605_v57 = vmul.f32 %v6727_v54, %v3597_v43 }
0x1b8b   :  { %v3612_v44 = vmul.f32 %v5821_v55, %v3605_v57 }
0x1b8d   :  { %v3619_v59 = vadd.f32 %v5822_v58, %v3612_v44 }
0x1b8f   :  { %6301 = vmatmul.mubr.msk.f32.vlgmr.msra.gmra.mrb[52].mxu1 %vm234_vm1, %v3619_v59 }
0x1b90   :  { %6330 = vmatprep.mubr.msk.f32.mxu1 %vm6822_vm2, %v6823_v56  ;;  %6563 = vmatpush3.bf16.msra.mxu1 %v6562_v60 }
0x1b91   :  { %6564 = vmatprep.subr.bf16.mxu1 %v6821_v3 }
0x1b94   :  { %6566 = vmatpush3.bf16.msra.mxu1 %v6565_v38 }
0x1b95   :  { %6567 = vmatprep.subr.bf16.mxu1 %v6821_v3 }
0x1b97   :  { %6331 = vmatmul.mubr.msk.f32.vlgmr.msra.gmra.mrb[54].mxu1 %vm234_vm1, %v3840_v39 }
0x1b98   :  { %6341 = vmatprep.mubr.msk.f32.mxu1 %vm6822_vm2, %v6823_v56 }
0x1c62   :  { %v3702_v11 = vpop.f32.mrb[52].mxu1 }
0x1c63   :  { %v3703_v12 = vadd.f32 %v5828_v10, %v3702_v11  ;;  %v6302_v13 = vpop.f32.mrb[53].mxu1 }
0x1c65   :  { %v3707_v14 = vmul.f32 0.044715, %v3703_v12  ;;  %v3706_v20 = vmul.f32 0.5, %v3703_v12 }
0x1c67   :  { %v3708_v15 = vmul.f32 %v3707_v14, %v3703_v12 }
0x1c69   :  { %v3709_v16 = vmul.f32 %v3708_v15, %v3703_v12 }
0x1c6a   :  { %v3910_v52 = vpop.f32.mrb[54].mxu1 }
0x1c6b   :  { %v3710_v17 = vadd.f32 %v3709_v16, %v3703_v12  ;;  %v3911_v53 = vadd.f32 %v3910_v52, %v3839_v49  ;;  %v6332_v54 = vpop.f32.mrb[55].mxu1 }
0x1c6d   :  { %v3711_v18 = vmul.f32 0.7978846, %v3710_v17  ;;  %v4012_v55 = vrot.slane %v3911_v53, 7 }
0x1c6f   :  { %6728 = vtanh.f32 %v3711_v18  ;;  %v4015_v57 = vsel %vm4014_vm9, %v3911_v53, %v4012_v55 }
0x1c70   :  { %v4698_v58 = vrot.slane %v4015_v57, 1 }
0x1c79   :  { %v6729_v19 = vpop.eup %6728 }
0x1c7a   :  { %v3713_v21 = vadd.f32 1.0, %v6729_v19 }
0x1c7c   :  { %v3714_v22 = vmul.f32 %v3713_v21, %v3706_v20 }
0x1c7e   :  { %6320 = vmatmul.mubr.msk.f32.vlgmr.msra.gmra.mrb[26].mxu0 %vm156_vm0, %v3714_v22 }
0x1c7f   :  { %6346 = vmatprep.mubr.msk.f32.mxu0 %vm6822_vm2, %v6823_v56 }
0x1d51   :  { %v3801_v25 = vpop.f32.mrb[26].mxu0 }
0x1d52   :  { %v3802_v26 = vadd.f32 %v5839_v23, %v3801_v25  ;;  %v6321_v27 = vpop.f32.mrb[27].mxu0 }
0x1d54   :  { %v3805_v28 = vadd.f32 %v3802_v26, %v7482_v0 }
0x1d56   :  { %v3808_v29 = vsel %vm234_vm1, %v3805_v28, 0.0 }
0x1d57   :  { %3809 = vadd.xlane.f32.xlu0 %v3808_v29 }
0x1d6d   :  { %6645 = vrot.lane.b32.xlu0 %v6644_v34, %s6825_s5 }
0x1de4   :  { %v3810_v0 = vpop.xlane.xlu0 %3809 }
0x1de5   :  { %v3811_v31 = vmul.f32 0.03125, %v3810_v0 }
0x1de7   :  { %v3812_v40 = vsub.f32 %v3805_v28, %v3811_v31 }
0x1de8   :  { %v6646_v45 = vpop.permute.xlu0 %6645 }
0x1de9   :  { %v3813_v41 = vmul.f32 %v3812_v40, %v3812_v40  ;;  %v6648_v46 = vunpack.i.h.bf16 %v6646_v45  ;;  %v6647_v47 = vunpack.i.l.bf16 %v6646_v45 }
0x1deb   :  { %v3814_v43 = vsel %vm234_vm1, %v3813_v41, 0.0  ;;  %v6568_v24 = vpack.c.bf16 %v6648_v46, %v6647_v47 }
0x1dec   :  { %3815 = vadd.xlane.f32.xlu1 %v3814_v43 }
0x1ded   :  { %6569 = vmatpush3.bf16.msra.mxu1 %v6568_v24 }
0x1dee   :  { %6570 = vmatprep.subr.bf16.mxu1 %v6821_v3 }
0x1dfd   :  { %6650 = vrot.lane.b32.xlu1 %v6649_v36, %s6825_s5 }
0x1e01   :  { %3935 = vrot.lane.b32.xlu1 %v3918_v51, %s6825_s5 }
0x1e05   :  { %4182 = vrot.lane.b32.xlu1 %v4015_v57, %s6827_s13 }
0x1e09   :  { %4349 = vrot.lane.b32.xlu1 %v4015_v57, %s6830_s10 }
0x1e0d   :  { %4516 = vrot.lane.b32.xlu1 %v4015_v57, %s6833_s16 }
0x1e11   :  { %4863 = vrot.lane.b32.xlu1 %v4698_v58, %s6827_s13 }
0x1e15   :  { %5030 = vrot.lane.b32.xlu1 %v4698_v58, %s6830_s10 }
0x1e19   :  { %5197 = vrot.lane.b32.xlu1 %v4698_v58, %s6833_s16 }
0x1e79   :  { %v3816_v44 = vpop.xlane.xlu1 %3815 }
0x1e7a   :  { %v3817_v59 = vmul.f32 0.03125, %v3816_v44 }
0x1e7c   :  { %v3818_v61 = vadd.f32 1e-06, %v3817_v59 }
0x1e7d   :  { %v6651_v63 = vpop.permute.xlu1 %6650 }
0x1e7e   :  { %6730 = vrsqrt.f32 %v3818_v61  ;;  %v6653_v1 = vunpack.i.h.bf16 %v6651_v63  ;;  %v6652_v62 = vunpack.i.l.bf16 %v6651_v63 }
0x1e80   :  { %v6571_v4 = vpack.c.bf16 %v6653_v1, %v6652_v62 }
0x1e81   :  { %v3936_v9 = vpop.permute.xlu1 %3935 }
0x1e82   :  { %6572 = vmatpush3.bf16.msra.mxu1 %v6571_v4 }
0x1e83   :  { %6349 = vmatprep.subr.mxu1 %v6823_v56 }
0x1e85   :  { %v4183_v14 = vpop.permute.xlu1 %4182 }
0x1e88   :  { %v6731_v5 = vpop.eup %6730 }
0x1e89   :  { %v3820_v7 = vmul.f32 %v6731_v5, %v3812_v40  ;;  %v4350_v16 = vpop.permute.xlu1 %4349 }
0x1e8b   :  { %v3827_v42 = vmul.f32 %v5841_v6, %v3820_v7 }
0x1e8d   :  { %v3834_v2 = vadd.f32 %v5842_v8, %v3827_v42  ;;  %v4517_v19 = vpop.permute.xlu1 %4516 }
0x1e8f   :  { %6342 = vmatmul.mubr.msk.f32.vlgmr.msra.gmra.mrb[56].mxu1 %vm234_vm1, %v3834_v2 }
0x1e90   :  { %6351 = vmatprep.mubr.msk.f32.mxu1 %vm6822_vm2, %v6823_v56 }
0x1e91   :  { %v4864_v21 = vpop.permute.xlu1 %4863 }
0x1e95   :  { %v5031_v25 = vpop.permute.xlu1 %5030 }
0x1e99   :  { %v5198_v27 = vpop.permute.xlu1 %5197 }
0x1f62   :  { %v4007_v10 = vpop.f32.mrb[56].mxu1 }
0x1f63   :  { %v7547_v11 = vadd.f32 %v4007_v10, %v3936_v9  ;;  %v6343_v12 = vpop.f32.mrb[57].mxu1 }
0x1f65   :  { %4272 = vrot.lane.b32.xlu1 %v7547_v11, %s6826_s9  ;;  %4184 = vrot.lane.b32.xlu0 %v7547_v11, %s6827_s13  ;;  %v7564_v13 = vrot.slane %v7547_v11, 4 }
0x1f66   :  { %6345 = vmatpush3.xpose.msk.msra.mxu0 %vm350_vm3, %v7547_v11 }
0x1f67   :  { %6354 = vmatprep.subr.mxu0 %v6823_v56 }
0x1f69   :  { %6347 = vmatmul.mubr.msk.f32.vlgmr.msra.gmra.mrb[28].mxu0 %vm350_vm3, %v4015_v57  ;;  %4351 = vrot.lane.b32.xlu0 %v7547_v11, %s6830_s10 }
0x1f6a   :  { %6356 = vmatprep.mubr.msk.f32.mxu0 %vm6822_vm2, %v6823_v56 }
0x1f6d   :  { %4518 = vrot.lane.b32.xlu0 %v7547_v11, %s6833_s16 }
0x1f71   :  { %4865 = vrot.lane.b32.xlu0 %v7564_v13, %s6827_s13 }
0x1f75   :  { %5032 = vrot.lane.b32.xlu0 %v7564_v13, %s6830_s10 }
0x1f79   :  { %5199 = vrot.lane.b32.xlu0 %v7564_v13, %s6833_s16 }
0x1f7d   :  { %4105 = vrot.lane.b32.xlu0 %v7547_v11, %s6825_s5 }
0x1fd7   :  { %v4185_v15 = vpop.permute.xlu0 %4184  ;;  %v4273_v4 = vpop.permute.xlu1 %4272 }
0x1fd8   :  { %6355 = vmatpush3.xpose.msk.msra.mxu0 %vm350_vm3, %v4185_v15 }
0x1fd9   :  { %6364 = vmatprep.subr.mxu0 %v6823_v56 }
0x1fdb   :  { %v4352_v17 = vpop.permute.xlu0 %4351  ;;  %6357 = vmatmul.mubr.msk.f32.vlgmr.msra.gmra.mrb[30].mxu0 %vm350_vm3, %v4183_v14 }
0x1fdc   :  { %6365 = vmatpush3.xpose.msk.msra.mxu0 %vm350_vm3, %v4352_v17  ;;  %6366 = vmatprep.mubr.msk.f32.mxu0 %vm6822_vm2, %v6823_v56 }
0x1fdd   :  { %6374 = vmatprep.subr.mxu0 %v6823_v56 }
0x1fdf   :  { %v4519_v18 = vpop.permute.xlu0 %4518  ;;  %6367 = vmatmul.mubr.msk.f32.vlgmr.msra.gmra.mrb[32].mxu0 %vm350_vm3, %v4350_v16 }
0x1fe0   :  { %6375 = vmatpush3.xpose.msk.msra.mxu0 %vm350_vm3, %v4519_v18  ;;  %6376 = vmatprep.mubr.msk.f32.mxu0 %vm6822_vm2, %v6823_v56 }
0x1fe1   :  { %6384 = vmatprep.subr.mxu0 %v6823_v56 }
0x1fe3   :  { %v4866_v20 = vpop.permute.xlu0 %4865  ;;  %6377 = vmatmul.mubr.msk.f32.vlgmr.msra.gmra.mrb[34].mxu0 %vm350_vm3, %v4517_v19 }
0x1fe4   :  { %6385 = vmatpush3.xpose.msk.msra.mxu0 %vm350_vm3, %v7564_v13  ;;  %6386 = vmatprep.mubr.msk.f32.mxu0 %vm6822_vm2, %v6823_v56 }
0x1fe5   :  { %6394 = vmatprep.subr.mxu0 %v6823_v56 }
0x1fe7   :  { %v5033_v22 = vpop.permute.xlu0 %5032  ;;  %6387 = vmatmul.mubr.msk.f32.vlgmr.msra.gmra.mrb[36].mxu0 %vm350_vm3, %v4698_v58 }
0x1fe8   :  { %6395 = vmatpush3.xpose.msk.msra.mxu0 %vm350_vm3, %v4866_v20  ;;  %6396 = vmatprep.mubr.msk.f32.mxu0 %vm6822_vm2, %v6823_v56 }
0x1fe9   :  { %6404 = vmatprep.subr.mxu0 %v6823_v56 }
0x1feb   :  { %v5200_v23 = vpop.permute.xlu0 %5199  ;;  %6397 = vmatmul.mubr.msk.f32.vlgmr.msra.gmra.mrb[38].mxu0 %vm350_vm3, %v4864_v21 }
0x1fec   :  { %6405 = vmatpush3.xpose.msk.msra.mxu0 %vm350_vm3, %v5033_v22  ;;  %6406 = vmatprep.mubr.msk.f32.mxu0 %vm6822_vm2, %v6823_v56 }
0x1fed   :  { %6414 = vmatprep.subr.mxu0 %v6823_v56 }
0x1fef   :  { %v4106_v26 = vpop.permute.xlu0 %4105  ;;  %6407 = vmatmul.mubr.msk.f32.vlgmr.msra.gmra.mrb[40].mxu0 %vm350_vm3, %v5031_v25 }
0x1ff0   :  { %6350 = vmatpush3.msk.msra.mxu1 %vm444_vm4, %v4106_v26  ;;  %6415 = vmatpush3.xpose.msk.msra.mxu0 %vm350_vm3, %v5200_v23 }
0x1ff1   :  { %6416 = vmatprep.mubr.msk.f32.mxu0 %vm6822_vm2, %v6823_v56  ;;  %6359 = vmatprep.subr.mxu1 %v6823_v56 }
0x1ff2   :  { %6573 = vmatprep.subr.bf16.mxu0 %v6821_v3 }
0x1ff3   :  { %6417 = vmatmul.mubr.msk.f32.vlgmr.msra.gmra.mrb[42].mxu0 %vm350_vm3, %v5198_v27 }
0x1ff4   :  { %6432 = vmatprep.mubr.msk.f32.mxu0 %vm6822_vm2, %v6823_v56 }
0x203c   :  { %v4088_v28 = vpop.f32.mrb[28].mxu0 }
0x203d   :  { %v4092_v29 = vmul.f32 0.35355338, %v4088_v28  ;;  %v6348_v30 = vpop.f32.mrb[29].mxu0 }
0x203f   :  { %v4094_v32 = vsel %vm4093_vm10, %v4092_v29, -inf }
0x2040   :  { %4095 = vmax.xlane.f32.xlu0 %v4094_v32 }
0x20ae   :  { %v4256_v33 = vpop.f32.mrb[30].mxu0 }
0x20af   :  { %v4260_v34 = vmul.f32 0.35355338, %v4256_v33  ;;  %v6358_v60 = vpop.f32.mrb[31].mxu0 }
0x20b1   :  { %v4261_v35 = vsel %vm4093_vm10, %v4260_v34, -inf }
0x20b2   :  { %4262 = vmax.xlane.f32.xlu1 %v4261_v35  ;;  %v4423_v36 = vpop.f32.mrb[32].mxu0 }
0x20b3   :  { %v4427_v38 = vmul.f32 0.35355338, %v4423_v36  ;;  %v6368_v39 = vpop.f32.mrb[33].mxu0 }
0x20b5   :  { %v4428_v0 = vsel %vm4093_vm10, %v4427_v38, -inf }
0x20b6   :  { %4429 = vmax.xlane.f32.xlu0 %v4428_v0  ;;  %v4590_v31 = vpop.f32.mrb[34].mxu0 }
0x20b7   :  { %v4594_v40 = vmul.f32 0.35355338, %v4590_v31  ;;  %v6378_v41 = vpop.f32.mrb[35].mxu0 }
0x20b9   :  { %v4595_v43 = vsel %vm4093_vm10, %v4594_v40, -inf }
0x20ba   :  { %4596 = vmax.xlane.f32.xlu0 %v4595_v43  ;;  %v4770_v45 = vpop.f32.mrb[36].mxu0 }
0x20bb   :  { %v4774_v46 = vmul.f32 0.35355338, %v4770_v45  ;;  %v6388_v47 = vpop.f32.mrb[37].mxu0 }
0x20bd   :  { %v4775_v24 = vsel %vm4093_vm10, %v4774_v46, -inf }
0x20be   :  { %4776 = vmax.xlane.f32.xlu1 %v4775_v24  ;;  %v4937_v48 = vpop.f32.mrb[38].mxu0 }
0x20bf   :  { %v4941_v37 = vmul.f32 0.35355338, %v4937_v48  ;;  %v6398_v49 = vpop.f32.mrb[39].mxu0 }
0x20c1   :  { %v4942_v50 = vsel %vm4093_vm10, %v4941_v37, -inf }
0x20c2   :  { %4943 = vmax.xlane.f32.xlu0 %v4942_v50  ;;  %v5104_v51 = vpop.f32.mrb[40].mxu0 }
0x20c3   :  { %v5108_v52 = vmul.f32 0.35355338, %v5104_v51  ;;  %v6408_v53 = vpop.f32.mrb[41].mxu0 }
0x20c5   :  { %v5109_v54 = vsel %vm4093_vm10, %v5108_v52, -inf }
0x20c6   :  { %5110 = vmax.xlane.f32.xlu1 %v5109_v54  ;;  %v5271_v55 = vpop.f32.mrb[42].mxu0 }
0x20c7   :  { %v5275_v57 = vmul.f32 0.35355338, %v5271_v55  ;;  %v6418_v58 = vpop.f32.mrb[43].mxu0 }
0x20c9   :  { %v5276_v44 = vsel %vm4093_vm10, %v5275_v57, -inf }
0x20ca   :  { %5277 = vmax.xlane.f32.xlu0 %v5276_v44 }
0x20cd   :  { %v4096_v59 = vpop.xlane.xlu0 %4095 }
0x20ce   :  { %v4097_v61 = vsub.f32 %v4092_v29, %v4096_v59 }
0x20d0   :  { %v4098_v63 = vmul.f32 1.442695, %v4097_v61 }
0x20d2   :  { %6732 = vpow2.f32 %v4098_v63 }
0x20d7   :  { %4606 = vrot.lane.b32.xlu1 %v7547_v11, %s6832_s15 }
0x20dc   :  { %v6733_v1 = vpop.eup %6732 }
0x20dd   :  { %v4100_v62 = vsel %vm4093_vm10, %v6733_v1, 0.0 }
0x20e0   :  { %4439 = vrot.lane.b32.xlu0 %v7547_v11, %s6829_s7 }
0x20fb   :  { %4101 = vadd.xlane.f32.xlu1 %v4100_v62 }
0x213f   :  { %v4263_v5 = vpop.xlane.xlu1 %4262 }
0x2140   :  { %v4264_v6 = vsub.f32 %v4260_v34, %v4263_v5 }
0x2142   :  { %v4265_v7 = vmul.f32 1.442695, %v4264_v6 }
0x2143   :  { %v4430_v8 = vpop.xlane.xlu0 %4429 }
0x2144   :  { %6734 = vpow2.f32 %v4265_v7  ;;  %v4431_v42 = vsub.f32 %v4427_v38, %v4430_v8 }
0x2146   :  { %v4432_v2 = vmul.f32 1.442695, %v4431_v42 }
0x2147   :  { %v4597_v9 = vpop.xlane.xlu0 %4596 }
0x2148   :  { %6736 = vpow2.f32 %v4432_v2  ;;  %v4598_v10 = vsub.f32 %v4594_v40, %v4597_v9 }
0x214a   :  { %v4599_v11 = vmul.f32 1.442695, %v4598_v10 }
0x214b   :  { %v4777_v19 = vpop.xlane.xlu1 %4776 }
0x214c   :  { %6738 = vpow2.f32 %v4599_v11  ;;  %v4778_v20 = vsub.f32 %v4774_v46, %v4777_v19 }
0x214e   :  { %v6735_v12 = vpop.eup %6734  ;;  %v4779_v25 = vmul.f32 1.442695, %v4778_v20  ;;  %v5385_v20 = vld [vmem:[%s7776_s14 + $0x10] sm:$0xff] }
0x214f   :  { %v4267_v14 = vsel %vm4093_vm10, %v6735_v12, 0.0  ;;  %v4944_v21 = vpop.xlane.xlu0 %4943 }
0x2150   :  { %4268 = vadd.xlane.f32.xlu0 %v4267_v14  ;;  %v4945_v23 = vsub.f32 %v4941_v37, %v4944_v21  ;;  %6740 = vpow2.f32 %v4779_v25  ;;  %v5386_v21 = vld [vmem:[%s7776_s14 + $0x18] sm:$0xff] }
0x2152   :  { %v6737_v15 = vpop.eup %6736  ;;  %v4946_v28 = vmul.f32 1.442695, %v4945_v23 }
0x2153   :  { %v4434_v16 = vsel %vm4093_vm10, %v6737_v15, 0.0  ;;  %v5111_v22 = vpop.xlane.xlu1 %5110 }
0x2154   :  { %4435 = vadd.xlane.f32.xlu1 %v4434_v16  ;;  %v5112_v26 = vsub.f32 %v5108_v52, %v5111_v22  ;;  %6742 = vpow2.f32 %v4946_v28  ;;  %v5384_v16 = vld [vmem:[%s7776_s14 + $0x8] sm:$0xff]  ;;  %v6577_v22 = vpack.c.bf16 %v5386_v21, %v5385_v20 }
0x2156   :  { %v7627_v17 = vpop.eup %6738  ;;  %v5113_v29 = vmul.f32 1.442695, %v5112_v26 }
0x2157   :  { %v4601_v18 = vsel %vm4093_vm10, %v7627_v17, 0.0  ;;  %v5278_v27 = vpop.xlane.xlu0 %5277  ;;  %v4607_v33 = vpop.permute.xlu1 %4606 }
0x2158   :  { %4602 = vadd.xlane.f32.xlu0 %v4601_v18  ;;  %v5279_v30 = vsub.f32 %v5275_v57, %v5278_v27  ;;  %6744 = vpow2.f32 %v5113_v29 }
0x215a   :  { %v5280_v32 = vmul.f32 1.442695, %v5279_v30  ;;  %v6741_v34 = vpop.eup %6740 }
0x215b   :  { %v4781_v36 = vsel %vm4093_vm10, %v6741_v34, 0.0  ;;  %v4440_v45 = vpop.permute.xlu0 %4439 }
0x215c   :  { %6746 = vpow2.f32 %v5280_v32 }
0x215e   :  { %v7635_v60 = vpop.eup %6742 }
0x215f   :  { %v4948_v0 = vsel %vm4093_vm10, %v7635_v60, 0.0 }
0x2162   :  { %v7638_v38 = vpop.eup %6744 }
0x2163   :  { %v5115_v39 = vsel %vm4093_vm10, %v7638_v38, 0.0 }
0x2165   :  { %4953 = vrot.lane.b32.xlu1 %v7564_v13, %s6826_s9 }
0x2166   :  { %v7644_v31 = vpop.eup %6746 }
0x2167   :  { %v5282_v40 = vsel %vm4093_vm10, %v7644_v31, 0.0 }
0x216e   :  { %4786 = vrot.lane.b32.xlu0 %v7564_v13, %s6825_s5 }
0x2188   :  { %v4102_v35 = vpop.xlane.xlu1 %4101 }
0x2189   :  { %6748 = vrcp.f32 %v4102_v35  ;;  %4782 = vadd.xlane.f32.xlu1 %v4781_v36 }
0x218d   :  { %5116 = vadd.xlane.f32.xlu1 %v5115_v39  ;;  %4949 = vadd.xlane.f32.xlu0 %v4948_v0 }
0x2191   :  { %5283 = vadd.xlane.f32.xlu1 %v5282_v40 }
0x2193   :  { %v6749_v41 = vpop.eup %6748 }
0x2194   :  { %v4104_v43 = vmul.f32 %v6749_v41, %v6733_v1 }
0x2196   :  { %6352 = vmatmul.mubr.msk.f32.vlgmr.msra.gmra.mrb[58].mxu1 %vm440_vm6, %v4104_v43 }
0x2197   :  { %6360 = vmatpush3.msk.msra.mxu1 %vm444_vm4, %v4273_v4  ;;  %6361 = vmatprep.mubr.msk.f32.mxu1 %vm6822_vm2, %v6823_v56 }
0x2198   :  { %6369 = vmatprep.subr.mxu1 %v6823_v56 }
0x21a2   :  { %5287 = vrot.lane.b32.xlu1 %v7564_v13, %s6832_s15 }
0x21a3   :  { %5120 = vrot.lane.b32.xlu0 %v7564_v13, %s6829_s7 }
0x21dd   :  { %v4269_v46 = vpop.xlane.xlu0 %4268 }
0x21de   :  { %6750 = vrcp.f32 %v4269_v46 }
0x21e1   :  { %v4436_v47 = vpop.xlane.xlu1 %4435 }
0x21e2   :  { %6752 = vrcp.f32 %v4436_v47 }
0x21e5   :  { %v4603_v24 = vpop.xlane.xlu0 %4602  ;;  %v4954_v53 = vpop.permute.xlu1 %4953 }
0x21e6   :  { %6754 = vrcp.f32 %v4603_v24 }
0x21e8   :  { %v6751_v48 = vpop.eup %6750 }
0x21e9   :  { %v4271_v37 = vmul.f32 %v6751_v48, %v6735_v12  ;;  %v4787_v52 = vpop.permute.xlu0 %4786 }
0x21eb   :  { %6362 = vmatmul.mubr.msk.f32.vlgmr.msra.gmra.mrb[60].mxu1 %vm440_vm6, %v4271_v37 }
0x21ec   :  { %v6753_v49 = vpop.eup %6752  ;;  %6370 = vmatpush3.msk.msra.mxu1 %vm444_vm4, %v4440_v45  ;;  %6371 = vmatprep.mubr.msk.f32.mxu1 %vm6822_vm2, %v6823_v56  ;;  %v5877_v45 = vld [vmem:[%s7777_s19] ss:$0 sm:$0xff] }
0x21ed   :  { %v4438_v50 = vmul.f32 %v6753_v49, %v6737_v15  ;;  %6379 = vmatprep.subr.mxu1 %v6823_v56  ;;  %v5383_v15 = vld [vmem:[%s7776_s14] sm:$0xff] }
0x21ef   :  { %6372 = vmatmul.mubr.msk.f32.vlgmr.msra.gmra.mrb[62].mxu1 %vm440_vm6, %v4438_v50 }
0x21f0   :  { %v6755_v13 = vpop.eup %6754  ;;  %6380 = vmatpush3.msk.msra.mxu1 %vm444_vm4, %v4607_v33  ;;  %6381 = vmatprep.mubr.msk.f32.mxu1 %vm6822_vm2, %v6823_v56 }
0x21f1   :  { %v4605_v51 = vmul.f32 %v6755_v13, %v7627_v17  ;;  %6389 = vmatprep.subr.mxu1 %v6823_v56  ;;  %v6574_v17 = vpack.c.bf16 %v5384_v16, %v5383_v15  ;;  %v5597_v15 = vld [vmem:[%s6982_s20 + $0x38] sm:$0xff] }
0x21f3   :  { %6382 = vmatmul.mubr.msk.f32.vlgmr.msra.gmra.mrb[64].mxu1 %vm440_vm6, %v4605_v51  ;;  %6575 = vmatpush3.bf16.msra.mxu0 %v6574_v17  ;;  %v5881_v17 = vld [vmem:[%s6977_s6] ss:$0 sm:$0xff] }
0x21f4   :  { %6390 = vmatpush3.msk.msra.mxu1 %vm444_vm4, %v4787_v52  ;;  %6391 = vmatprep.mubr.msk.f32.mxu1 %vm6822_vm2, %v6823_v56  ;;  %v5498_v52 = vld [vmem:[%s7778_s24 + $0x8] sm:$0xff] }
0x21f5   :  { %6399 = vmatprep.subr.mxu1 %v6823_v56  ;;  %6576 = vmatprep.subr.bf16.mxu0 %v6821_v3 }
0x21f7   :  { %6578 = vmatpush3.bf16.msra.mxu0 %v6577_v22 }
0x21f8   :  { %6585 = vmatprep.subr.bf16.mxu0 %v6821_v3 }
0x2216   :  { %v4783_v54 = vpop.xlane.xlu1 %4782 }
0x2217   :  { %6756 = vrcp.f32 %v4783_v54  ;;  %v5499_v54 = vld [vmem:[%s7778_s24 + $0x10] sm:$0xff] }
0x221a   :  { %v5117_v55 = vpop.xlane.xlu1 %5116  ;;  %v4950_v57 = vpop.xlane.xlu0 %4949 }
0x221b   :  { %6758 = vrcp.f32 %v4950_v57 }
0x221c   :  { %6760 = vrcp.f32 %v5117_v55  ;;  %v5500_v55 = vld [vmem:[%s7778_s24 + $0x18] sm:$0xff] }
0x221d   :  { %v6583_v57 = vpack.c.bf16 %v5500_v55, %v5499_v54 }
0x221e   :  { %v5284_v58 = vpop.xlane.xlu1 %5283  ;;  %v5121_v62 = vpop.permute.xlu0 %5120 }
0x221f   :  { %6762 = vrcp.f32 %v5284_v58 }
0x2221   :  { %v6757_v44 = vpop.eup %6756 }
0x2222   :  { %v4785_v59 = vmul.f32 %v6757_v44, %v6741_v34  ;;  %v5288_v6 = vpop.permute.xlu1 %5287 }
0x2224   :  { %6392 = vmatmul.mubr.msk.f32.vlgmr.msra.gmra.mrb[66].mxu1 %vm440_vm6, %v4785_v59 }
0x2225   :  { %6400 = vmatpush3.msk.msra.mxu1 %vm444_vm4, %v4954_v53  ;;  %6401 = vmatprep.mubr.msk.f32.mxu1 %vm6822_vm2, %v6823_v56  ;;  %v6759_v61 = vpop.eup %6758 }
0x2226   :  { %6409 = vmatprep.subr.mxu1 %v6823_v56  ;;  %v4952_v63 = vmul.f32 %v6759_v61, %v7635_v60  ;;  %v6761_v1 = vpop.eup %6760 }
0x2227   :  { %v5119_v4 = vmul.f32 %v6761_v1, %v7638_v38 }
0x2228   :  { %6402 = vmatmul.mubr.msk.f32.vlgmr.msra.gmra.mrb[68].mxu1 %vm440_vm6, %v4952_v63  ;;  %v5879_v63 = vld [vmem:[%s7779_s30] ss:$0 sm:$0xff] }
0x2229   :  { %6410 = vmatpush3.msk.msra.mxu1 %vm444_vm4, %v5121_v62  ;;  %6411 = vmatprep.mubr.msk.f32.mxu1 %vm6822_vm2, %v6823_v56  ;;  %v6763_v5 = vpop.eup %6762  ;;  %v5880_v62 = vld [vmem:[%s7780_s12] ss:$0 sm:$0xff] }
0x222a   :  { %6419 = vmatprep.subr.mxu1 %v6823_v56  ;;  %v5286_v7 = vmul.f32 %v6763_v5, %v7644_v31 }
0x222c   :  { %6412 = vmatmul.mubr.msk.f32.vlgmr.msra.gmra.mrb[70].mxu1 %vm440_vm6, %v5119_v4 }
0x222d   :  { %6420 = vmatpush3.msk.msra.mxu1 %vm444_vm4, %v5288_v6  ;;  %6421 = vmatprep.mubr.msk.f32.mxu1 %vm6822_vm2, %v6823_v56  ;;  %v5590_v6 = vld [vmem:[%s6982_s20] sm:$0xff] }
0x222e   :  { %6579 = vmatprep.subr.bf16.mxu1 %v6821_v3 }
0x2230   :  { %6422 = vmatmul.mubr.msk.f32.vlgmr.msra.gmra.mrb[72].mxu1 %vm440_vm6, %v5286_v7  ;;  %v5591_v7 = vld [vmem:[%s6982_s20 + $0x8] sm:$0xff] }
0x2231   :  { %6443 = vmatprep.mubr.msk.f32.mxu1 %vm6822_vm2, %v6823_v56 }
0x2269   :  { %v4178_v8 = vpop.f32.mrb[58].mxu1 }
0x226a   :  { %v6353_v42 = vpop.f32.mrb[59].mxu1 }
0x226b   :  { %v5592_v42 = vld [vmem:[%s6982_s20 + $0x10] sm:$0xff] }
0x22be   :  { %v4345_v2 = vpop.f32.mrb[60].mxu1 }
0x22bf   :  { %4684 = vrot.lane.b32.xlu0 %v4345_v2, %s6835_s22  ;;  %v6363_v9 = vpop.f32.mrb[61].mxu1  ;;  %v5593_v2 = vld [vmem:[%s6982_s20 + $0x18] sm:$0xff] }
0x22c0   :  { %v6589_v9 = vpack.c.bf16 %v5593_v2, %v5592_v42 }
0x22c2   :  { %v4512_v10 = vpop.f32.mrb[62].mxu1 }
0x22c3   :  { %v6373_v11 = vpop.f32.mrb[63].mxu1 }
0x22c4   :  { %v5595_v11 = vld [vmem:[%s6982_s20 + $0x28] sm:$0xff] }
0x22c6   :  { %v4679_v12 = vpop.f32.mrb[64].mxu1 }
0x22c7   :  { %v6383_v14 = vpop.f32.mrb[65].mxu1 }
0x22c8   :  { %v5596_v14 = vld [vmem:[%s6982_s20 + $0x30] sm:$0xff] }
0x22c9   :  { %v6595_v16 = vpack.c.bf16 %v5597_v15, %v5596_v14 }
0x22f7   :  { %v4859_v18 = vpop.f32.mrb[66].mxu1 }
0x22f8   :  { %v6393_v19 = vpop.f32.mrb[67].mxu1 }
0x22fb   :  { %v5026_v23 = vpop.f32.mrb[68].mxu1 }
0x22fc   :  { %5365 = vrot.lane.b32.xlu0 %v5026_v23, %s6835_s22  ;;  %v6403_v25 = vpop.f32.mrb[69].mxu1 }
0x22ff   :  { %v5193_v26 = vpop.f32.mrb[70].mxu1 }
0x2300   :  { %4688 = vrot.lane.b32.xlu0 %v4512_v10, %s6836_s23  ;;  %5369 = vrot.lane.b32.xlu1 %v5193_v26, %s6836_s23  ;;  %v6413_v27 = vpop.f32.mrb[71].mxu1  ;;  %v5594_v10 = vld [vmem:[%s6982_s20 + $0x20] sm:$0xff]  ;;  %s6838_s20 = smov [#allocation2]  }
0x2301   :  { %s5686_s2 = sshll.u32 %s6838_s20, 4  ;;  %s5687_s2 = int_to_ptr.vmem [resolvable:$true] %s5686_s2 }
0x2302   :  { %s6768_s6 = scalar_lea.vmem %s5687_s2, 32  ;;  %p6773_p1 = scmp.lt.s32.totalorder %s5687_s2, %s5687_s2 }
0x2303   :  { %v5360_v28 = vpop.f32.mrb[72].mxu1  ;;  %p6769_p0 = scmp.ne.s32.totalorder %s5687_s2, %s6768_s6  ;;  %p6774_p2 = scmp.lt.s32.totalorder %s6768_s6, %s6768_s6 }
0x2304   :  { %5373 = vrot.lane.b32.xlu1 %v5360_v28, %s6837_s26  ;;  %v6423_v29 = vpop.f32.mrb[73].mxu1 }
0x2305   :  { %p6775_p3 = por %p6774_p2, %p6773_p1 }
0x2307   :  { %p6776_p4 = pnand %p6775_p3, %p6769_p0 }
0x2308   :  { %4692 = vrot.lane.b32.xlu1 %v4679_v12, %s6837_s26  ;;  %v6592_v12 = vpack.c.bf16 %v5595_v11, %v5594_v10 }
0x2331   :  { %v4685_v30 = vpop.permute.xlu0 %4684 }
0x2332   :  { %v4695_v39 = vsel %vm350_vm3, %v4178_v8, %v4685_v30  ;;  %v6586_v8 = vpack.c.bf16 %v5591_v7, %v5590_v6 }
0x236e   :  { %v5366_v32 = vpop.permute.xlu0 %5365 }
0x236f   :  { %v5376_v34 = vsel %vm350_vm3, %v4859_v18, %v5366_v32  ;;  %v5883_v32 = vld [vmem:[%s6987_s27] ss:$0 sm:$0xff] }
0x2372   :  { %v5370_v33 = vpop.permute.xlu1 %5369  ;;  %v4689_v36 = vpop.permute.xlu0 %4688 }
0x2373   :  { %v5377_v60 = vsel %vm1031_vm7, %v5376_v34, %v5370_v33  ;;  %v4696_v0 = vsel %vm1031_vm7, %v4695_v39, %v4689_v36 }
0x2376   :  { %v5374_v35 = vpop.permute.xlu1 %5373 }
0x2377   :  { %v5378_v38 = vsel %vm1033_vm8, %v5377_v60, %v5374_v35 }
0x2378   :  { %v5380_v31 = vrot.slane %v5378_v38, 7 }
0x237a   :  { %v4693_v40 = vpop.permute.xlu1 %4692 }
0x237b   :  { %v4697_v41 = vsel %vm1033_vm8, %v4696_v0, %v4693_v40 }
0x237c   :  { %v5382_v43 = vsel %vm4014_vm9, %v4697_v41, %v5380_v31 }
0x237d   :  { %6433 = vmatmul.mubr.msk.f32.vlgmr.msra.gmra.mrb[44].mxu0 %vm234_vm1, %v5382_v43 }
0x237e   :  { %6462 = vmatprep.mubr.msk.f32.mxu0 %vm6822_vm2, %v6823_v56  ;;  %v5497_v56 = vld [vmem:[%s7778_s24] sm:$0xff]  ;;  %6587 = vmatpush3.bf16.msra.mxu0 %v6586_v8 }
0x237f   :  { %v6580_v53 = vpack.c.bf16 %v5498_v52, %v5497_v56  ;;  %6588 = vmatprep.subr.bf16.mxu0 %v6821_v3 }
0x2381   :  { %6581 = vmatpush3.bf16.msra.mxu1 %v6580_v53 }
0x2382   :  { %6582 = vmatprep.subr.bf16.mxu1 %v6821_v3  ;;  %6590 = vmatpush3.bf16.msra.mxu0 %v6589_v9 }
0x2383   :  { %6591 = vmatprep.subr.bf16.mxu0 %v6821_v3 }
0x2385   :  { %6584 = vmatpush3.bf16.msra.mxu1 %v6583_v57 }
0x2386   :  { %6593 = vmatpush3.bf16.msra.mxu0 %v6592_v12 }
0x2387   :  { %6594 = vmatprep.subr.bf16.mxu0 %v6821_v3 }
0x238a   :  { %6596 = vmatpush3.bf16.msra.mxu0 %v6595_v16 }
0x2450   :  { %v5463_v46 = vpop.f32.mrb[44].mxu0 }
0x2451   :  { %v7717_v47 = vadd.f32 %v5877_v45, %v5463_v46  ;;  %v6434_v24 = vpop.f32.mrb[45].mxu0 }
0x2453   :  { %v5470_v48 = vsel %vm5469_vm11, %v7717_v47, 0.0 }
0x2454   :  { %5471 = vadd.xlane.f32.xlu0 %v5470_v48 }
0x24e1   :  { %v5472_v37 = vpop.xlane.xlu0 %5471 }
0x24e2   :  { %v5473_v49 = vmul.f32 0.03125, %v5472_v37 }
0x24e4   :  { %v5474_v50 = vsub.f32 %v7717_v47, %v5473_v49 }
0x24e6   :  { %v5475_v13 = vmul.f32 %v5474_v50, %v5474_v50 }
0x24e8   :  { %v5476_v51 = vsel %vm5469_vm11, %v5475_v13, 0.0 }
0x24e9   :  { %5477 = vadd.xlane.f32.xlu1 %v5476_v51 }
0x2576   :  { %v5478_v58 = vpop.xlane.xlu1 %5477 }
0x2577   :  { %v5479_v44 = vmul.f32 0.03125, %v5478_v58 }
0x2579   :  { %v5480_v59 = vadd.f32 1e-06, %v5479_v44 }
0x257b   :  { %6764 = vrsqrt.f32 %v5480_v59 }
0x2585   :  { %v6765_v61 = vpop.eup %6764 }
0x2586   :  { %v5482_v1 = vmul.f32 %v6765_v61, %v5474_v50 }
0x2588   :  { %v5489_v4 = vmul.f32 %v5879_v63, %v5482_v1 }
0x258a   :  { %v5496_v5 = vadd.f32 %v5880_v62, %v5489_v4 }
0x258c   :  { %6444 = vmatmul.mubr.msk.f32.vlgmr.msra.gmra.mrb[74].mxu1 %vm234_vm1, %v5496_v5 }
0x265f   :  { %v5577_v18 = vpop.f32.mrb[74].mxu1 }
0x2660   :  { %v5578_v19 = vadd.f32 %v5881_v17, %v5577_v18  ;;  %v6445_v20 = vpop.f32.mrb[75].mxu1 }
0x2662   :  { %v5582_v21 = vmul.f32 0.044715, %v5578_v19  ;;  %v5581_v28 = vmul.f32 0.5, %v5578_v19 }
0x2664   :  { %v5583_v22 = vmul.f32 %v5582_v21, %v5578_v19 }
0x2666   :  { %v5584_v23 = vmul.f32 %v5583_v22, %v5578_v19 }
0x2668   :  { %v5585_v25 = vadd.f32 %v5584_v23, %v5578_v19 }
0x266a   :  { %v5586_v26 = vmul.f32 0.7978846, %v5585_v25 }
0x266c   :  { %6766 = vtanh.f32 %v5586_v26 }
0x2676   :  { %v6767_v27 = vpop.eup %6766 }
0x2677   :  { %v5588_v29 = vadd.f32 1.0, %v6767_v27 }
0x2679   :  { %v5589_v30 = vmul.f32 %v5588_v29, %v5581_v28 }
0x267b   :  { %6463 = vmatmul.mubr.msk.f32.vlgmr.msra.gmra.mrb[46].mxu0 %vm156_vm0, %v5589_v30 }
0x274e   :  { %v5674_v3 = vpop.f32.mrb[46].mxu0 }
0x274f   :  { %v5675_v33 = vadd.f32 %v5883_v32, %v5674_v3  ;;  %v6464_v34 = vpop.f32.mrb[47].mxu0 }
0x2751   :  { %v5678_v60 = vadd.f32 %v5675_v33, %v7717_v47 }
0x2753   :  { %5679 = vst.msk [vmem:[#allocation2] sm:$0x3] %vm5469_vm11, %v5678_v60 }
0x2754   :  { %6779 = shalt.err (!%p6776_p4)
}
0x2755   :  { %s6780_s27 = scalar_lea.hbm %s6992_s4, 32 }
0x2756   :  { %p6781_p5 = scmp.ne.s32.totalorder %s6992_s4, %s6780_s27  ;;  %p6784_p6 = scmp.lt.u32.totalorder %s6780_s27, %s6992_s4 }
0x2758   :  { %p6786_p7 = pnand %p6784_p6, %p6781_p5 }
0x275a   :  { %6789 = shalt.err (!%p6786_p7)
}
0x275b   :  { %5689 = dma.vmem_to_hbm [thread:$0]  %s5687_s2, 32, %s6992_s4, [#allocation3]  }
0x275c   :  { %6790 = dma.done.wait [#allocation3], 32  }
0x275d   :  { %6791 = vsyncadd [#allocation3], 4294967264 }
0x275e   :  { %5693 = vsyncpa [#allocation3], 1 }

</bundles_post_ra>
